<compile_context>
chip_gen: v5e
topology: v5e:2x2
jax: 0.10.0
libtpu: 0.0.40
codegen_flags: <defaults>
</compile_context>

<pallas_src>
import math

import jax
import jax.numpy as jnp
from jax.experimental import pallas as pl
from jax.experimental.pallas import tpu as pltpu

# ----------------------------- small synthetic config -----------------------------
VOCAB = 128
HIDDEN = 64                         # base model hidden size
INTER = 128                         # MLP intermediate size
N_LAYERS = 2
N_HEADS = 4
N_KV_HEADS = 2                      # GQA, like Llama-3.2
HEAD_DIM = HIDDEN // N_HEADS        # 16
GROUP = N_HEADS // N_KV_HEADS       # 2
Q_DIM = N_HEADS * HEAD_DIM          # 64
KV_DIM = N_KV_HEADS * HEAD_DIM      # 32
HEAD_HID = HIDDEN // 2              # head intermediate (32)
OUT_PAD = 128                       # lane-dense padded width of the final output
RMS_EPS = 1e-5
LN_EPS = 1e-5
ROPE_THETA = 10000.0


# ================================ fused Pallas kernel ================================

def _network_kernel(h_ref, bias_ref, cosq_ref, sinq_ref, cosk_ref, sink_ref,
                    rotq_ref, rotk_ref, pool_ref,
                    anorm_ref, wq_ref, wkv_ref, wo_ref,
                    mnorm_ref, wgu_ref, wd_ref,
                    fnorm_ref, w1_ref, b1_ref, gam_ref, bet_ref, w2_ref, b2_ref,
                    o_ref):
    """Entire network forward for the whole (flattened) batch in one grid step."""
    BT = h_ref.shape[0]                       # B*T (static)
    h = h_ref[...]                            # (BT, D) flat hidden state
    bias = bias_ref[...]                      # (H*BT, BT) causal+padding bias, head-tiled
    cos_q = cosq_ref[...]; sin_q = sinq_ref[...]   # (BT, Q_DIM)
    cos_k = cosk_ref[...]; sin_k = sink_ref[...]   # (BT, KV_DIM)
    rot_q = rotq_ref[...]; rot_k = rotk_ref[...]   # rotate_half as +/-1 block-diag mats
    scale = 1.0 / math.sqrt(HEAD_DIM)

    for l in range(N_LAYERS):                 # static unrolled layer loop (weights in VMEM)
        # ---------------- attention sub-block ----------------
        var = jnp.mean(h * h, axis=-1, keepdims=True)
        xn = h * jax.lax.rsqrt(var + RMS_EPS) * anorm_ref[l]

        q = jnp.dot(xn, wq_ref[l], preferred_element_type=jnp.float32)      # (BT, 64)
        kvp = jnp.dot(xn, wkv_ref[l], preferred_element_type=jnp.float32)   # (BT, 64)
        k = kvp[:, :KV_DIM]
        v = kvp[:, KV_DIM:]

        # RoPE on whole q/k slabs; rotate_half via constant matrix (MXU, no lane shuffle)
        q = (q * cos_q
             + jnp.dot(q, rot_q, preferred_element_type=jnp.float32) * sin_q) * scale
        k = (k * cos_k
             + jnp.dot(k, rot_k, preferred_element_type=jnp.float32) * sin_k)

        # Per-head QK^T, stacked along SUBLANES -> single softmax pass for all heads.
        s_parts = []
        for hh in range(N_HEADS):
            qh = q[:, hh * HEAD_DIM:(hh + 1) * HEAD_DIM]
            kh = k[:, (hh // GROUP) * HEAD_DIM:(hh // GROUP + 1) * HEAD_DIM]
            s_parts.append(jax.lax.dot_general(
                qh, kh, (((1,), (1,)), ((), ())),
                preferred_element_type=jnp.float32))                        # (BT, BT)
        s = jnp.concatenate(s_parts, axis=0) + bias                          # (H*BT, BT)
        m = jnp.max(s, axis=-1, keepdims=True)
        p = jnp.exp(s - m)
        p = p * pl.reciprocal(jnp.sum(p, axis=-1, keepdims=True), approx=True)

        # One PV matmul per KV head (GQA sharing, no repeat); fold the per-head
        # output concatenate into WO by summing o_h @ WO_h (sublane slices only).
        wo = wo_ref[l]                                                       # (D, D)
        for kvh in range(N_KV_HEADS):
            pg = p[kvh * GROUP * BT:(kvh + 1) * GROUP * BT, :]               # (GROUP*BT, BT)
            vg = v[:, kvh * HEAD_DIM:(kvh + 1) * HEAD_DIM]                   # (BT, Dh)
            og = jnp.dot(pg, vg, preferred_element_type=jnp.float32)         # (GROUP*BT, Dh)
            for j in range(GROUP):
                hh = kvh * GROUP + j
                oh = og[j * BT:(j + 1) * BT, :]                              # (BT, Dh)
                h = h + jnp.dot(oh, wo[hh * HEAD_DIM:(hh + 1) * HEAD_DIM, :],
                                preferred_element_type=jnp.float32)

        # ---------------- MLP sub-block ----------------
        var2 = jnp.mean(h * h, axis=-1, keepdims=True)
        xn2 = h * jax.lax.rsqrt(var2 + RMS_EPS) * mnorm_ref[l]
        gu = jnp.dot(xn2, wgu_ref[l], preferred_element_type=jnp.float32)    # (BT, 256)
        gg = gu[:, :INTER]                                                   # vreg-boundary split
        uu = gu[:, INTER:]
        act = gg * jax.nn.sigmoid(gg) * uu                                   # SwiGLU
        h = h + jnp.dot(act, wd_ref[l], preferred_element_type=jnp.float32)

    # ---------------- final RMSNorm + masked mean pooling + head ----------------
    var = jnp.mean(h * h, axis=-1, keepdims=True)
    hn = h * jax.lax.rsqrt(var + RMS_EPS) * fnorm_ref[...]
    # pool is the pre-normalized block-diagonal mask (B, BT) -> masked mean in one matmul
    mean_emb = jnp.dot(pool_ref[...], hn, preferred_element_type=jnp.float32)    # (B, D)

    x = jnp.dot(mean_emb, w1_ref[...], preferred_element_type=jnp.float32) + b1_ref[...]
    mu = jnp.mean(x, axis=-1, keepdims=True)
    varx = jnp.mean((x - mu) * (x - mu), axis=-1, keepdims=True)
    x = (x - mu) * jax.lax.rsqrt(varx + LN_EPS) * gam_ref[...] + bet_ref[...]
    x = 0.5 * x * (1.0 + jax.lax.erf(x * (1.0 / math.sqrt(2.0))))            # exact GELU
    # Dropout(0.1) is identity in eval/inference mode.
    # w2 / b2 are zero-padded to lane width 128; only column 0 is meaningful.
    o_ref[...] = jnp.dot(x, w2_ref[...], preferred_element_type=jnp.float32) + b2_ref[...]


# ================================ JAX glue =====================================

def _rotate_half_matrix(width):
    """Block-diagonal +/-1 matrix R such that x @ R == HF rotate_half(x) per head."""
    half = HEAD_DIM // 2
    i = jnp.arange(width)
    j = jnp.arange(width)
    same_head = (i[:, None] // HEAD_DIM) == (j[None, :] // HEAD_DIM)
    ii = i[:, None] % HEAD_DIM
    jj = j[None, :] % HEAD_DIM
    plus = same_head & (ii < half) & (jj == ii + half)
    minus = same_head & (ii >= half) & (jj == ii - half)
    return jnp.where(plus, 1.0, jnp.where(minus, -1.0, 0.0)).astype(jnp.float32)


def network_forward(params, input_ids, attention_mask):
    B, T = input_ids.shape
    BT = B * T
    D = HIDDEN

    # Embedding gather stays in plain JAX (glue).
    h0 = params["embed"][input_ids.reshape(-1)]                # (BT, D)
    mask_f = attention_mask.astype(jnp.float32).reshape(BT)

    idx = jnp.arange(BT, dtype=jnp.int32)
    bvec = idx // T                                            # batch id per flat row
    pvec = idx % T                                             # position per flat row

    # Block-diagonal causal + key-padding additive bias, hoisted out of the kernel
    # (it is layer- and head-invariant); tiled over heads on the sublane axis.
    allowed = ((bvec[:, None] == bvec[None, :]) &
               (pvec[:, None] >= pvec[None, :]) &
               (mask_f[None, :] > 0.5))
    bias = jnp.where(allowed, 0.0, -1e9).astype(jnp.float32)   # (BT, BT)
    bias_tiled = jnp.tile(bias, (N_HEADS, 1))                  # (H*BT, BT)

    # RoPE tables per flat row, tiled across heads on the lane axis.
    inv_freq = 1.0 / (ROPE_THETA ** (jnp.arange(0, HEAD_DIM, 2, dtype=jnp.float32) / HEAD_DIM))
    freqs = pvec.astype(jnp.float32)[:, None] * inv_freq[None, :]        # (BT, Dh/2)
    emb = jnp.concatenate([freqs, freqs], axis=-1)                        # (BT, Dh)
    cos_f, sin_f = jnp.cos(emb), jnp.sin(emb)
    cos_q = jnp.tile(cos_f, (1, N_HEADS)); sin_q = jnp.tile(sin_f, (1, N_HEADS))
    cos_k = jnp.tile(cos_f, (1, N_KV_HEADS)); sin_k = jnp.tile(sin_f, (1, N_KV_HEADS))

    rot_q = _rotate_half_matrix(Q_DIM)
    rot_k = _rotate_half_matrix(KV_DIM)

    # Pre-normalized masked-mean pooling weights (clamp matches torch.clamp(min=1e-9)).
    counts = jnp.maximum(jnp.sum(mask_f.reshape(B, T), axis=1, keepdims=True), 1e-9)
    pool = ((jnp.arange(B, dtype=jnp.int32)[:, None] == bvec[None, :]).astype(jnp.float32)
            * mask_f[None, :]) / counts                                   # (B, BT)

    st = params["stack"]
    head = params["head"]

    def full(shape):
        return pl.BlockSpec(shape, lambda i, _s=shape: (0,) * len(_s))

    out = pl.pallas_call(
        _network_kernel,
        out_shape=jax.ShapeDtypeStruct((B, OUT_PAD), jnp.float32),
        grid=(1,),
        in_specs=[
            full((BT, D)),                       # h0
            full((N_HEADS * BT, BT)),            # bias (head-tiled)
            full((BT, Q_DIM)),                   # cos_q
            full((BT, Q_DIM)),                   # sin_q
            full((BT, KV_DIM)),                  # cos_k
            full((BT, KV_DIM)),                  # sin_k
            full((Q_DIM, Q_DIM)),                # rot_q
            full((KV_DIM, KV_DIM)),              # rot_k
            full((B, BT)),                       # pool
            full((N_LAYERS, 1, D)),              # attn norms (stacked over layers)
            full((N_LAYERS, D, Q_DIM)),          # wq
            full((N_LAYERS, D, 2 * KV_DIM)),     # wkv
            full((N_LAYERS, D, D)),              # wo
            full((N_LAYERS, 1, D)),              # mlp norms
            full((N_LAYERS, D, 2 * INTER)),      # wgu
            full((N_LAYERS, INTER, D)),          # wd
            full((1, D)),                        # final norm
            full((D, HEAD_HID)),                 # head w1
            full((1, HEAD_HID)),                 # head b1
            full((1, HEAD_HID)),                 # LN gamma
            full((1, HEAD_HID)),                 # LN beta
            full((HEAD_HID, OUT_PAD)),           # head w2 (lane-padded)
            full((1, OUT_PAD)),                  # head b2 (lane-padded)
        ],
        out_specs=full((B, OUT_PAD)),
        compiler_params=pltpu.CompilerParams(
            dimension_semantics=("arbitrary",)),
    )(h0, bias_tiled, cos_q, sin_q, cos_k, sin_k, rot_q, rot_k, pool,
      st["anorm"], st["wq"], st["wkv"], st["wo"], st["mnorm"], st["wgu"], st["wd"],
      params["final_norm"], head["w1"], head["b1"], head["gamma"], head["beta"],
      head["w2p"], head["b2p"])
    return out[:, :1]


# ================================ params init ==================================

def init_params(key):
    D, D2 = HIDDEN, HEAD_HID
    keys = iter(jax.random.split(key, 64))

    def nrm(shape, std=0.02):
        return (std * jax.random.normal(next(keys), shape)).astype(jnp.float32)

    wq, wkv, wo, wgu, wd = [], [], [], [], []
    for _ in range(N_LAYERS):
        wq.append(nrm((D, Q_DIM)))
        wk = nrm((D, KV_DIM))
        wv = nrm((D, KV_DIM))
        wkv.append(jnp.concatenate([wk, wv], axis=1))          # (D, 64)
        wo.append(nrm((Q_DIM, D)))
        wg = nrm((D, INTER))
        wu = nrm((D, INTER))
        wgu.append(jnp.concatenate([wg, wu], axis=1))          # (D, 256)
        wd.append(nrm((INTER, D)))

    stack = dict(
        anorm=jnp.ones((N_LAYERS, 1, D), jnp.float32),
        wq=jnp.stack(wq),
        wkv=jnp.stack(wkv),
        wo=jnp.stack(wo),
        mnorm=jnp.ones((N_LAYERS, 1, D), jnp.float32),
        wgu=jnp.stack(wgu),
        wd=jnp.stack(wd),
    )

    w2 = nrm((D2, 1))
    b2 = nrm((1, 1))
    head = dict(
        w1=nrm((D, D2)),
        b1=nrm((1, D2)),
        gamma=jnp.ones((1, D2), jnp.float32),
        beta=jnp.zeros((1, D2), jnp.float32),
        w2p=jnp.pad(w2, ((0, 0), (0, OUT_PAD - 1))),           # lane-dense (D2, 128)
        b2p=jnp.pad(b2, ((0, 0), (0, OUT_PAD - 1))),           # lane-dense (1, 128)
    )
    # TODO(synk): pretrained meta-llama/Llama-3.2-1B weights cannot be loaded
    # in-script; a small synthetic Llama-style parameterization is used instead.
    return dict(
        embed=nrm((VOCAB, D)),
        stack=stack,
        final_norm=jnp.ones((1, D), jnp.float32),
        head=head,
    )


# ==================================== main =====================================

if __name__ == "__main__":
    key = jax.random.PRNGKey(0)
    k_param, k_ids = jax.random.split(key)
    params = init_params(k_param)

    B, T = 2, 8
    input_ids = jax.random.randint(k_ids, (B, T), 0, VOCAB, dtype=jnp.int32)
    attention_mask = jnp.array([[1, 1, 1, 1, 1, 1, 1, 1],
                                [1, 1, 1, 1, 1, 0, 0, 0]], dtype=jnp.int32)

    fwd = jax.jit(network_forward)
    out = jax.block_until_ready(fwd(params, input_ids, attention_mask))
    assert out.shape == (B, 1) and out.dtype == jnp.float32
    print("KERNEL_OK")
</pallas_src>

<mosaic_0001>
module attributes {stable_mosaic.version = 11 : i64} {
  func.func @_network_kernel(%arg0: i32, %arg1: memref<16x64xf32, #tpu.memory_space<vmem>>, %arg2: memref<64x16xf32, #tpu.memory_space<vmem>>, %arg3: memref<16x64xf32, #tpu.memory_space<vmem>>, %arg4: memref<16x64xf32, #tpu.memory_space<vmem>>, %arg5: memref<16x32xf32, #tpu.memory_space<vmem>>, %arg6: memref<16x32xf32, #tpu.memory_space<vmem>>, %arg7: memref<64x64xf32, #tpu.memory_space<vmem>>, %arg8: memref<32x32xf32, #tpu.memory_space<vmem>>, %arg9: memref<2x16xf32, #tpu.memory_space<vmem>>, %arg10: memref<2x1x64xf32, #tpu.memory_space<vmem>>, %arg11: memref<2x64x64xf32, #tpu.memory_space<vmem>>, %arg12: memref<2x64x64xf32, #tpu.memory_space<vmem>>, %arg13: memref<2x64x64xf32, #tpu.memory_space<vmem>>, %arg14: memref<2x1x64xf32, #tpu.memory_space<vmem>>, %arg15: memref<2x64x256xf32, #tpu.memory_space<vmem>>, %arg16: memref<2x128x64xf32, #tpu.memory_space<vmem>>, %arg17: memref<1x64xf32, #tpu.memory_space<vmem>>, %arg18: memref<64x32xf32, #tpu.memory_space<vmem>>, %arg19: memref<1x32xf32, #tpu.memory_space<vmem>>, %arg20: memref<1x32xf32, #tpu.memory_space<vmem>>, %arg21: memref<1x32xf32, #tpu.memory_space<vmem>>, %arg22: memref<32x128xf32, #tpu.memory_space<vmem>>, %arg23: memref<1x128xf32, #tpu.memory_space<vmem>>, %arg24: memref<2x128xf32, #tpu.memory_space<vmem>>) attributes {dimension_semantics = [#tpu.dimension_semantics<arbitrary>], iteration_bounds = array<i64: 1>, scalar_prefetch = 0 : i64, scratch_operands = 0 : i64, tpu.core_type = #tpu.core_type<tc>, window_params = [{pipeline_mode = #tpu.pipeline_mode<synchronous>, transform_indices = @transform_0, window_bounds = array<i64: 16, 64>}, {pipeline_mode = #tpu.pipeline_mode<synchronous>, transform_indices = @transform_1, window_bounds = array<i64: 64, 16>}, {pipeline_mode = #tpu.pipeline_mode<synchronous>, transform_indices = @transform_2, window_bounds = array<i64: 16, 64>}, {pipeline_mode = #tpu.pipeline_mode<synchronous>, transform_indices = @transform_3, window_bounds = array<i64: 16, 64>}, {pipeline_mode = #tpu.pipeline_mode<synchronous>, transform_indices = @transform_4, window_bounds = array<i64: 16, 32>}, {pipeline_mode = #tpu.pipeline_mode<synchronous>, transform_indices = @transform_5, window_bounds = array<i64: 16, 32>}, {pipeline_mode = #tpu.pipeline_mode<synchronous>, transform_indices = @transform_6, window_bounds = array<i64: 64, 64>}, {pipeline_mode = #tpu.pipeline_mode<synchronous>, transform_indices = @transform_7, window_bounds = array<i64: 32, 32>}, {pipeline_mode = #tpu.pipeline_mode<synchronous>, transform_indices = @transform_8, window_bounds = array<i64: 2, 16>}, {pipeline_mode = #tpu.pipeline_mode<synchronous>, transform_indices = @transform_9, window_bounds = array<i64: 2, 1, 64>}, {pipeline_mode = #tpu.pipeline_mode<synchronous>, transform_indices = @transform_10, window_bounds = array<i64: 2, 64, 64>}, {pipeline_mode = #tpu.pipeline_mode<synchronous>, transform_indices = @transform_11, window_bounds = array<i64: 2, 64, 64>}, {pipeline_mode = #tpu.pipeline_mode<synchronous>, transform_indices = @transform_12, window_bounds = array<i64: 2, 64, 64>}, {pipeline_mode = #tpu.pipeline_mode<synchronous>, transform_indices = @transform_13, window_bounds = array<i64: 2, 1, 64>}, {pipeline_mode = #tpu.pipeline_mode<synchronous>, transform_indices = @transform_14, window_bounds = array<i64: 2, 64, 256>}, {pipeline_mode = #tpu.pipeline_mode<synchronous>, transform_indices = @transform_15, window_bounds = array<i64: 2, 128, 64>}, {pipeline_mode = #tpu.pipeline_mode<synchronous>, transform_indices = @transform_16, window_bounds = array<i64: 1, 64>}, {pipeline_mode = #tpu.pipeline_mode<synchronous>, transform_indices = @transform_17, window_bounds = array<i64: 64, 32>}, {pipeline_mode = #tpu.pipeline_mode<synchronous>, transform_indices = @transform_18, window_bounds = array<i64: 1, 32>}, {pipeline_mode = #tpu.pipeline_mode<synchronous>, transform_indices = @transform_19, window_bounds = array<i64: 1, 32>}, {pipeline_mode = #tpu.pipeline_mode<synchronous>, transform_indices = @transform_20, window_bounds = array<i64: 1, 32>}, {pipeline_mode = #tpu.pipeline_mode<synchronous>, transform_indices = @transform_21, window_bounds = array<i64: 32, 128>}, {pipeline_mode = #tpu.pipeline_mode<synchronous>, transform_indices = @transform_22, window_bounds = array<i64: 1, 128>}, {pipeline_mode = #tpu.pipeline_mode<synchronous>, transform_indices = @transform_23, window_bounds = array<i64: 2, 128>}]} {
    %c0 = arith.constant 0 : index
    %c0_0 = arith.constant 0 : index
    %0 = vector.load %arg1[%c0, %c0_0] : memref<16x64xf32, #tpu.memory_space<vmem>>, vector<16x64xf32>
    %c0_1 = arith.constant 0 : index
    %c0_2 = arith.constant 0 : index
    %1 = vector.load %arg2[%c0_1, %c0_2] : memref<64x16xf32, #tpu.memory_space<vmem>>, vector<64x16xf32>
    %c0_3 = arith.constant 0 : index
    %c0_4 = arith.constant 0 : index
    %2 = vector.load %arg3[%c0_3, %c0_4] : memref<16x64xf32, #tpu.memory_space<vmem>>, vector<16x64xf32>
    %c0_5 = arith.constant 0 : index
    %c0_6 = arith.constant 0 : index
    %3 = vector.load %arg4[%c0_5, %c0_6] : memref<16x64xf32, #tpu.memory_space<vmem>>, vector<16x64xf32>
    %c0_7 = arith.constant 0 : index
    %c0_8 = arith.constant 0 : index
    %4 = vector.load %arg5[%c0_7, %c0_8] : memref<16x32xf32, #tpu.memory_space<vmem>>, vector<16x32xf32>
    %c0_9 = arith.constant 0 : index
    %c0_10 = arith.constant 0 : index
    %5 = vector.load %arg6[%c0_9, %c0_10] : memref<16x32xf32, #tpu.memory_space<vmem>>, vector<16x32xf32>
    %c0_11 = arith.constant 0 : index
    %c0_12 = arith.constant 0 : index
    %6 = vector.load %arg7[%c0_11, %c0_12] : memref<64x64xf32, #tpu.memory_space<vmem>>, vector<64x64xf32>
    %c0_13 = arith.constant 0 : index
    %c0_14 = arith.constant 0 : index
    %7 = vector.load %arg8[%c0_13, %c0_14] : memref<32x32xf32, #tpu.memory_space<vmem>>, vector<32x32xf32>
    %8 = arith.mulf %0, %0 : vector<16x64xf32>
    %cst = arith.constant dense<0.000000e+00> : vector<16xf32>
    %9 = vector.multi_reduction <add>, %8, %cst [1] : vector<16x64xf32> to vector<16xf32>
    %10 = vector.shape_cast %9 : vector<16xf32> to vector<16x1xf32>
    %cst_15 = arith.constant 6.400000e+01 : f32
    %11 = vector.broadcast %cst_15 : f32 to vector<16x1xf32>
    %12 = arith.divf %10, %11 : vector<16x1xf32>
    %cst_16 = arith.constant 9.99999974E-6 : f32
    %13 = vector.broadcast %cst_16 : f32 to vector<16x1xf32>
    %14 = arith.addf %12, %13 : vector<16x1xf32>
    %15 = math.rsqrt %14 : vector<16x1xf32>
    %16 = vector.broadcast %15 : vector<16x1xf32> to vector<16x64xf32>
    %17 = arith.mulf %0, %16 : vector<16x64xf32>
    %c0_17 = arith.constant 0 : index
    %c0_18 = arith.constant 0 : index
    %c0_19 = arith.constant 0 : index
    %18 = vector.load %arg10[%c0_17, %c0_18, %c0_19] : memref<2x1x64xf32, #tpu.memory_space<vmem>>, vector<1x1x64xf32>
    %19 = vector.shape_cast %18 : vector<1x1x64xf32> to vector<1x64xf32>
    %20 = vector.broadcast %19 : vector<1x64xf32> to vector<16x64xf32>
    %21 = arith.mulf %17, %20 : vector<16x64xf32>
    %c0_20 = arith.constant 0 : index
    %c0_21 = arith.constant 0 : index
    %c0_22 = arith.constant 0 : index
    %22 = vector.load %arg11[%c0_20, %c0_21, %c0_22] : memref<2x64x64xf32, #tpu.memory_space<vmem>>, vector<1x64x64xf32>
    %23 = vector.shape_cast %22 : vector<1x64x64xf32> to vector<64x64xf32>
    %cst_23 = arith.constant dense<0.000000e+00> : vector<16x64xf32>
    %24 = tpu.matmul %21, %23, %cst_23 {dimension_numbers = #tpu.dot_dimension_numbers<[1], [0], [0], [1], [0, 0, 1, 1], [], []>} : vector<16x64xf32>, vector<64x64xf32>, vector<16x64xf32> -> vector<16x64xf32>
    %c0_24 = arith.constant 0 : index
    %c0_25 = arith.constant 0 : index
    %c0_26 = arith.constant 0 : index
    %25 = vector.load %arg12[%c0_24, %c0_25, %c0_26] : memref<2x64x64xf32, #tpu.memory_space<vmem>>, vector<1x64x64xf32>
    %26 = vector.shape_cast %25 : vector<1x64x64xf32> to vector<64x64xf32>
    %cst_27 = arith.constant dense<0.000000e+00> : vector<16x64xf32>
    %27 = tpu.matmul %21, %26, %cst_27 {dimension_numbers = #tpu.dot_dimension_numbers<[1], [0], [0], [1], [0, 0, 1, 1], [], []>} : vector<16x64xf32>, vector<64x64xf32>, vector<16x64xf32> -> vector<16x64xf32>
    %28 = vector.extract_strided_slice %27 {offsets = [0, 0], sizes = [16, 32], strides = [1, 1]} : vector<16x64xf32> to vector<16x32xf32>
    %29 = vector.extract_strided_slice %27 {offsets = [0, 32], sizes = [16, 32], strides = [1, 1]} : vector<16x64xf32> to vector<16x32xf32>
    %30 = arith.mulf %24, %2 : vector<16x64xf32>
    %cst_28 = arith.constant dense<0.000000e+00> : vector<16x64xf32>
    %31 = tpu.matmul %24, %6, %cst_28 {dimension_numbers = #tpu.dot_dimension_numbers<[1], [0], [0], [1], [0, 0, 1, 1], [], []>} : vector<16x64xf32>, vector<64x64xf32>, vector<16x64xf32> -> vector<16x64xf32>
    %32 = arith.mulf %31, %3 : vector<16x64xf32>
    %33 = arith.addf %30, %32 : vector<16x64xf32>
    %cst_29 = arith.constant 2.500000e-01 : f32
    %34 = vector.broadcast %cst_29 : f32 to vector<16x64xf32>
    %35 = arith.mulf %33, %34 : vector<16x64xf32>
    %36 = arith.mulf %28, %4 : vector<16x32xf32>
    %cst_30 = arith.constant dense<0.000000e+00> : vector<16x32xf32>
    %37 = tpu.matmul %28, %7, %cst_30 {dimension_numbers = #tpu.dot_dimension_numbers<[1], [0], [0], [1], [0, 0, 1, 1], [], []>} : vector<16x32xf32>, vector<32x32xf32>, vector<16x32xf32> -> vector<16x32xf32>
    %38 = arith.mulf %37, %5 : vector<16x32xf32>
    %39 = arith.addf %36, %38 : vector<16x32xf32>
    %40 = vector.extract_strided_slice %35 {offsets = [0, 0], sizes = [16, 16], strides = [1, 1]} : vector<16x64xf32> to vector<16x16xf32>
    %41 = vector.extract_strided_slice %39 {offsets = [0, 0], sizes = [16, 16], strides = [1, 1]} : vector<16x32xf32> to vector<16x16xf32>
    %cst_31 = arith.constant dense<0.000000e+00> : vector<16x16xf32>
    %42 = tpu.matmul %40, %41, %cst_31 {dimension_numbers = #tpu.dot_dimension_numbers<[1], [1], [0], [0], [0, 0, 1, 0], [], []>} : vector<16x16xf32>, vector<16x16xf32>, vector<16x16xf32> -> vector<16x16xf32>
    %43 = vector.extract_strided_slice %35 {offsets = [0, 16], sizes = [16, 16], strides = [1, 1]} : vector<16x64xf32> to vector<16x16xf32>
    %44 = vector.extract_strided_slice %39 {offsets = [0, 0], sizes = [16, 16], strides = [1, 1]} : vector<16x32xf32> to vector<16x16xf32>
    %cst_32 = arith.constant dense<0.000000e+00> : vector<16x16xf32>
    %45 = tpu.matmul %43, %44, %cst_32 {dimension_numbers = #tpu.dot_dimension_numbers<[1], [1], [0], [0], [0, 0, 1, 0], [], []>} : vector<16x16xf32>, vector<16x16xf32>, vector<16x16xf32> -> vector<16x16xf32>
    %46 = vector.extract_strided_slice %35 {offsets = [0, 32], sizes = [16, 16], strides = [1, 1]} : vector<16x64xf32> to vector<16x16xf32>
    %47 = vector.extract_strided_slice %39 {offsets = [0, 16], sizes = [16, 16], strides = [1, 1]} : vector<16x32xf32> to vector<16x16xf32>
    %cst_33 = arith.constant dense<0.000000e+00> : vector<16x16xf32>
    %48 = tpu.matmul %46, %47, %cst_33 {dimension_numbers = #tpu.dot_dimension_numbers<[1], [1], [0], [0], [0, 0, 1, 0], [], []>} : vector<16x16xf32>, vector<16x16xf32>, vector<16x16xf32> -> vector<16x16xf32>
    %49 = vector.extract_strided_slice %35 {offsets = [0, 48], sizes = [16, 16], strides = [1, 1]} : vector<16x64xf32> to vector<16x16xf32>
    %50 = vector.extract_strided_slice %39 {offsets = [0, 16], sizes = [16, 16], strides = [1, 1]} : vector<16x32xf32> to vector<16x16xf32>
    %cst_34 = arith.constant dense<0.000000e+00> : vector<16x16xf32>
    %51 = tpu.matmul %49, %50, %cst_34 {dimension_numbers = #tpu.dot_dimension_numbers<[1], [1], [0], [0], [0, 0, 1, 0], [], []>} : vector<16x16xf32>, vector<16x16xf32>, vector<16x16xf32> -> vector<16x16xf32>
    %52 = tpu.concatenate %42, %45, %48, %51 in 0 : vector<16x16xf32>, vector<16x16xf32>, vector<16x16xf32>, vector<16x16xf32> -> vector<64x16xf32>
    %53 = arith.addf %52, %1 : vector<64x16xf32>
    %cst_35 = arith.constant dense<0xFF800000> : vector<64xf32>
    %54 = vector.multi_reduction <maximumf>, %53, %cst_35 [1] : vector<64x16xf32> to vector<64xf32>
    %55 = vector.shape_cast %54 : vector<64xf32> to vector<64x1xf32>
    %56 = vector.broadcast %55 : vector<64x1xf32> to vector<64x16xf32>
    %57 = arith.subf %53, %56 : vector<64x16xf32>
    %58 = math.exp %57 : vector<64x16xf32>
    %cst_36 = arith.constant dense<0.000000e+00> : vector<64xf32>
    %59 = vector.multi_reduction <add>, %58, %cst_36 [1] : vector<64x16xf32> to vector<64xf32>
    %60 = vector.shape_cast %59 : vector<64xf32> to vector<64x1xf32>
    %61 = tpu.reciprocal %60 {approx = true} : vector<64x1xf32> -> vector<64x1xf32>
    %62 = vector.broadcast %61 : vector<64x1xf32> to vector<64x16xf32>
    %63 = arith.mulf %58, %62 : vector<64x16xf32>
    %c0_37 = arith.constant 0 : index
    %c0_38 = arith.constant 0 : index
    %c0_39 = arith.constant 0 : index
    %64 = vector.load %arg13[%c0_37, %c0_38, %c0_39] : memref<2x64x64xf32, #tpu.memory_space<vmem>>, vector<1x64x64xf32>
    %65 = vector.shape_cast %64 : vector<1x64x64xf32> to vector<64x64xf32>
    %66 = vector.extract_strided_slice %63 {offsets = [0, 0], sizes = [32, 16], strides = [1, 1]} : vector<64x16xf32> to vector<32x16xf32>
    %67 = vector.extract_strided_slice %29 {offsets = [0, 0], sizes = [16, 16], strides = [1, 1]} : vector<16x32xf32> to vector<16x16xf32>
    %cst_40 = arith.constant dense<0.000000e+00> : vector<32x16xf32>
    %68 = tpu.matmul %66, %67, %cst_40 {dimension_numbers = #tpu.dot_dimension_numbers<[1], [0], [0], [1], [0, 0, 1, 1], [], []>} : vector<32x16xf32>, vector<16x16xf32>, vector<32x16xf32> -> vector<32x16xf32>
    %69 = vector.extract_strided_slice %68 {offsets = [0, 0], sizes = [16, 16], strides = [1, 1]} : vector<32x16xf32> to vector<16x16xf32>
    %70 = vector.extract_strided_slice %65 {offsets = [0, 0], sizes = [16, 64], strides = [1, 1]} : vector<64x64xf32> to vector<16x64xf32>
    %cst_41 = arith.constant dense<0.000000e+00> : vector<16x64xf32>
    %71 = tpu.matmul %69, %70, %cst_41 {dimension_numbers = #tpu.dot_dimension_numbers<[1], [0], [0], [1], [0, 0, 1, 1], [], []>} : vector<16x16xf32>, vector<16x64xf32>, vector<16x64xf32> -> vector<16x64xf32>
    %72 = arith.addf %0, %71 : vector<16x64xf32>
    %73 = vector.extract_strided_slice %68 {offsets = [16, 0], sizes = [16, 16], strides = [1, 1]} : vector<32x16xf32> to vector<16x16xf32>
    %74 = vector.extract_strided_slice %65 {offsets = [16, 0], sizes = [16, 64], strides = [1, 1]} : vector<64x64xf32> to vector<16x64xf32>
    %cst_42 = arith.constant dense<0.000000e+00> : vector<16x64xf32>
    %75 = tpu.matmul %73, %74, %cst_42 {dimension_numbers = #tpu.dot_dimension_numbers<[1], [0], [0], [1], [0, 0, 1, 1], [], []>} : vector<16x16xf32>, vector<16x64xf32>, vector<16x64xf32> -> vector<16x64xf32>
    %76 = arith.addf %72, %75 : vector<16x64xf32>
    %77 = vector.extract_strided_slice %63 {offsets = [32, 0], sizes = [32, 16], strides = [1, 1]} : vector<64x16xf32> to vector<32x16xf32>
    %78 = vector.extract_strided_slice %29 {offsets = [0, 16], sizes = [16, 16], strides = [1, 1]} : vector<16x32xf32> to vector<16x16xf32>
    %cst_43 = arith.constant dense<0.000000e+00> : vector<32x16xf32>
    %79 = tpu.matmul %77, %78, %cst_43 {dimension_numbers = #tpu.dot_dimension_numbers<[1], [0], [0], [1], [0, 0, 1, 1], [], []>} : vector<32x16xf32>, vector<16x16xf32>, vector<32x16xf32> -> vector<32x16xf32>
    %80 = vector.extract_strided_slice %79 {offsets = [0, 0], sizes = [16, 16], strides = [1, 1]} : vector<32x16xf32> to vector<16x16xf32>
    %81 = vector.extract_strided_slice %65 {offsets = [32, 0], sizes = [16, 64], strides = [1, 1]} : vector<64x64xf32> to vector<16x64xf32>
    %cst_44 = arith.constant dense<0.000000e+00> : vector<16x64xf32>
    %82 = tpu.matmul %80, %81, %cst_44 {dimension_numbers = #tpu.dot_dimension_numbers<[1], [0], [0], [1], [0, 0, 1, 1], [], []>} : vector<16x16xf32>, vector<16x64xf32>, vector<16x64xf32> -> vector<16x64xf32>
    %83 = arith.addf %76, %82 : vector<16x64xf32>
    %84 = vector.extract_strided_slice %79 {offsets = [16, 0], sizes = [16, 16], strides = [1, 1]} : vector<32x16xf32> to vector<16x16xf32>
    %85 = vector.extract_strided_slice %65 {offsets = [48, 0], sizes = [16, 64], strides = [1, 1]} : vector<64x64xf32> to vector<16x64xf32>
    %cst_45 = arith.constant dense<0.000000e+00> : vector<16x64xf32>
    %86 = tpu.matmul %84, %85, %cst_45 {dimension_numbers = #tpu.dot_dimension_numbers<[1], [0], [0], [1], [0, 0, 1, 1], [], []>} : vector<16x16xf32>, vector<16x64xf32>, vector<16x64xf32> -> vector<16x64xf32>
    %87 = arith.addf %83, %86 : vector<16x64xf32>
    %88 = arith.mulf %87, %87 : vector<16x64xf32>
    %cst_46 = arith.constant dense<0.000000e+00> : vector<16xf32>
    %89 = vector.multi_reduction <add>, %88, %cst_46 [1] : vector<16x64xf32> to vector<16xf32>
    %90 = vector.shape_cast %89 : vector<16xf32> to vector<16x1xf32>
    %cst_47 = arith.constant 6.400000e+01 : f32
    %91 = vector.broadcast %cst_47 : f32 to vector<16x1xf32>
    %92 = arith.divf %90, %91 : vector<16x1xf32>
    %cst_48 = arith.constant 9.99999974E-6 : f32
    %93 = vector.broadcast %cst_48 : f32 to vector<16x1xf32>
    %94 = arith.addf %92, %93 : vector<16x1xf32>
    %95 = math.rsqrt %94 : vector<16x1xf32>
    %96 = vector.broadcast %95 : vector<16x1xf32> to vector<16x64xf32>
    %97 = arith.mulf %87, %96 : vector<16x64xf32>
    %c0_49 = arith.constant 0 : index
    %c0_50 = arith.constant 0 : index
    %c0_51 = arith.constant 0 : index
    %98 = vector.load %arg14[%c0_49, %c0_50, %c0_51] : memref<2x1x64xf32, #tpu.memory_space<vmem>>, vector<1x1x64xf32>
    %99 = vector.shape_cast %98 : vector<1x1x64xf32> to vector<1x64xf32>
    %100 = vector.broadcast %99 : vector<1x64xf32> to vector<16x64xf32>
    %101 = arith.mulf %97, %100 : vector<16x64xf32>
    %c0_52 = arith.constant 0 : index
    %c0_53 = arith.constant 0 : index
    %c0_54 = arith.constant 0 : index
    %102 = vector.load %arg15[%c0_52, %c0_53, %c0_54] : memref<2x64x256xf32, #tpu.memory_space<vmem>>, vector<1x64x256xf32>
    %103 = vector.shape_cast %102 : vector<1x64x256xf32> to vector<64x256xf32>
    %cst_55 = arith.constant dense<0.000000e+00> : vector<16x256xf32>
    %104 = tpu.matmul %101, %103, %cst_55 {dimension_numbers = #tpu.dot_dimension_numbers<[1], [0], [0], [1], [0, 0, 1, 1], [], []>} : vector<16x64xf32>, vector<64x256xf32>, vector<16x256xf32> -> vector<16x256xf32>
    %105 = vector.extract_strided_slice %104 {offsets = [0, 0], sizes = [16, 128], strides = [1, 1]} : vector<16x256xf32> to vector<16x128xf32>
    %106 = vector.extract_strided_slice %104 {offsets = [0, 128], sizes = [16, 128], strides = [1, 1]} : vector<16x256xf32> to vector<16x128xf32>
    %107 = arith.negf %105 : vector<16x128xf32>
    %108 = math.exp %107 : vector<16x128xf32>
    %cst_56 = arith.constant 1.000000e+00 : f32
    %109 = vector.broadcast %cst_56 : f32 to vector<16x128xf32>
    %110 = arith.addf %109, %108 : vector<16x128xf32>
    %111 = arith.divf %109, %110 : vector<16x128xf32>
    %112 = arith.mulf %105, %111 : vector<16x128xf32>
    %113 = arith.mulf %112, %106 : vector<16x128xf32>
    %c0_57 = arith.constant 0 : index
    %c0_58 = arith.constant 0 : index
    %c0_59 = arith.constant 0 : index
    %114 = vector.load %arg16[%c0_57, %c0_58, %c0_59] : memref<2x128x64xf32, #tpu.memory_space<vmem>>, vector<1x128x64xf32>
    %115 = vector.shape_cast %114 : vector<1x128x64xf32> to vector<128x64xf32>
    %cst_60 = arith.constant dense<0.000000e+00> : vector<16x64xf32>
    %116 = tpu.matmul %113, %115, %cst_60 {dimension_numbers = #tpu.dot_dimension_numbers<[1], [0], [0], [1], [0, 0, 1, 1], [], []>} : vector<16x128xf32>, vector<128x64xf32>, vector<16x64xf32> -> vector<16x64xf32>
    %117 = arith.addf %87, %116 : vector<16x64xf32>
    %118 = arith.mulf %117, %117 : vector<16x64xf32>
    %cst_61 = arith.constant dense<0.000000e+00> : vector<16xf32>
    %119 = vector.multi_reduction <add>, %118, %cst_61 [1] : vector<16x64xf32> to vector<16xf32>
    %120 = vector.shape_cast %119 : vector<16xf32> to vector<16x1xf32>
    %cst_62 = arith.constant 6.400000e+01 : f32
    %121 = vector.broadcast %cst_62 : f32 to vector<16x1xf32>
    %122 = arith.divf %120, %121 : vector<16x1xf32>
    %cst_63 = arith.constant 9.99999974E-6 : f32
    %123 = vector.broadcast %cst_63 : f32 to vector<16x1xf32>
    %124 = arith.addf %122, %123 : vector<16x1xf32>
    %125 = math.rsqrt %124 : vector<16x1xf32>
    %126 = vector.broadcast %125 : vector<16x1xf32> to vector<16x64xf32>
    %127 = arith.mulf %117, %126 : vector<16x64xf32>
    %c1 = arith.constant 1 : index
    %c0_64 = arith.constant 0 : index
    %c0_65 = arith.constant 0 : index
    %128 = vector.load %arg10[%c1, %c0_64, %c0_65] : memref<2x1x64xf32, #tpu.memory_space<vmem>>, vector<1x1x64xf32>
    %129 = vector.shape_cast %128 : vector<1x1x64xf32> to vector<1x64xf32>
    %130 = vector.broadcast %129 : vector<1x64xf32> to vector<16x64xf32>
    %131 = arith.mulf %127, %130 : vector<16x64xf32>
    %c1_66 = arith.constant 1 : index
    %c0_67 = arith.constant 0 : index
    %c0_68 = arith.constant 0 : index
    %132 = vector.load %arg11[%c1_66, %c0_67, %c0_68] : memref<2x64x64xf32, #tpu.memory_space<vmem>>, vector<1x64x64xf32>
    %133 = vector.shape_cast %132 : vector<1x64x64xf32> to vector<64x64xf32>
    %cst_69 = arith.constant dense<0.000000e+00> : vector<16x64xf32>
    %134 = tpu.matmul %131, %133, %cst_69 {dimension_numbers = #tpu.dot_dimension_numbers<[1], [0], [0], [1], [0, 0, 1, 1], [], []>} : vector<16x64xf32>, vector<64x64xf32>, vector<16x64xf32> -> vector<16x64xf32>
    %c1_70 = arith.constant 1 : index
    %c0_71 = arith.constant 0 : index
    %c0_72 = arith.constant 0 : index
    %135 = vector.load %arg12[%c1_70, %c0_71, %c0_72] : memref<2x64x64xf32, #tpu.memory_space<vmem>>, vector<1x64x64xf32>
    %136 = vector.shape_cast %135 : vector<1x64x64xf32> to vector<64x64xf32>
    %cst_73 = arith.constant dense<0.000000e+00> : vector<16x64xf32>
    %137 = tpu.matmul %131, %136, %cst_73 {dimension_numbers = #tpu.dot_dimension_numbers<[1], [0], [0], [1], [0, 0, 1, 1], [], []>} : vector<16x64xf32>, vector<64x64xf32>, vector<16x64xf32> -> vector<16x64xf32>
    %138 = vector.extract_strided_slice %137 {offsets = [0, 0], sizes = [16, 32], strides = [1, 1]} : vector<16x64xf32> to vector<16x32xf32>
    %139 = vector.extract_strided_slice %137 {offsets = [0, 32], sizes = [16, 32], strides = [1, 1]} : vector<16x64xf32> to vector<16x32xf32>
    %140 = arith.mulf %134, %2 : vector<16x64xf32>
    %cst_74 = arith.constant dense<0.000000e+00> : vector<16x64xf32>
    %141 = tpu.matmul %134, %6, %cst_74 {dimension_numbers = #tpu.dot_dimension_numbers<[1], [0], [0], [1], [0, 0, 1, 1], [], []>} : vector<16x64xf32>, vector<64x64xf32>, vector<16x64xf32> -> vector<16x64xf32>
    %142 = arith.mulf %141, %3 : vector<16x64xf32>
    %143 = arith.addf %140, %142 : vector<16x64xf32>
    %cst_75 = arith.constant 2.500000e-01 : f32
    %144 = vector.broadcast %cst_75 : f32 to vector<16x64xf32>
    %145 = arith.mulf %143, %144 : vector<16x64xf32>
    %146 = arith.mulf %138, %4 : vector<16x32xf32>
    %cst_76 = arith.constant dense<0.000000e+00> : vector<16x32xf32>
    %147 = tpu.matmul %138, %7, %cst_76 {dimension_numbers = #tpu.dot_dimension_numbers<[1], [0], [0], [1], [0, 0, 1, 1], [], []>} : vector<16x32xf32>, vector<32x32xf32>, vector<16x32xf32> -> vector<16x32xf32>
    %148 = arith.mulf %147, %5 : vector<16x32xf32>
    %149 = arith.addf %146, %148 : vector<16x32xf32>
    %150 = vector.extract_strided_slice %145 {offsets = [0, 0], sizes = [16, 16], strides = [1, 1]} : vector<16x64xf32> to vector<16x16xf32>
    %151 = vector.extract_strided_slice %149 {offsets = [0, 0], sizes = [16, 16], strides = [1, 1]} : vector<16x32xf32> to vector<16x16xf32>
    %cst_77 = arith.constant dense<0.000000e+00> : vector<16x16xf32>
    %152 = tpu.matmul %150, %151, %cst_77 {dimension_numbers = #tpu.dot_dimension_numbers<[1], [1], [0], [0], [0, 0, 1, 0], [], []>} : vector<16x16xf32>, vector<16x16xf32>, vector<16x16xf32> -> vector<16x16xf32>
    %153 = vector.extract_strided_slice %145 {offsets = [0, 16], sizes = [16, 16], strides = [1, 1]} : vector<16x64xf32> to vector<16x16xf32>
    %154 = vector.extract_strided_slice %149 {offsets = [0, 0], sizes = [16, 16], strides = [1, 1]} : vector<16x32xf32> to vector<16x16xf32>
    %cst_78 = arith.constant dense<0.000000e+00> : vector<16x16xf32>
    %155 = tpu.matmul %153, %154, %cst_78 {dimension_numbers = #tpu.dot_dimension_numbers<[1], [1], [0], [0], [0, 0, 1, 0], [], []>} : vector<16x16xf32>, vector<16x16xf32>, vector<16x16xf32> -> vector<16x16xf32>
    %156 = vector.extract_strided_slice %145 {offsets = [0, 32], sizes = [16, 16], strides = [1, 1]} : vector<16x64xf32> to vector<16x16xf32>
    %157 = vector.extract_strided_slice %149 {offsets = [0, 16], sizes = [16, 16], strides = [1, 1]} : vector<16x32xf32> to vector<16x16xf32>
    %cst_79 = arith.constant dense<0.000000e+00> : vector<16x16xf32>
    %158 = tpu.matmul %156, %157, %cst_79 {dimension_numbers = #tpu.dot_dimension_numbers<[1], [1], [0], [0], [0, 0, 1, 0], [], []>} : vector<16x16xf32>, vector<16x16xf32>, vector<16x16xf32> -> vector<16x16xf32>
    %159 = vector.extract_strided_slice %145 {offsets = [0, 48], sizes = [16, 16], strides = [1, 1]} : vector<16x64xf32> to vector<16x16xf32>
    %160 = vector.extract_strided_slice %149 {offsets = [0, 16], sizes = [16, 16], strides = [1, 1]} : vector<16x32xf32> to vector<16x16xf32>
    %cst_80 = arith.constant dense<0.000000e+00> : vector<16x16xf32>
    %161 = tpu.matmul %159, %160, %cst_80 {dimension_numbers = #tpu.dot_dimension_numbers<[1], [1], [0], [0], [0, 0, 1, 0], [], []>} : vector<16x16xf32>, vector<16x16xf32>, vector<16x16xf32> -> vector<16x16xf32>
    %162 = tpu.concatenate %152, %155, %158, %161 in 0 : vector<16x16xf32>, vector<16x16xf32>, vector<16x16xf32>, vector<16x16xf32> -> vector<64x16xf32>
    %163 = arith.addf %162, %1 : vector<64x16xf32>
    %cst_81 = arith.constant dense<0xFF800000> : vector<64xf32>
    %164 = vector.multi_reduction <maximumf>, %163, %cst_81 [1] : vector<64x16xf32> to vector<64xf32>
    %165 = vector.shape_cast %164 : vector<64xf32> to vector<64x1xf32>
    %166 = vector.broadcast %165 : vector<64x1xf32> to vector<64x16xf32>
    %167 = arith.subf %163, %166 : vector<64x16xf32>
    %168 = math.exp %167 : vector<64x16xf32>
    %cst_82 = arith.constant dense<0.000000e+00> : vector<64xf32>
    %169 = vector.multi_reduction <add>, %168, %cst_82 [1] : vector<64x16xf32> to vector<64xf32>
    %170 = vector.shape_cast %169 : vector<64xf32> to vector<64x1xf32>
    %171 = tpu.reciprocal %170 {approx = true} : vector<64x1xf32> -> vector<64x1xf32>
    %172 = vector.broadcast %171 : vector<64x1xf32> to vector<64x16xf32>
    %173 = arith.mulf %168, %172 : vector<64x16xf32>
    %c1_83 = arith.constant 1 : index
    %c0_84 = arith.constant 0 : index
    %c0_85 = arith.constant 0 : index
    %174 = vector.load %arg13[%c1_83, %c0_84, %c0_85] : memref<2x64x64xf32, #tpu.memory_space<vmem>>, vector<1x64x64xf32>
    %175 = vector.shape_cast %174 : vector<1x64x64xf32> to vector<64x64xf32>
    %176 = vector.extract_strided_slice %173 {offsets = [0, 0], sizes = [32, 16], strides = [1, 1]} : vector<64x16xf32> to vector<32x16xf32>
    %177 = vector.extract_strided_slice %139 {offsets = [0, 0], sizes = [16, 16], strides = [1, 1]} : vector<16x32xf32> to vector<16x16xf32>
    %cst_86 = arith.constant dense<0.000000e+00> : vector<32x16xf32>
    %178 = tpu.matmul %176, %177, %cst_86 {dimension_numbers = #tpu.dot_dimension_numbers<[1], [0], [0], [1], [0, 0, 1, 1], [], []>} : vector<32x16xf32>, vector<16x16xf32>, vector<32x16xf32> -> vector<32x16xf32>
    %179 = vector.extract_strided_slice %178 {offsets = [0, 0], sizes = [16, 16], strides = [1, 1]} : vector<32x16xf32> to vector<16x16xf32>
    %180 = vector.extract_strided_slice %175 {offsets = [0, 0], sizes = [16, 64], strides = [1, 1]} : vector<64x64xf32> to vector<16x64xf32>
    %cst_87 = arith.constant dense<0.000000e+00> : vector<16x64xf32>
    %181 = tpu.matmul %179, %180, %cst_87 {dimension_numbers = #tpu.dot_dimension_numbers<[1], [0], [0], [1], [0, 0, 1, 1], [], []>} : vector<16x16xf32>, vector<16x64xf32>, vector<16x64xf32> -> vector<16x64xf32>
    %182 = arith.addf %117, %181 : vector<16x64xf32>
    %183 = vector.extract_strided_slice %178 {offsets = [16, 0], sizes = [16, 16], strides = [1, 1]} : vector<32x16xf32> to vector<16x16xf32>
    %184 = vector.extract_strided_slice %175 {offsets = [16, 0], sizes = [16, 64], strides = [1, 1]} : vector<64x64xf32> to vector<16x64xf32>
    %cst_88 = arith.constant dense<0.000000e+00> : vector<16x64xf32>
    %185 = tpu.matmul %183, %184, %cst_88 {dimension_numbers = #tpu.dot_dimension_numbers<[1], [0], [0], [1], [0, 0, 1, 1], [], []>} : vector<16x16xf32>, vector<16x64xf32>, vector<16x64xf32> -> vector<16x64xf32>
    %186 = arith.addf %182, %185 : vector<16x64xf32>
    %187 = vector.extract_strided_slice %173 {offsets = [32, 0], sizes = [32, 16], strides = [1, 1]} : vector<64x16xf32> to vector<32x16xf32>
    %188 = vector.extract_strided_slice %139 {offsets = [0, 16], sizes = [16, 16], strides = [1, 1]} : vector<16x32xf32> to vector<16x16xf32>
    %cst_89 = arith.constant dense<0.000000e+00> : vector<32x16xf32>
    %189 = tpu.matmul %187, %188, %cst_89 {dimension_numbers = #tpu.dot_dimension_numbers<[1], [0], [0], [1], [0, 0, 1, 1], [], []>} : vector<32x16xf32>, vector<16x16xf32>, vector<32x16xf32> -> vector<32x16xf32>
    %190 = vector.extract_strided_slice %189 {offsets = [0, 0], sizes = [16, 16], strides = [1, 1]} : vector<32x16xf32> to vector<16x16xf32>
    %191 = vector.extract_strided_slice %175 {offsets = [32, 0], sizes = [16, 64], strides = [1, 1]} : vector<64x64xf32> to vector<16x64xf32>
    %cst_90 = arith.constant dense<0.000000e+00> : vector<16x64xf32>
    %192 = tpu.matmul %190, %191, %cst_90 {dimension_numbers = #tpu.dot_dimension_numbers<[1], [0], [0], [1], [0, 0, 1, 1], [], []>} : vector<16x16xf32>, vector<16x64xf32>, vector<16x64xf32> -> vector<16x64xf32>
    %193 = arith.addf %186, %192 : vector<16x64xf32>
    %194 = vector.extract_strided_slice %189 {offsets = [16, 0], sizes = [16, 16], strides = [1, 1]} : vector<32x16xf32> to vector<16x16xf32>
    %195 = vector.extract_strided_slice %175 {offsets = [48, 0], sizes = [16, 64], strides = [1, 1]} : vector<64x64xf32> to vector<16x64xf32>
    %cst_91 = arith.constant dense<0.000000e+00> : vector<16x64xf32>
    %196 = tpu.matmul %194, %195, %cst_91 {dimension_numbers = #tpu.dot_dimension_numbers<[1], [0], [0], [1], [0, 0, 1, 1], [], []>} : vector<16x16xf32>, vector<16x64xf32>, vector<16x64xf32> -> vector<16x64xf32>
    %197 = arith.addf %193, %196 : vector<16x64xf32>
    %198 = arith.mulf %197, %197 : vector<16x64xf32>
    %cst_92 = arith.constant dense<0.000000e+00> : vector<16xf32>
    %199 = vector.multi_reduction <add>, %198, %cst_92 [1] : vector<16x64xf32> to vector<16xf32>
    %200 = vector.shape_cast %199 : vector<16xf32> to vector<16x1xf32>
    %cst_93 = arith.constant 6.400000e+01 : f32
    %201 = vector.broadcast %cst_93 : f32 to vector<16x1xf32>
    %202 = arith.divf %200, %201 : vector<16x1xf32>
    %cst_94 = arith.constant 9.99999974E-6 : f32
    %203 = vector.broadcast %cst_94 : f32 to vector<16x1xf32>
    %204 = arith.addf %202, %203 : vector<16x1xf32>
    %205 = math.rsqrt %204 : vector<16x1xf32>
    %206 = vector.broadcast %205 : vector<16x1xf32> to vector<16x64xf32>
    %207 = arith.mulf %197, %206 : vector<16x64xf32>
    %c1_95 = arith.constant 1 : index
    %c0_96 = arith.constant 0 : index
    %c0_97 = arith.constant 0 : index
    %208 = vector.load %arg14[%c1_95, %c0_96, %c0_97] : memref<2x1x64xf32, #tpu.memory_space<vmem>>, vector<1x1x64xf32>
    %209 = vector.shape_cast %208 : vector<1x1x64xf32> to vector<1x64xf32>
    %210 = vector.broadcast %209 : vector<1x64xf32> to vector<16x64xf32>
    %211 = arith.mulf %207, %210 : vector<16x64xf32>
    %c1_98 = arith.constant 1 : index
    %c0_99 = arith.constant 0 : index
    %c0_100 = arith.constant 0 : index
    %212 = vector.load %arg15[%c1_98, %c0_99, %c0_100] : memref<2x64x256xf32, #tpu.memory_space<vmem>>, vector<1x64x256xf32>
    %213 = vector.shape_cast %212 : vector<1x64x256xf32> to vector<64x256xf32>
    %cst_101 = arith.constant dense<0.000000e+00> : vector<16x256xf32>
    %214 = tpu.matmul %211, %213, %cst_101 {dimension_numbers = #tpu.dot_dimension_numbers<[1], [0], [0], [1], [0, 0, 1, 1], [], []>} : vector<16x64xf32>, vector<64x256xf32>, vector<16x256xf32> -> vector<16x256xf32>
    %215 = vector.extract_strided_slice %214 {offsets = [0, 0], sizes = [16, 128], strides = [1, 1]} : vector<16x256xf32> to vector<16x128xf32>
    %216 = vector.extract_strided_slice %214 {offsets = [0, 128], sizes = [16, 128], strides = [1, 1]} : vector<16x256xf32> to vector<16x128xf32>
    %217 = arith.negf %215 : vector<16x128xf32>
    %218 = math.exp %217 : vector<16x128xf32>
    %cst_102 = arith.constant 1.000000e+00 : f32
    %219 = vector.broadcast %cst_102 : f32 to vector<16x128xf32>
    %220 = arith.addf %219, %218 : vector<16x128xf32>
    %221 = arith.divf %219, %220 : vector<16x128xf32>
    %222 = arith.mulf %215, %221 : vector<16x128xf32>
    %223 = arith.mulf %222, %216 : vector<16x128xf32>
    %c1_103 = arith.constant 1 : index
    %c0_104 = arith.constant 0 : index
    %c0_105 = arith.constant 0 : index
    %224 = vector.load %arg16[%c1_103, %c0_104, %c0_105] : memref<2x128x64xf32, #tpu.memory_space<vmem>>, vector<1x128x64xf32>
    %225 = vector.shape_cast %224 : vector<1x128x64xf32> to vector<128x64xf32>
    %cst_106 = arith.constant dense<0.000000e+00> : vector<16x64xf32>
    %226 = tpu.matmul %223, %225, %cst_106 {dimension_numbers = #tpu.dot_dimension_numbers<[1], [0], [0], [1], [0, 0, 1, 1], [], []>} : vector<16x128xf32>, vector<128x64xf32>, vector<16x64xf32> -> vector<16x64xf32>
    %227 = arith.addf %197, %226 : vector<16x64xf32>
    %228 = arith.mulf %227, %227 : vector<16x64xf32>
    %cst_107 = arith.constant dense<0.000000e+00> : vector<16xf32>
    %229 = vector.multi_reduction <add>, %228, %cst_107 [1] : vector<16x64xf32> to vector<16xf32>
    %230 = vector.shape_cast %229 : vector<16xf32> to vector<16x1xf32>
    %cst_108 = arith.constant 6.400000e+01 : f32
    %231 = vector.broadcast %cst_108 : f32 to vector<16x1xf32>
    %232 = arith.divf %230, %231 : vector<16x1xf32>
    %cst_109 = arith.constant 9.99999974E-6 : f32
    %233 = vector.broadcast %cst_109 : f32 to vector<16x1xf32>
    %234 = arith.addf %232, %233 : vector<16x1xf32>
    %235 = math.rsqrt %234 : vector<16x1xf32>
    %236 = vector.broadcast %235 : vector<16x1xf32> to vector<16x64xf32>
    %237 = arith.mulf %227, %236 : vector<16x64xf32>
    %c0_110 = arith.constant 0 : index
    %c0_111 = arith.constant 0 : index
    %238 = vector.load %arg17[%c0_110, %c0_111] : memref<1x64xf32, #tpu.memory_space<vmem>>, vector<1x64xf32>
    %239 = vector.broadcast %238 : vector<1x64xf32> to vector<16x64xf32>
    %240 = arith.mulf %237, %239 : vector<16x64xf32>
    %c0_112 = arith.constant 0 : index
    %c0_113 = arith.constant 0 : index
    %241 = vector.load %arg9[%c0_112, %c0_113] : memref<2x16xf32, #tpu.memory_space<vmem>>, vector<2x16xf32>
    %cst_114 = arith.constant dense<0.000000e+00> : vector<2x64xf32>
    %242 = tpu.matmul %241, %240, %cst_114 {dimension_numbers = #tpu.dot_dimension_numbers<[1], [0], [0], [1], [0, 0, 1, 1], [], []>} : vector<2x16xf32>, vector<16x64xf32>, vector<2x64xf32> -> vector<2x64xf32>
    %c0_115 = arith.constant 0 : index
    %c0_116 = arith.constant 0 : index
    %243 = vector.load %arg18[%c0_115, %c0_116] : memref<64x32xf32, #tpu.memory_space<vmem>>, vector<64x32xf32>
    %cst_117 = arith.constant dense<0.000000e+00> : vector<2x32xf32>
    %244 = tpu.matmul %242, %243, %cst_117 {dimension_numbers = #tpu.dot_dimension_numbers<[1], [0], [0], [1], [0, 0, 1, 1], [], []>} : vector<2x64xf32>, vector<64x32xf32>, vector<2x32xf32> -> vector<2x32xf32>
    %c0_118 = arith.constant 0 : index
    %c0_119 = arith.constant 0 : index
    %245 = vector.load %arg19[%c0_118, %c0_119] : memref<1x32xf32, #tpu.memory_space<vmem>>, vector<1x32xf32>
    %246 = vector.broadcast %245 : vector<1x32xf32> to vector<2x32xf32>
    %247 = arith.addf %244, %246 : vector<2x32xf32>
    %cst_120 = arith.constant dense<0.000000e+00> : vector<2xf32>
    %248 = vector.multi_reduction <add>, %247, %cst_120 [1] : vector<2x32xf32> to vector<2xf32>
    %249 = vector.shape_cast %248 : vector<2xf32> to vector<2x1xf32>
    %cst_121 = arith.constant 3.200000e+01 : f32
    %250 = vector.broadcast %cst_121 : f32 to vector<2x1xf32>
    %251 = arith.divf %249, %250 : vector<2x1xf32>
    %252 = vector.broadcast %251 : vector<2x1xf32> to vector<2x32xf32>
    %253 = arith.subf %247, %252 : vector<2x32xf32>
    %254 = vector.broadcast %251 : vector<2x1xf32> to vector<2x32xf32>
    %255 = arith.subf %247, %254 : vector<2x32xf32>
    %256 = arith.mulf %253, %255 : vector<2x32xf32>
    %cst_122 = arith.constant dense<0.000000e+00> : vector<2xf32>
    %257 = vector.multi_reduction <add>, %256, %cst_122 [1] : vector<2x32xf32> to vector<2xf32>
    %258 = vector.shape_cast %257 : vector<2xf32> to vector<2x1xf32>
    %cst_123 = arith.constant 3.200000e+01 : f32
    %259 = vector.broadcast %cst_123 : f32 to vector<2x1xf32>
    %260 = arith.divf %258, %259 : vector<2x1xf32>
    %261 = vector.broadcast %251 : vector<2x1xf32> to vector<2x32xf32>
    %262 = arith.subf %247, %261 : vector<2x32xf32>
    %cst_124 = arith.constant 9.99999974E-6 : f32
    %263 = vector.broadcast %cst_124 : f32 to vector<2x1xf32>
    %264 = arith.addf %260, %263 : vector<2x1xf32>
    %265 = math.rsqrt %264 : vector<2x1xf32>
    %266 = vector.broadcast %265 : vector<2x1xf32> to vector<2x32xf32>
    %267 = arith.mulf %262, %266 : vector<2x32xf32>
    %c0_125 = arith.constant 0 : index
    %c0_126 = arith.constant 0 : index
    %268 = vector.load %arg20[%c0_125, %c0_126] : memref<1x32xf32, #tpu.memory_space<vmem>>, vector<1x32xf32>
    %269 = vector.broadcast %268 : vector<1x32xf32> to vector<2x32xf32>
    %270 = arith.mulf %267, %269 : vector<2x32xf32>
    %c0_127 = arith.constant 0 : index
    %c0_128 = arith.constant 0 : index
    %271 = vector.load %arg21[%c0_127, %c0_128] : memref<1x32xf32, #tpu.memory_space<vmem>>, vector<1x32xf32>
    %272 = vector.broadcast %271 : vector<1x32xf32> to vector<2x32xf32>
    %273 = arith.addf %270, %272 : vector<2x32xf32>
    %cst_129 = arith.constant 5.000000e-01 : f32
    %274 = vector.broadcast %cst_129 : f32 to vector<2x32xf32>
    %275 = arith.mulf %274, %273 : vector<2x32xf32>
    %cst_130 = arith.constant 0.707106769 : f32
    %276 = vector.broadcast %cst_130 : f32 to vector<2x32xf32>
    %277 = arith.mulf %273, %276 : vector<2x32xf32>
    %278 = math.erf %277 : vector<2x32xf32>
    %cst_131 = arith.constant 1.000000e+00 : f32
    %279 = vector.broadcast %cst_131 : f32 to vector<2x32xf32>
    %280 = arith.addf %279, %278 : vector<2x32xf32>
    %281 = arith.mulf %275, %280 : vector<2x32xf32>
    %c0_132 = arith.constant 0 : index
    %c0_133 = arith.constant 0 : index
    %282 = vector.load %arg22[%c0_132, %c0_133] : memref<32x128xf32, #tpu.memory_space<vmem>>, vector<32x128xf32>
    %cst_134 = arith.constant dense<0.000000e+00> : vector<2x128xf32>
    %283 = tpu.matmul %281, %282, %cst_134 {dimension_numbers = #tpu.dot_dimension_numbers<[1], [0], [0], [1], [0, 0, 1, 1], [], []>} : vector<2x32xf32>, vector<32x128xf32>, vector<2x128xf32> -> vector<2x128xf32>
    %c0_135 = arith.constant 0 : index
    %c0_136 = arith.constant 0 : index
    %284 = vector.load %arg23[%c0_135, %c0_136] : memref<1x128xf32, #tpu.memory_space<vmem>>, vector<1x128xf32>
    %285 = vector.broadcast %284 : vector<1x128xf32> to vector<2x128xf32>
    %286 = arith.addf %283, %285 : vector<2x128xf32>
    %c0_137 = arith.constant 0 : index
    %c0_138 = arith.constant 0 : index
    %287 = vector.load %arg24[%c0_137, %c0_138] : memref<2x128xf32, #tpu.memory_space<vmem>>, vector<2x128xf32>
    tpu.vector_store %arg24[%c0_137, %c0_138], %286 {strides = array<i32>} : memref<2x128xf32, #tpu.memory_space<vmem>>, vector<2x128xf32>,
    return
  }
  func.func @transform_0(%arg0: i32) -> (i32, i32) {
    %c0_i32 = arith.constant 0 : i32
    %c0_i32_0 = arith.constant 0 : i32
    %c0_i32_1 = arith.constant 0 : i32
    return %c0_i32, %c0_i32_0 : i32, i32
  }
  func.func @transform_1(%arg0: i32) -> (i32, i32) {
    %c0_i32 = arith.constant 0 : i32
    %c0_i32_0 = arith.constant 0 : i32
    %c0_i32_1 = arith.constant 0 : i32
    return %c0_i32, %c0_i32_0 : i32, i32
  }
  func.func @transform_2(%arg0: i32) -> (i32, i32) {
    %c0_i32 = arith.constant 0 : i32
    %c0_i32_0 = arith.constant 0 : i32
    %c0_i32_1 = arith.constant 0 : i32
    return %c0_i32, %c0_i32_0 : i32, i32
  }
  func.func @transform_3(%arg0: i32) -> (i32, i32) {
    %c0_i32 = arith.constant 0 : i32
    %c0_i32_0 = arith.constant 0 : i32
    %c0_i32_1 = arith.constant 0 : i32
    return %c0_i32, %c0_i32_0 : i32, i32
  }
  func.func @transform_4(%arg0: i32) -> (i32, i32) {
    %c0_i32 = arith.constant 0 : i32
    %c0_i32_0 = arith.constant 0 : i32
    %c0_i32_1 = arith.constant 0 : i32
    return %c0_i32, %c0_i32_0 : i32, i32
  }
  func.func @transform_5(%arg0: i32) -> (i32, i32) {
    %c0_i32 = arith.constant 0 : i32
    %c0_i32_0 = arith.constant 0 : i32
    %c0_i32_1 = arith.constant 0 : i32
    return %c0_i32, %c0_i32_0 : i32, i32
  }
  func.func @transform_6(%arg0: i32) -> (i32, i32) {
    %c0_i32 = arith.constant 0 : i32
    %c0_i32_0 = arith.constant 0 : i32
    %c0_i32_1 = arith.constant 0 : i32
    return %c0_i32, %c0_i32_0 : i32, i32
  }
  func.func @transform_7(%arg0: i32) -> (i32, i32) {
    %c0_i32 = arith.constant 0 : i32
    %c0_i32_0 = arith.constant 0 : i32
    %c0_i32_1 = arith.constant 0 : i32
    return %c0_i32, %c0_i32_0 : i32, i32
  }
  func.func @transform_8(%arg0: i32) -> (i32, i32) {
    %c0_i32 = arith.constant 0 : i32
    %c0_i32_0 = arith.constant 0 : i32
    %c0_i32_1 = arith.constant 0 : i32
    return %c0_i32, %c0_i32_0 : i32, i32
  }
  func.func @transform_9(%arg0: i32) -> (i32, i32, i32) {
    %c0_i32 = arith.constant 0 : i32
    %c0_i32_0 = arith.constant 0 : i32
    %c0_i32_1 = arith.constant 0 : i32
    %c0_i32_2 = arith.constant 0 : i32
    return %c0_i32, %c0_i32_0, %c0_i32_1 : i32, i32, i32
  }
  func.func @transform_10(%arg0: i32) -> (i32, i32, i32) {
    %c0_i32 = arith.constant 0 : i32
    %c0_i32_0 = arith.constant 0 : i32
    %c0_i32_1 = arith.constant 0 : i32
    %c0_i32_2 = arith.constant 0 : i32
    return %c0_i32, %c0_i32_0, %c0_i32_1 : i32, i32, i32
  }
  func.func @transform_11(%arg0: i32) -> (i32, i32, i32) {
    %c0_i32 = arith.constant 0 : i32
    %c0_i32_0 = arith.constant 0 : i32
    %c0_i32_1 = arith.constant 0 : i32
    %c0_i32_2 = arith.constant 0 : i32
    return %c0_i32, %c0_i32_0, %c0_i32_1 : i32, i32, i32
  }
  func.func @transform_12(%arg0: i32) -> (i32, i32, i32) {
    %c0_i32 = arith.constant 0 : i32
    %c0_i32_0 = arith.constant 0 : i32
    %c0_i32_1 = arith.constant 0 : i32
    %c0_i32_2 = arith.constant 0 : i32
    return %c0_i32, %c0_i32_0, %c0_i32_1 : i32, i32, i32
  }
  func.func @transform_13(%arg0: i32) -> (i32, i32, i32) {
    %c0_i32 = arith.constant 0 : i32
    %c0_i32_0 = arith.constant 0 : i32
    %c0_i32_1 = arith.constant 0 : i32
    %c0_i32_2 = arith.constant 0 : i32
    return %c0_i32, %c0_i32_0, %c0_i32_1 : i32, i32, i32
  }
  func.func @transform_14(%arg0: i32) -> (i32, i32, i32) {
    %c0_i32 = arith.constant 0 : i32
    %c0_i32_0 = arith.constant 0 : i32
    %c0_i32_1 = arith.constant 0 : i32
    %c0_i32_2 = arith.constant 0 : i32
    return %c0_i32, %c0_i32_0, %c0_i32_1 : i32, i32, i32
  }
  func.func @transform_15(%arg0: i32) -> (i32, i32, i32) {
    %c0_i32 = arith.constant 0 : i32
    %c0_i32_0 = arith.constant 0 : i32
    %c0_i32_1 = arith.constant 0 : i32
    %c0_i32_2 = arith.constant 0 : i32
    return %c0_i32, %c0_i32_0, %c0_i32_1 : i32, i32, i32
  }
  func.func @transform_16(%arg0: i32) -> (i32, i32) {
    %c0_i32 = arith.constant 0 : i32
    %c0_i32_0 = arith.constant 0 : i32
    %c0_i32_1 = arith.constant 0 : i32
    return %c0_i32, %c0_i32_0 : i32, i32
  }
  func.func @transform_17(%arg0: i32) -> (i32, i32) {
    %c0_i32 = arith.constant 0 : i32
    %c0_i32_0 = arith.constant 0 : i32
    %c0_i32_1 = arith.constant 0 : i32
    return %c0_i32, %c0_i32_0 : i32, i32
  }
  func.func @transform_18(%arg0: i32) -> (i32, i32) {
    %c0_i32 = arith.constant 0 : i32
    %c0_i32_0 = arith.constant 0 : i32
    %c0_i32_1 = arith.constant 0 : i32
    return %c0_i32, %c0_i32_0 : i32, i32
  }
  func.func @transform_19(%arg0: i32) -> (i32, i32) {
    %c0_i32 = arith.constant 0 : i32
    %c0_i32_0 = arith.constant 0 : i32
    %c0_i32_1 = arith.constant 0 : i32
    return %c0_i32, %c0_i32_0 : i32, i32
  }
  func.func @transform_20(%arg0: i32) -> (i32, i32) {
    %c0_i32 = arith.constant 0 : i32
    %c0_i32_0 = arith.constant 0 : i32
    %c0_i32_1 = arith.constant 0 : i32
    return %c0_i32, %c0_i32_0 : i32, i32
  }
  func.func @transform_21(%arg0: i32) -> (i32, i32) {
    %c0_i32 = arith.constant 0 : i32
    %c0_i32_0 = arith.constant 0 : i32
    %c0_i32_1 = arith.constant 0 : i32
    return %c0_i32, %c0_i32_0 : i32, i32
  }
  func.func @transform_22(%arg0: i32) -> (i32, i32) {
    %c0_i32 = arith.constant 0 : i32
    %c0_i32_0 = arith.constant 0 : i32
    %c0_i32_1 = arith.constant 0 : i32
    return %c0_i32, %c0_i32_0 : i32, i32
  }
  func.func @transform_23(%arg0: i32) -> (i32, i32) {
    %c0_i32 = arith.constant 0 : i32
    %c0_i32_0 = arith.constant 0 : i32
    %c0_i32_1 = arith.constant 0 : i32
    return %c0_i32, %c0_i32_0 : i32, i32
  }
}

</mosaic_0001>

<bundles_post_ra>
// kernel: tile.49
= control target key start
LH: loop header
LB: loop body
LE: loop exit
PB: predicated region body
PF: predicated region fallthrough
CT: control target
= control target key end

     0   :  { %vm68_vm0 = vcmask 1047556   ;;  %vm70_vm1 = vcmask 130048   ;;  %vm89_vm2 = vcmask 261248   ;;  %s195_s0 = inlined_call_operand.vmem [shape: f32[16,2,16], index: 0, kind: input, shape index: {}]   ;;  %s196_s1 = inlined_call_operand.vmem [shape: f32[16,32], index: 1, kind: output, shape index: {}]  }
   0x1   :  { %v110_v0 = vld [vmem:[%s195_s0 + $0xe] sm:$0x3]  ;;  %v111_v1 = vld [vmem:[%s195_s0 + $0xc] sm:$0x3]  ;;  %v112_v2 = vld [vmem:[%s195_s0 + $0xa] sm:$0x3] }
   0x2   :  { %39 = vst [vmem:[#allocation0 + $0x38] sm:$0x3] %v110_v0  ;;  %v113_v3 = vld [vmem:[%s195_s0 + $0x8] sm:$0x3]  ;;  %v114_v4 = vld [vmem:[%s195_s0 + $0x6] sm:$0x3] }
   0x3   :  { %43 = vst [vmem:[#allocation0 + $0x30] sm:$0x3] %v111_v1  ;;  %v115_v5 = vld [vmem:[%s195_s0 + $0x4] sm:$0x3]  ;;  %v116_v6 = vld [vmem:[%s195_s0 + $0x2] sm:$0x3] }
   0x4   :  { %47 = vst [vmem:[#allocation0 + $0x28] sm:$0x3] %v112_v2  ;;  %v64_v7 = vld [vmem:[%s195_s0] sm:$0x3]  ;;  %v102_v8 = vld [vmem:[%s195_s0 + $0x1e] sm:$0x3] }
   0x5   :  { %51 = vst [vmem:[#allocation0 + $0x20] sm:$0x3] %v113_v3  ;;  %v103_v9 = vld [vmem:[%s195_s0 + $0x1c] sm:$0x3]  ;;  %v104_v10 = vld [vmem:[%s195_s0 + $0x1a] sm:$0x3] }
   0x6   :  { %55 = vst [vmem:[#allocation0 + $0x18] sm:$0x3] %v114_v4  ;;  %v105_v11 = vld [vmem:[%s195_s0 + $0x18] sm:$0x3]  ;;  %v106_v12 = vld [vmem:[%s195_s0 + $0x16] sm:$0x3] }
   0x7   :  { %59 = vst [vmem:[#allocation0 + $0x10] sm:$0x3] %v115_v5  ;;  %v107_v13 = vld [vmem:[%s195_s0 + $0x14] sm:$0x3]  ;;  %v108_v14 = vld [vmem:[%s195_s0 + $0x12] sm:$0x3] }
   0x8   :  { %63 = vst [vmem:[#allocation0 + $0x8] sm:$0x3] %v116_v6  ;;  %v109_v15 = vld [vmem:[%s195_s0 + $0x10] sm:$0x3]  ;;  %s120_s0 = smov 16  }
   0x9   :  { %65 = vst [vmem:[#allocation0] sm:$0x3] %v64_v7 }
   0xa   :  { %7 = vst [vmem:[#allocation0 + $0x78] sm:$0x3] %v102_v8 }
   0xb   :  { %11 = vst [vmem:[#allocation0 + $0x70] sm:$0x3] %v103_v9 }
   0xc   :  { %15 = vst [vmem:[#allocation0 + $0x68] sm:$0x3] %v104_v10  ;;  %v84_v16 = vld [vmem:[#allocation0 + $0x1] ss:$8 sm:$0xf0]  }
   0xd   :  { %19 = vst [vmem:[#allocation0 + $0x60] sm:$0x3] %v105_v11  ;;  %v67_v23 = vld [vmem:[#allocation0] ss:$8 sm:$0xf0]  }
   0xe   :  { %23 = vst [vmem:[#allocation0 + $0x58] sm:$0x3] %v106_v12 }
   0xf   :  { %27 = vst [vmem:[#allocation0 + $0x50] sm:$0x3] %v107_v13 }
  0x10   :  { %v82_v17 = vld [vmem:[#allocation0 + $0x1] ss:$8 sm:$0xf]   ;;  %31 = vst [vmem:[#allocation0 + $0x48] sm:$0x3] %v108_v14 }
  0x11   :  { %v86_v18 = vsel %vm68_vm0, %v84_v16, %v82_v17  ;;  %35 = vst [vmem:[#allocation0 + $0x40] sm:$0x3] %v109_v15  ;;  %v66_v22 = vld [vmem:[#allocation0] ss:$8 sm:$0xf]  }
  0x12   :  { %87 = vrot.lane.b32.xlu0 %v86_v18, %s120_s0  ;;  %v69_v24 = vsel %vm68_vm0, %v67_v23, %v66_v22 }
  0x13   :  { %71 = vst.msk [vmem:[%s196_s1] sm:$0xff] %vm70_vm1, %v69_v24  }
  0x14   :  { %v94_v19 = vld [vmem:[#allocation0 + $0x41] ss:$8 sm:$0xf0]   ;;  %v75_v26 = vld [vmem:[#allocation0 + $0x40] ss:$8 sm:$0xf0]  }
  0x18   :  { %v92_v20 = vld [vmem:[#allocation0 + $0x41] ss:$8 sm:$0xf]   ;;  %v73_v25 = vld [vmem:[#allocation0 + $0x40] ss:$8 sm:$0xf]  }
  0x19   :  { %v96_v21 = vsel %vm68_vm0, %v94_v19, %v92_v20  ;;  %v77_v27 = vsel %vm68_vm0, %v75_v26, %v73_v25 }
  0x1a   :  { %97 = vrot.lane.b32.xlu0 %v96_v21, %s120_s0  ;;  %117 = vst.msk [vmem:[%s196_s1 + $0x8] sm:$0xff] %vm70_vm1, %v77_v27  }
  0x84   :  { %v88_v28 = vpop.permute.xlu0 %87  }
  0x85   :  { %90 = vst.msk [vmem:[%s196_s1] sm:$0xff] %vm89_vm2, %v88_v28  }
  0x8c   :  { %v98_v29 = vpop.permute.xlu0 %97  }
  0x8d   :  { %118 = vst.msk [vmem:[%s196_s1 + $0x8] sm:$0xff] %vm89_vm2, %v98_v29  }

// kernel: tile.34
= control target key start
LH: loop header
LB: loop body
LE: loop exit
PB: predicated region body
PF: predicated region fallthrough
CT: control target
= control target key end

     0   :  { %vm68_vm0 = vcmask 1047556   ;;  %s167_s9 = smov 32   ;;  %s168_s10 = smov 16   ;;  %vm70_vm1 = vcmask 130048   ;;  %vm89_vm2 = vcmask 523648   ;;  %vm110_vm3 = vcmask 392448   ;;  %s259_s0 = inlined_call_operand.vmem [shape: f32[16,4,16], index: 0, kind: input, shape index: {}]   ;;  %s260_s1 = inlined_call_operand.vmem [shape: f32[16,64], index: 1, kind: output, shape index: {}]  }
   0x1   :  { %v152_v0 = vld [vmem:[%s259_s0 + $0x1c] sm:$0xf]  ;;  %v153_v1 = vld [vmem:[%s259_s0 + $0x18] sm:$0xf]  ;;  %v154_v2 = vld [vmem:[%s259_s0 + $0x14] sm:$0xf] }
   0x2   :  { %39 = vst [vmem:[#allocation0 + $0x38] sm:$0xf] %v152_v0  ;;  %v155_v3 = vld [vmem:[%s259_s0 + $0x10] sm:$0xf]  ;;  %v156_v4 = vld [vmem:[%s259_s0 + $0xc] sm:$0xf] }
   0x3   :  { %43 = vst [vmem:[#allocation0 + $0x30] sm:$0xf] %v153_v1  ;;  %v157_v5 = vld [vmem:[%s259_s0 + $0x8] sm:$0xf]  ;;  %v158_v6 = vld [vmem:[%s259_s0 + $0x4] sm:$0xf] }
   0x4   :  { %47 = vst [vmem:[#allocation0 + $0x28] sm:$0xf] %v154_v2  ;;  %v64_v7 = vld [vmem:[%s259_s0] sm:$0xf]  ;;  %v144_v8 = vld [vmem:[%s259_s0 + $0x3c] sm:$0xf] }
   0x5   :  { %51 = vst [vmem:[#allocation0 + $0x20] sm:$0xf] %v155_v3  ;;  %v145_v9 = vld [vmem:[%s259_s0 + $0x38] sm:$0xf]  ;;  %v146_v10 = vld [vmem:[%s259_s0 + $0x34] sm:$0xf] }
   0x6   :  { %55 = vst [vmem:[#allocation0 + $0x18] sm:$0xf] %v156_v4  ;;  %v147_v11 = vld [vmem:[%s259_s0 + $0x30] sm:$0xf]  ;;  %v148_v12 = vld [vmem:[%s259_s0 + $0x2c] sm:$0xf] }
   0x7   :  { %59 = vst [vmem:[#allocation0 + $0x10] sm:$0xf] %v157_v5  ;;  %v149_v13 = vld [vmem:[%s259_s0 + $0x28] sm:$0xf]  ;;  %v150_v15 = vld [vmem:[%s259_s0 + $0x24] sm:$0xf] }
   0x8   :  { %63 = vst [vmem:[#allocation0 + $0x8] sm:$0xf] %v158_v6  ;;  %v151_v17 = vld [vmem:[%s259_s0 + $0x20] sm:$0xf]  ;;  %s166_s0 = smov 48   ;;  %vm131_vm4 = vcmask 261248  }
   0x9   :  { %65 = vst [vmem:[#allocation0] sm:$0xf] %v64_v7 }
   0xa   :  { %7 = vst [vmem:[#allocation0 + $0x78] sm:$0xf] %v144_v8 }
   0xb   :  { %11 = vst [vmem:[#allocation0 + $0x70] sm:$0xf] %v145_v9 }
   0xc   :  { %v84_v14 = vld [vmem:[#allocation0 + $0x3] ss:$8 sm:$0xf0]   ;;  %15 = vst [vmem:[#allocation0 + $0x68] sm:$0xf] %v146_v10 }
   0xd   :  { %v105_v16 = vld [vmem:[#allocation0 + $0x2] ss:$8 sm:$0xf0]   ;;  %19 = vst [vmem:[#allocation0 + $0x60] sm:$0xf] %v147_v11 }
   0xe   :  { %23 = vst [vmem:[#allocation0 + $0x58] sm:$0xf] %v148_v12  ;;  %v126_v18 = vld [vmem:[#allocation0 + $0x1] ss:$8 sm:$0xf0]  }
   0xf   :  { %27 = vst [vmem:[#allocation0 + $0x50] sm:$0xf] %v149_v13  ;;  %v67_v35 = vld [vmem:[#allocation0] ss:$8 sm:$0xf0]  }
  0x10   :  { %v82_v19 = vld [vmem:[#allocation0 + $0x3] ss:$8 sm:$0xf]   ;;  %v103_v20 = vld [vmem:[#allocation0 + $0x2] ss:$8 sm:$0xf]  }
  0x11   :  { %v86_v21 = vsel %vm68_vm0, %v84_v14, %v82_v19  ;;  %v107_v22 = vsel %vm68_vm0, %v105_v16, %v103_v20  ;;  %v124_v23 = vld [vmem:[#allocation0 + $0x1] ss:$8 sm:$0xf]   ;;  %31 = vst [vmem:[#allocation0 + $0x48] sm:$0xf] %v150_v15 }
  0x12   :  { %87 = vrot.lane.b32.xlu0 %v86_v21, %s166_s0  ;;  %108 = vrot.lane.b32.xlu1 %v107_v22, %s167_s9  ;;  %v128_v24 = vsel %vm68_vm0, %v126_v18, %v124_v23  ;;  %35 = vst [vmem:[#allocation0 + $0x40] sm:$0xf] %v151_v17  ;;  %v66_v34 = vld [vmem:[#allocation0] ss:$8 sm:$0xf]  }
  0x13   :  { %129 = vrot.lane.b32.xlu2 %v128_v24, %s168_s10  ;;  %v69_v36 = vsel %vm68_vm0, %v67_v35, %v66_v34 }
  0x14   :  { %v94_v25 = vld [vmem:[#allocation0 + $0x43] ss:$8 sm:$0xf0]   ;;  %v115_v26 = vld [vmem:[#allocation0 + $0x42] ss:$8 sm:$0xf0]  }
  0x15   :  { %v136_v27 = vld [vmem:[#allocation0 + $0x41] ss:$8 sm:$0xf0]   ;;  %71 = vst.msk [vmem:[%s260_s1] sm:$0xff] %vm70_vm1, %v69_v36  }
  0x16   :  { %v75_v38 = vld [vmem:[#allocation0 + $0x40] ss:$8 sm:$0xf0]  }
  0x19   :  { %v92_v28 = vld [vmem:[#allocation0 + $0x43] ss:$8 sm:$0xf]   ;;  %v113_v29 = vld [vmem:[#allocation0 + $0x42] ss:$8 sm:$0xf]  }
  0x1a   :  { %v96_v30 = vsel %vm68_vm0, %v94_v25, %v92_v28  ;;  %v117_v31 = vsel %vm68_vm0, %v115_v26, %v113_v29  ;;  %v134_v32 = vld [vmem:[#allocation0 + $0x41] ss:$8 sm:$0xf]   ;;  %v73_v37 = vld [vmem:[#allocation0 + $0x40] ss:$8 sm:$0xf]  }
  0x1b   :  { %97 = vrot.lane.b32.xlu0 %v96_v30, %s166_s0  ;;  %118 = vrot.lane.b32.xlu1 %v117_v31, %s167_s9  ;;  %v138_v33 = vsel %vm68_vm0, %v136_v27, %v134_v32  ;;  %v77_v40 = vsel %vm68_vm0, %v75_v38, %v73_v37 }
  0x1c   :  { %139 = vrot.lane.b32.xlu2 %v138_v33, %s168_s10  ;;  %159 = vst.msk [vmem:[%s260_s1 + $0x8] sm:$0xff] %vm70_vm1, %v77_v40  }
  0x6d   :  { %v130_v39 = vpop.permute.xlu2 %129  }
  0x76   :  { %v140_v41 = vpop.permute.xlu2 %139  }
  0x84   :  { %v88_v42 = vpop.permute.xlu0 %87   ;;  %v109_v43 = vpop.permute.xlu1 %108  }
  0x85   :  { %90 = vst.msk [vmem:[%s260_s1] sm:$0xff] %vm89_vm2, %v88_v42  }
  0x86   :  { %111 = vst.msk [vmem:[%s260_s1] sm:$0xff] %vm110_vm3, %v109_v43  }
  0x87   :  { %132 = vst.msk [vmem:[%s260_s1] sm:$0xff] %vm131_vm4, %v130_v39  }
  0x8d   :  { %v98_v44 = vpop.permute.xlu0 %97   ;;  %v119_v45 = vpop.permute.xlu1 %118  }
  0x8e   :  { %160 = vst.msk [vmem:[%s260_s1 + $0x8] sm:$0xff] %vm89_vm2, %v98_v44  }
  0x8f   :  { %161 = vst.msk [vmem:[%s260_s1 + $0x8] sm:$0xff] %vm110_vm3, %v119_v45  }
  0x90   :  { %162 = vst.msk [vmem:[%s260_s1 + $0x8] sm:$0xff] %vm131_vm4, %v140_v41  }

// kernel: network_forward.1
= control target key start
LH: loop header
LB: loop body
LE: loop exit
PB: predicated region body
PF: predicated region fallthrough
CT: control target
= control target key end

     0   :  { %vm106_vm0 = vcmask 523264   ;;  %v2304_v6 = vmov 64.0   ;;  %vm259_vm8 = vcmask 261120   ;;  %s2305_s27 = smov 112   ;;  %vm293_vm9 = vcmask 130048   ;;  %s3265_s0 = inlined_call_operand.vmem [shape: f32[16,64], index: 0, kind: input, shape index: {}]   ;;  %s3266_s9 = inlined_call_operand.vmem [shape: f32[2,1,64], index: 9, kind: input, shape index: {}]   ;;  %s3267_s10 = inlined_call_operand.vmem [shape: f32[2,64,64], index: 10, kind: input, shape index: {}]   ;;  %s3268_s11 = inlined_call_operand.vmem [shape: f32[2,64,64], index: 11, kind: input, shape index: {}]   ;;  %s3269_s6 = inlined_call_operand.vmem [shape: f32[64,64], index: 6, kind: input, shape index: {}]   ;;  %s3270_s7 = inlined_call_operand.vmem [shape: f32[32,32], index: 7, kind: input, shape index: {}]   ;;  %s3271_s2 = inlined_call_operand.vmem [shape: f32[16,64], index: 2, kind: input, shape index: {}]   ;;  %s3272_s3 = inlined_call_operand.vmem [shape: f32[16,64], index: 3, kind: input, shape index: {}]   ;;  %s3273_s4 = inlined_call_operand.vmem [shape: f32[16,32], index: 4, kind: input, shape index: {}]   ;;  %s3274_s5 = inlined_call_operand.vmem [shape: f32[16,32], index: 5, kind: input, shape index: {}]   ;;  %s3275_s1 = inlined_call_operand.vmem [shape: f32[64,16], index: 1, kind: input, shape index: {}]   ;;  %s3276_s12 = inlined_call_operand.vmem [shape: f32[2,64,64], index: 12, kind: input, shape index: {}]   ;;  %s3277_s13 = inlined_call_operand.vmem [shape: f32[2,1,64], index: 13, kind: input, shape index: {}]   ;;  %s3278_s14 = inlined_call_operand.vmem [shape: f32[2,64,256], index: 14, kind: input, shape index: {}]   ;;  %s3279_s15 = inlined_call_operand.vmem [shape: f32[2,128,64], index: 15, kind: input, shape index: {}]   ;;  %s3280_s16 = inlined_call_operand.vmem [shape: f32[1,64], index: 16, kind: input, shape index: {}]   ;;  %s3281_s17 = inlined_call_operand.vmem [shape: f32[64,32], index: 17, kind: input, shape index: {}]   ;;  %s3282_s8 = inlined_call_operand.vmem [shape: f32[2,16], index: 8, kind: input, shape index: {}]   ;;  %s3283_s18 = inlined_call_operand.vmem [shape: f32[1,32], index: 18, kind: input, shape index: {}]   ;;  %s3284_s19 = inlined_call_operand.vmem [shape: f32[1,32], index: 19, kind: input, shape index: {}]   ;;  %s3285_s20 = inlined_call_operand.vmem [shape: f32[1,32], index: 20, kind: input, shape index: {}]   ;;  %s3286_s22 = inlined_call_operand.vmem [shape: f32[1,128], index: 22, kind: input, shape index: {}]   ;;  %s3287_s21 = inlined_call_operand.vmem [shape: f32[32,128], index: 21, kind: input, shape index: {}]   ;;  %s3288_s23 = inlined_call_operand.vmem [shape: f32[2,128], index: 23, kind: output, shape index: {}]  }
   0x1   :  { %3299 = sst [smem:[#allocation2_spill]] %s3265_s0  ;;  %2186 = vrcp.f32 %v2304_v6 }
   0x2   :  { %3300 = sst [smem:[#allocation3_spill]] %s3266_s9 }
   0x3   :  { %3301 = sst [smem:[#allocation4_spill]] %s3267_s10 }
   0x4   :  { %3302 = sst [smem:[#allocation5_spill]] %s3268_s11 }
   0x5   :  { %3303 = sst [smem:[#allocation6_spill]] %s3269_s6 }
   0x6   :  { %3304 = sst [smem:[#allocation7_spill]] %s3270_s7 }
   0x7   :  { %3305 = sst [smem:[#allocation8_spill]] %s3271_s2  ;;  %v2187_v7 = vpop.eup %2186 }
   0x8   :  { %3306 = sst [smem:[#allocation9_spill]] %s3272_s3  ;;  %v114_v12 = vmul.f32 64.0, %v2187_v7  ;;  %vm118_vm1 = vweird.f32 %v2187_v7 }
   0x9   :  { %3307 = sst [smem:[#allocation10_spill]] %s3286_s22  ;;  %s2306_s22 = smov 96  }
   0xa   :  { %3308 = sst [smem:[#allocation11_spill]] %s3288_s23  ;;  %v115_v17 = vsub.f32 1.0, %v114_v12  ;;  %s3297_s23 = smov 80  }
   0xb   :  { %s3309_s24 = sld [smem:[#allocation2_spill]] }
   0xc   :  { %s3310_s26 = sld [smem:[#allocation4_spill]]  ;;  %v116_v22 = vmul.f32 %v2187_v7, %v115_v17 }
   0xd   :  { %s3311_s3 = sld [smem:[#allocation5_spill]] }
   0xe   :  { %v117_v27 = vadd.f32 %v2187_v7, %v116_v22  ;;  %s3312_s6 = sld [smem:[#allocation6_spill]] }
   0xf   :  { %s3313_s9 = sld [smem:[#allocation7_spill]] }
  0x10   :  { %v2493_v28 = vsel %vm118_vm1, %v2187_v7, %v117_v27  ;;  %s3314_s11 = sld [smem:[#allocation3_spill]]  ;;  %v2605_v27 = vld [vmem:[%s3273_s4] sm:$0xff] }
  0x11   :  { %v2432_v0 = vld [vmem:[%s3309_s24] sm:$0xff]  ;;  %v2439_v2 = vld [vmem:[%s3309_s24 + $0x8] sm:$0xff]  ;;  %s3315_s2 = sld [smem:[#allocation8_spill]] }
  0x12   :  { %v104_v1 = vmul.f32 %v2432_v0, %v2432_v0  ;;  %v105_v4 = vmul.f32 %v2439_v2, %v2439_v2  ;;  %v159_v8 = vld [vmem:[%s3310_s26 + $0x38] sm:$0xff]  ;;  %v158_v10 = vld [vmem:[%s3310_s26 + $0x30] sm:$0xff]  ;;  %v157_v13 = vld [vmem:[%s3310_s26 + $0x28] sm:$0xff]  ;;  %s3316_s28 = sld [smem:[#allocation9_spill]] }
  0x13   :  { %v196_v9 = vld [vmem:[%s3311_s3 + $0x38] sm:$0xff]  ;;  %174 = vmatpush.msra.mxu0 %v159_v8  ;;  %v195_v11 = vld [vmem:[%s3311_s3 + $0x30] sm:$0xff]  ;;  %v194_v14 = vld [vmem:[%s3311_s3 + $0x28] sm:$0xff] }
  0x14   :  { %v107_v3 = vsel %vm106_vm0, %v104_v1, 0.0  ;;  %v110_v5 = vsel %vm106_vm0, %v105_v4, 0.0  ;;  %205 = vmatpush.msra.mxu1 %v196_v9  ;;  %v156_v15 = vld [vmem:[%s3310_s26 + $0x20] sm:$0xff]  ;;  %v155_v18 = vld [vmem:[%s3310_s26 + $0x18] sm:$0xff]  ;;  %v154_v20 = vld [vmem:[%s3310_s26 + $0x10] sm:$0xff] }
  0x15   :  { %108 = vadd.xlane.f32.xlu0 %v107_v3  ;;  %175 = vmatpush.msra.mxu0 %v158_v10  ;;  %v193_v16 = vld [vmem:[%s3311_s3 + $0x20] sm:$0xff]  ;;  %v192_v19 = vld [vmem:[%s3311_s3 + $0x18] sm:$0xff]  ;;  %v191_v21 = vld [vmem:[%s3311_s3 + $0x10] sm:$0xff] }
  0x16   :  { %206 = vmatpush.msra.mxu1 %v195_v11  ;;  %v153_v23 = vld [vmem:[%s3310_s26 + $0x8] sm:$0xff]  ;;  %v152_v25 = vld [vmem:[%s3310_s26] sm:$0xff]  ;;  %v2499_v32 = vld [vmem:[%s3312_s6 + $0x38] sm:$0xff] }
  0x17   :  { %176 = vmatpush.msra.mxu0 %v157_v13  ;;  %v190_v24 = vld [vmem:[%s3311_s3 + $0x8] sm:$0xff]  ;;  %v189_v26 = vld [vmem:[%s3311_s3] sm:$0xff]  ;;  %v2504_v33 = vld [vmem:[%s3312_s6 + $0x30] sm:$0xff]  ;;  %236 = vmatpush.msra.mxu2 %v2499_v32 }
  0x18   :  { %207 = vmatpush.msra.mxu1 %v194_v14  ;;  %v103_v34 = vld [vmem:[%s3313_s9 + $0x18] sm:$0xff]  ;;  %v2513_v35 = vld [vmem:[%s3312_s6 + $0x28] sm:$0xff]  ;;  %v102_v36 = vld [vmem:[%s3313_s9 + $0x10] sm:$0xff] }
  0x19   :  { %177 = vmatpush.msra.mxu0 %v156_v15  ;;  %278 = vmatpush.msra.mxu3 %v103_v34  ;;  %v101_v37 = vld [vmem:[%s3313_s9 + $0x8] sm:$0xff]  ;;  %v2525_v38 = vld [vmem:[%s3312_s6 + $0x20] sm:$0xff]  ;;  %v2532_v41 = vld [vmem:[%s3312_s6 + $0x18] sm:$0xff] }
  0x1a   :  { %208 = vmatpush.msra.mxu1 %v193_v16  ;;  %237 = vmatpush.msra.mxu2 %v2504_v33  ;;  %v2538_v44 = vld [vmem:[%s3312_s6 + $0x10] sm:$0xff]  ;;  %v2544_v46 = vld [vmem:[%s3312_s6 + $0x8] sm:$0xff]  ;;  %v2177_v53 = vld [vmem:[%s3314_s11] ss:$0 sm:$0xff] }
  0x1b   :  { %178 = vmatpush.msra.mxu0 %v155_v18  ;;  %279 = vmatpush.msra.mxu3 %v102_v36  ;;  %v2560_v1 = vld [vmem:[%s3312_s6] sm:$0xff]  ;;  %v85_v15 = vld [vmem:[%s3315_s2 + $0x8] sm:$0xff] }
  0x1c   :  { %209 = vmatpush.msra.mxu1 %v192_v19  ;;  %238 = vmatpush.msra.mxu2 %v2513_v35  ;;  %v2565_v3 = vld [vmem:[%s3313_s9] sm:$0xff]  ;;  %v87_v17 = vld [vmem:[%s3316_s28 + $0x8] sm:$0xff] }
  0x1d   :  { %111 = vadd.xlane.f32.xlu0 %v110_v5  ;;  %179 = vmatpush.msra.mxu0 %v154_v20  ;;  %v84_v8 = vld [vmem:[%s3315_s2] sm:$0xff]  ;;  %v89_v18 = vld [vmem:[%s3273_s4 + $0x8] sm:$0xff] }
  0x1e   :  { %210 = vmatpush.msra.mxu1 %v191_v21  ;;  %280 = vmatpush.msra.mxu3 %v101_v37  ;;  %v86_v9 = vld [vmem:[%s3316_s28] sm:$0xff]  ;;  %v91_v19 = vld [vmem:[%s3274_s5 + $0x8] sm:$0xff] }
  0x1f   :  { %180 = vmatpush.msra.mxu0 %v153_v23  ;;  %239 = vmatpush.msra.mxu2 %v2525_v38  ;;  %v90_v20 = vld [vmem:[%s3274_s5] sm:$0xff] }
  0x20   :  { %211 = vmatpush.msra.mxu1 %v190_v24  ;;  %281 = vmatpush.msra.mxu3 %v2565_v3 }
  0x21   :  { %181 = vmatpush.msra.mxu0 %v152_v25  ;;  %240 = vmatpush.msra.mxu2 %v2532_v41 }
  0x22   :  { %212 = vmatpush.msra.mxu1 %v189_v26 }
  0x23   :  { %241 = vmatpush.msra.mxu2 %v2538_v44 }
  0x25   :  { %242 = vmatpush.msra.mxu2 %v2544_v46 }
  0x27   :  { %243 = vmatpush.msra.mxu2 %v2560_v1 }
  0x88   :  { %v109_v29 = vpop.xlane.xlu0 %108 }
  0x89   :  { %v120_v30 = vmul.f32 %v2493_v28, %v109_v29 }
  0x8b   :  { %v122_v31 = vadd.f32 1e-05, %v120_v30 }
  0x8d   :  { %2188 = vrsqrt.f32 %v122_v31  ;;  %vm130_vm3 = vweird.f32 %v122_v31 }
  0x90   :  { %v112_v39 = vpop.xlane.xlu0 %111 }
  0x91   :  { %v121_v40 = vmul.f32 %v2493_v28, %v112_v39 }
  0x93   :  { %v2189_v42 = vpop.eup %2188  ;;  %v123_v43 = vadd.f32 1e-05, %v121_v40 }
  0x94   :  { %v125_v45 = vmul.f32 %v2189_v42, %v122_v31  ;;  %vm131_vm2 = vweird.f32 %v2189_v42 }
  0x95   :  { %2190 = vrsqrt.f32 %v123_v43  ;;  %vm132_vm4 = vmor %vm130_vm3, %vm131_vm2  ;;  %vm140_vm6 = vweird.f32 %v123_v43 }
  0x96   :  { %v126_v47 = vmul.f32 %v2189_v42, %v125_v45 }
  0x98   :  { %v127_v48 = vmul.f32 0.5, %v126_v47 }
  0x9a   :  { %v128_v49 = vsub.f32 1.5, %v127_v48 }
  0x9b   :  { %v2191_v50 = vpop.eup %2190 }
  0x9c   :  { %v129_v51 = vmul.f32 %v2189_v42, %v128_v49  ;;  %v135_v52 = vmul.f32 %v2191_v50, %v123_v43  ;;  %vm141_vm5 = vweird.f32 %v2191_v50  ;;  %v2634_v49 = vld [vmem:[%s3275_s1] sm:$0xff] }
  0x9d   :  { %vm142_vm7 = vmor %vm140_vm6, %vm141_vm5 }
  0x9e   :  { %v136_v54 = vmul.f32 %v2191_v50, %v135_v52  ;;  %v133_v55 = vsel %vm132_vm4, %v2189_v42, %v129_v51 }
  0x9f   :  { %v144_v56 = vmul.f32 %v133_v55, %v2432_v0 }
  0xa0   :  { %v137_v57 = vmul.f32 0.5, %v136_v54  ;;  %v2642_v54 = vld [vmem:[%s3275_s1 + $0x8] sm:$0xff] }
  0xa1   :  { %v150_v58 = vmul.f32 %v2177_v53, %v144_v56 }
  0xa2   :  { %v138_v59 = vsub.f32 1.5, %v137_v57 }
  0xa3   :  { %1998 = vmatmul.msk.f32.vlgmr.msra.gmra.mxu0 %vm106_vm0, %v150_v58  ;;  %2000 = vmatmul.msk.f32.vlgmr.msra.gmra.mxu1 %vm106_vm0, %v150_v58  ;;  %v2649_v58 = vld [vmem:[%s3275_s1 + $0x10] sm:$0xff] }
  0xa4   :  { %v139_v60 = vmul.f32 %v2191_v50, %v138_v59 }
  0xa6   :  { %v143_v61 = vsel %vm142_vm7, %v2191_v50, %v139_v60 }
  0xa7   :  { %v145_v62 = vmul.f32 %v143_v61, %v2439_v2 }
  0xa9   :  { %v151_v63 = vmul.f32 %v2177_v53, %v145_v62  ;;  %v2656_v62 = vld [vmem:[%s3275_s1 + $0x20] sm:$0xff] }
  0xab   :  { %1999 = vmatmul.msk.f32.gmra.mxu0 %vm106_vm0, %v151_v63  ;;  %2001 = vmatmul.msk.f32.gmra.mxu1 %vm106_vm0, %v151_v63 }
 0x120   :  { %v183_v4 = vpop.f32.mrf.mxu0  ;;  %v2569_v5 = vpop.f32.mrf.mxu1 }
 0x121   :  { %2002 = vmatmul.msk.f32.vlgmr.msra.gmra.mxu2 %vm106_vm0, %v183_v4  ;;  %2004 = vmatmul.msk.f32.vlgmr.msra.gmra.mxu3 %vm259_vm8, %v2569_v5  ;;  %v220_v12 = vmul.f32 %v183_v4, %v84_v8  ;;  %v257_v34 = vmul.f32 %v2569_v5, %v2605_v27  ;;  %v2663_v8 = vld [vmem:[%s3275_s1 + $0x18] sm:$0xff] }
 0x128   :  { %v186_v6 = vpop.f32.mrf.mxu0  ;;  %v2574_v7 = vpop.f32.mrf.mxu1 }
 0x129   :  { %2003 = vmatmul.msk.f32.gmra.mxu2 %vm106_vm0, %v186_v6  ;;  %2005 = vmatmul.msk.f32.gmra.mxu3 %vm259_vm8, %v2574_v7  ;;  %v221_v23 = vmul.f32 %v186_v6, %v85_v15  ;;  %v258_v25 = vmul.f32 %v2574_v7, %v89_v18 }
 0x1a4   :  { %v245_v10 = vpop.f32.mrf.mxu2  ;;  %v283_v11 = vpop.f32.mrf.mxu3 }
 0x1a5   :  { %v251_v13 = vmul.f32 %v245_v10, %v86_v9  ;;  %v289_v29 = vmul.f32 %v283_v11, %v90_v20  ;;  %v2668_v10 = vld [vmem:[%s3275_s1 + $0x30] sm:$0xff] }
 0x1a7   :  { %v253_v14 = vadd.f32 %v251_v13, %v220_v12  ;;  %v291_v37 = vadd.f32 %v289_v29, %v257_v34  ;;  %v2673_v13 = vld [vmem:[%s3275_s1 + $0x28] sm:$0xff]  ;;  %v2686_v29 = vld [vmem:[%s3275_s1 + $0x38] sm:$0xff] }
 0x1a9   :  { %v255_v16 = vmul.f32 0.25, %v253_v14 }
 0x1ab   :  { %329 = vrot.lane.b32.xlu2 %v255_v16, %s2305_s27 }
 0x1ac   :  { %v248_v21 = vpop.f32.mrf.mxu2  ;;  %v286_v22 = vpop.f32.mrf.mxu3 }
 0x1ad   :  { %v252_v24 = vmul.f32 %v248_v21, %v87_v17  ;;  %v290_v26 = vmul.f32 %v286_v22, %v91_v19 }
 0x1af   :  { %v254_v30 = vadd.f32 %v252_v24, %v221_v23  ;;  %v292_v31 = vadd.f32 %v290_v26, %v258_v25 }
 0x1b1   :  { %v256_v36 = vmul.f32 0.25, %v254_v30  ;;  %366 = vrot.lane.b32.xlu1 %v292_v31, %s2305_s27  ;;  %2006 = vmatpush.xpose.msk.msrb.mxu3 %vm293_vm9, %v292_v31 }
 0x1b2   :  { %2010 = vmatpush.xpose.msk.msrb.mxu0 %vm293_vm9, %v292_v31 }
 0x1b3   :  { %360 = vrot.lane.b32.xlu2 %v255_v16, %s2306_s22  ;;  %331 = vrot.lane.b32.xlu0 %v256_v36, %s2305_s27 }
 0x1b5   :  { %2007 = vmatpush.xpose.msk.msrb.mxu3 %vm293_vm9, %v291_v37 }
 0x1b6   :  { %2011 = vmatpush.xpose.msk.msrb.mxu0 %vm293_vm9, %v291_v37 }
 0x1b8   :  { %2008 = vmatmul.msk.f32.vlgmr.msrb.gmra.mxu3 %vm293_vm9, %v255_v16 }
 0x1b9   :  { %364 = vrot.lane.b32.xlu1 %v291_v37, %s2305_s27 }
 0x1bb   :  { %399 = vrot.lane.b32.xlu2 %v255_v16, %s3297_s23 }
 0x1c0   :  { %2009 = vmatmul.msk.f32.gmra.mxu3 %vm293_vm9, %v256_v36 }
 0x1c1   :  { %362 = vrot.lane.b32.xlu1 %v256_v36, %s2306_s22 }
 0x1c9   :  { %401 = vrot.lane.b32.xlu1 %v256_v36, %s3297_s23 }
 0x205   :  { %v330_v39 = vpop.permute.xlu2 %329 }
 0x206   :  { %2012 = vmatmul.msk.f32.vlgmr.msrb.gmra.mxu0 %vm293_vm9, %v330_v39  ;;  %v2157_v39 = vpack.i.bf16 %v2569_v5, %v2574_v7 }
 0x20d   :  { %v361_v42 = vpop.permute.xlu2 %360 }
 0x215   :  { %v400_v47 = vpop.permute.xlu2 %399 }
 0x223   :  { %v367_v40 = vpop.permute.xlu1 %366 }
 0x224   :  { %2014 = vmatpush.xpose.msk.msrb.mxu1 %vm293_vm9, %v367_v40  ;;  %2018 = vmatpush.xpose.msk.msrb.mxu2 %vm293_vm9, %v367_v40 }
 0x225   :  { %v332_v43 = vpop.permute.xlu0 %331 }
 0x226   :  { %2013 = vmatmul.msk.f32.gmra.mxu0 %vm293_vm9, %v332_v43 }
 0x22b   :  { %v365_v45 = vpop.permute.xlu1 %364 }
 0x22c   :  { %2015 = vmatpush.xpose.msk.msrb.mxu1 %vm293_vm9, %v365_v45  ;;  %2019 = vmatpush.xpose.msk.msrb.mxu2 %vm293_vm9, %v365_v45 }
 0x22f   :  { %2016 = vmatmul.msk.f32.vlgmr.msrb.gmra.mxu1 %vm293_vm9, %v361_v42  ;;  %2020 = vmatmul.msk.f32.vlgmr.msrb.gmra.mxu2 %vm293_vm9, %v400_v47 }
 0x233   :  { %v363_v48 = vpop.permute.xlu1 %362 }
 0x237   :  { %2017 = vmatmul.msk.f32.gmra.mxu1 %vm293_vm9, %v363_v48 }
 0x23b   :  { %v323_v50 = vpop.f32.mrf.mxu3  ;;  %v402_v51 = vpop.permute.xlu1 %401 }
 0x23c   :  { %v430_v52 = vadd.f32 %v323_v50, %v2634_v49  ;;  %2021 = vmatmul.msk.f32.gmra.mxu2 %vm293_vm9, %v402_v51 }
 0x23e   :  { %v438_v53 = vsel %vm293_vm9, %v430_v52, -inf }
 0x23f   :  { %439 = vmax.xlane.f32.xlu2 %v438_v53 }
 0x243   :  { %v326_v55 = vpop.f32.mrf.mxu3 }
 0x244   :  { %v431_v56 = vadd.f32 %v326_v55, %v2642_v54 }
 0x246   :  { %v441_v57 = vsel %vm293_vm9, %v431_v56, -inf }
 0x247   :  { %442 = vmax.xlane.f32.xlu1 %v441_v57 }
 0x283   :  { %v354_v59 = vpop.f32.mrf.mxu0 }
 0x284   :  { %v432_v60 = vadd.f32 %v354_v59, %v2649_v58 }
 0x286   :  { %v444_v61 = vsel %vm293_vm9, %v432_v60, -inf }
 0x287   :  { %445 = vmax.xlane.f32.xlu0 %v444_v61 }
 0x2a3   :  { %v357_v9 = vpop.f32.mrf.mxu0 }
 0x2a4   :  { %v433_v14 = vadd.f32 %v357_v9, %v2663_v8 }
 0x2a6   :  { %v447_v21 = vsel %vm293_vm9, %v433_v14, -inf }
 0x2ac   :  { %v393_v63 = vpop.f32.mrf.mxu1 }
 0x2ad   :  { %v434_v4 = vadd.f32 %v393_v63, %v2656_v62 }
 0x2af   :  { %v450_v6 = vsel %vm293_vm9, %v434_v4, -inf }
 0x2b0   :  { %451 = vmax.xlane.f32.xlu2 %v450_v6 }
 0x2b2   :  { %v440_v11 = vpop.xlane.xlu2 %439  ;;  %v424_v12 = vpop.f32.mrf.mxu2 }
 0x2b3   :  { %v462_v15 = vsub.f32 %v430_v52, %v440_v11  ;;  %v436_v16 = vadd.f32 %v424_v12, %v2668_v10 }
 0x2b4   :  { %v396_v17 = vpop.f32.mrf.mxu1 }
 0x2b5   :  { %v470_v18 = vmul.f32 1.442695, %v462_v15  ;;  %v435_v19 = vadd.f32 %v396_v17, %v2673_v13  ;;  %v456_v20 = vsel %vm293_vm9, %v436_v16, -inf }
 0x2b6   :  { %457 = vmax.xlane.f32.xlu0 %v456_v20 }
 0x2b7   :  { %2192 = vpow2.f32 %v470_v18  ;;  %v453_v22 = vsel %vm293_vm9, %v435_v19, -inf }
 0x2b8   :  { %448 = vmax.xlane.f32.xlu2 %v447_v21  ;;  %454 = vmax.xlane.f32.xlu1 %v453_v22 }
 0x2ba   :  { %v443_v23 = vpop.xlane.xlu1 %442 }
 0x2bb   :  { %v463_v24 = vsub.f32 %v431_v56, %v443_v23 }
 0x2bd   :  { %v2681_v25 = vpop.eup %2192  ;;  %v472_v26 = vmul.f32 1.442695, %v463_v24 }
 0x2be   :  { %v486_v30 = vsel %vm293_vm9, %v2681_v25, 0.0 }
 0x2bf   :  { %v427_v31 = vpop.f32.mrf.mxu2  ;;  %2194 = vpow2.f32 %v472_v26 }
 0x2c0   :  { %v437_v34 = vadd.f32 %v427_v31, %v2686_v29  ;;  %487 = vadd.xlane.f32.xlu1 %v486_v30 }
 0x2c2   :  { %v459_v36 = vsel %vm293_vm9, %v437_v34, -inf }
 0x2c3   :  { %460 = vmax.xlane.f32.xlu2 %v459_v36 }
 0x2c5   :  { %v2195_v37 = vpop.eup %2194 }
 0x2c6   :  { %v489_v40 = vsel %vm293_vm9, %v2195_v37, 0.0 }
 0x2ca   :  { %2158 = vrot.lane.b32.xlu0 %v2157_v39, %s2306_s22 }
 0x2cb   :  { %490 = vadd.xlane.f32.xlu2 %v489_v40 }
 0x2fa   :  { %v446_v42 = vpop.xlane.xlu0 %445 }
 0x2fb   :  { %v464_v43 = vsub.f32 %v432_v60, %v446_v42 }
 0x2fd   :  { %v474_v45 = vmul.f32 1.442695, %v464_v43 }
 0x2ff   :  { %2196 = vpow2.f32 %v474_v45 }
 0x305   :  { %v2197_v47 = vpop.eup %2196 }
 0x306   :  { %v492_v48 = vsel %vm293_vm9, %v2197_v47, 0.0 }
 0x307   :  { %493 = vadd.xlane.f32.xlu1 %v492_v48  ;;  %v527_v48 = vld [vmem:[%s3276_s12 + $0x8] sm:$0xff] }
 0x308   :  { %601 = vmatpush.msra.mxu0 %v527_v48 }
 0x320   :  { %2163 = vrot.lane.b32.xlu1 %v2157_v39, %s3297_s23 }
 0x323   :  { %v452_v50 = vpop.xlane.xlu2 %451 }
 0x324   :  { %v466_v51 = vsub.f32 %v434_v4, %v452_v50 }
 0x326   :  { %v478_v52 = vmul.f32 1.442695, %v466_v51 }
 0x328   :  { %2198 = vpow2.f32 %v478_v52 }
 0x329   :  { %v458_v5 = vpop.xlane.xlu0 %457 }
 0x32a   :  { %v468_v59 = vsub.f32 %v436_v16, %v458_v5 }
 0x32b   :  { %v449_v7 = vpop.xlane.xlu2 %448  ;;  %v455_v53 = vpop.xlane.xlu1 %454 }
 0x32c   :  { %v465_v55 = vsub.f32 %v433_v14, %v449_v7  ;;  %v467_v56 = vsub.f32 %v435_v19, %v455_v53  ;;  %v482_v6 = vmul.f32 1.442695, %v468_v59  ;;  %v529_v7 = vld [vmem:[%s3276_s12 + $0x18] sm:$0xff] }
 0x32d   :  { %632 = vmatpush.msra.mxu1 %v529_v7  ;;  %v807_v7 = vld [vmem:[%s3278_s14 + $0x78] sm:$0xff] }
 0x32e   :  { %v2199_v57 = vpop.eup %2198  ;;  %v476_v60 = vmul.f32 1.442695, %v465_v55  ;;  %v480_v61 = vmul.f32 1.442695, %v467_v56 }
 0x32f   :  { %v498_v63 = vsel %vm293_vm9, %v2199_v57, 0.0 }
 0x330   :  { %2200 = vpow2.f32 %v476_v60  ;;  %499 = vadd.xlane.f32.xlu2 %v498_v63 }
 0x331   :  { %2202 = vpow2.f32 %v480_v61 }
 0x332   :  { %2204 = vpow2.f32 %v482_v6 }
 0x333   :  { %v488_v9 = vpop.xlane.xlu1 %487 }
 0x334   :  { %2206 = vrcp.f32 %v488_v9 }
 0x336   :  { %v2201_v11 = vpop.eup %2200  ;;  %v461_v4 = vpop.xlane.xlu2 %460 }
 0x337   :  { %v2203_v12 = vpop.eup %2202  ;;  %v469_v15 = vsub.f32 %v437_v34, %v461_v4  ;;  %v495_v14 = vsel %vm293_vm9, %v2201_v11, 0.0 }
 0x338   :  { %496 = vadd.xlane.f32.xlu2 %v495_v14  ;;  %v501_v16 = vsel %vm293_vm9, %v2203_v12, 0.0  ;;  %v2205_v18 = vpop.eup %2204 }
 0x339   :  { %502 = vadd.xlane.f32.xlu0 %v501_v16  ;;  %v484_v17 = vmul.f32 1.442695, %v469_v15  ;;  %v504_v24 = vsel %vm293_vm9, %v2205_v18, 0.0  ;;  %v531_v15 = vld [vmem:[%s3276_s12 + $0x28] sm:$0xff]  ;;  %v530_v16 = vld [vmem:[%s3276_s12 + $0x20] sm:$0xff] }
 0x33a   :  { %v2207_v20 = vpop.eup %2206 }
 0x33b   :  { %2208 = vpow2.f32 %v484_v17  ;;  %v518_v26 = vmul.f32 %v2207_v20, %v2681_v25  ;;  %v533_v17 = vld [vmem:[%s3276_s12 + $0x38] sm:$0xff] }
 0x33c   :  { %v2159_v19 = vpop.permute.xlu0 %2158 }
 0x33d   :  { %v2160_v21 = vunpack.i.l.bf16 %v2159_v19  ;;  %v2161_v23 = vunpack.i.h.bf16 %v2159_v19 }
 0x33e   :  { %v491_v22 = vpop.xlane.xlu2 %490 }
 0x33f   :  { %2210 = vrcp.f32 %v491_v22  ;;  %566 = vmatpush.msra.mxu3 %v2160_v21 }
 0x340   :  { %505 = vadd.xlane.f32.xlu2 %v504_v24 }
 0x341   :  { %567 = vmatpush.msra.mxu3 %v2161_v23  ;;  %v2209_v30 = vpop.eup %2208 }
 0x342   :  { %2022 = vmatmul.msk.f32.vlgmr.msra.gmra.mxu3 %vm293_vm9, %v518_v26  ;;  %v507_v34 = vsel %vm293_vm9, %v2209_v30, 0.0 }
 0x345   :  { %v2211_v31 = vpop.eup %2210 }
 0x346   :  { %v519_v36 = vmul.f32 %v2211_v31, %v2195_v37  ;;  %v526_v37 = vld [vmem:[%s3276_s12] sm:$0xff] }
 0x347   :  { %602 = vmatpush.msra.mxu0 %v526_v37 }
 0x348   :  { %508 = vadd.xlane.f32.xlu2 %v507_v34 }
 0x349   :  { %710 = vmatpush.msrb.mxu0 %v531_v15  ;;  %v793_v15 = vld [vmem:[%s3278_s14 + $0x8] sm:$0xff] }
 0x34a   :  { %2023 = vmatmul.msk.f32.gmra.mxu3 %vm293_vm9, %v519_v36 }
 0x34b   :  { %711 = vmatpush.msrb.mxu0 %v530_v16 }
 0x37a   :  { %v494_v39 = vpop.xlane.xlu1 %493 }
 0x37b   :  { %2212 = vrcp.f32 %v494_v39 }
 0x381   :  { %v2213_v40 = vpop.eup %2212 }
 0x382   :  { %v520_v42 = vmul.f32 %v2213_v40, %v2197_v47 }
 0x384   :  { %2024 = vmatmul.msk.f32.gmra.mxu3 %vm293_vm9, %v520_v42 }
 0x392   :  { %v2164_v43 = vpop.permute.xlu1 %2163 }
 0x393   :  { %v2165_v25 = vunpack.i.l.bf16 %v2164_v43  ;;  %v2166_v45 = vunpack.i.h.bf16 %v2164_v43 }
 0x395   :  { %675 = vmatpush.msra.mxu2 %v2165_v25 }
 0x397   :  { %676 = vmatpush.msra.mxu2 %v2166_v45 }
 0x3a3   :  { %v500_v50 = vpop.xlane.xlu2 %499 }
 0x3a4   :  { %2214 = vrcp.f32 %v500_v50 }
 0x3aa   :  { %v2215_v47 = vpop.eup %2214 }
 0x3ab   :  { %v522_v51 = vmul.f32 %v2215_v47, %v2199_v57  ;;  %v497_v52 = vpop.xlane.xlu2 %496 }
 0x3ac   :  { %2216 = vrcp.f32 %v497_v52  ;;  %v503_v5 = vpop.xlane.xlu0 %502 }
 0x3ad   :  { %2218 = vrcp.f32 %v503_v5  ;;  %2030 = vmatmul.msk.f32.vlgmr.msra.gmra.mxu2 %vm293_vm9, %v522_v51 }
 0x3b2   :  { %v2217_v53 = vpop.eup %2216 }
 0x3b3   :  { %v2219_v55 = vpop.eup %2218  ;;  %v506_v56 = vpop.xlane.xlu2 %505  ;;  %v521_v59 = vmul.f32 %v2217_v53, %v2201_v11  ;;  %v804_v53 = vld [vmem:[%s3278_s14 + $0x60] sm:$0xff] }
 0x3b4   :  { %2220 = vrcp.f32 %v506_v56  ;;  %v523_v60 = vmul.f32 %v2219_v55, %v2203_v12  ;;  %v528_v12 = vld [vmem:[%s3276_s12 + $0x10] sm:$0xff]  ;;  %v805_v55 = vld [vmem:[%s3278_s14 + $0x68] sm:$0xff] }
 0x3b5   :  { %2025 = vmatmul.msk.f32.gmra.mxu3 %vm293_vm9, %v521_v59  ;;  %633 = vmatpush.msra.mxu1 %v528_v12  ;;  %v802_v56 = vld [vmem:[%s3278_s14 + $0x50] sm:$0xff]  ;;  %v803_v59 = vld [vmem:[%s3278_s14 + $0x58] sm:$0xff]  ;;  %v792_v12 = vld [vmem:[%s3278_s14] sm:$0xff] }
 0x3b6   :  { %2031 = vmatmul.msk.f32.gmra.mxu2 %vm293_vm9, %v523_v60  ;;  %v800_v60 = vld [vmem:[%s3278_s14 + $0x40] sm:$0xff] }
 0x3b7   :  { %741 = vmatpush.msrb.mxu1 %v533_v17 }
 0x3ba   :  { %v2221_v57 = vpop.eup %2220 }
 0x3bb   :  { %v509_v61 = vpop.xlane.xlu2 %508  ;;  %v524_v63 = vmul.f32 %v2221_v57, %v2205_v18  ;;  %v532_v18 = vld [vmem:[%s3276_s12 + $0x30] sm:$0xff]  ;;  %v801_v57 = vld [vmem:[%s3278_s14 + $0x48] sm:$0xff] }
 0x3bc   :  { %2222 = vrcp.f32 %v509_v61  ;;  %742 = vmatpush.msrb.mxu1 %v532_v18  ;;  %v798_v61 = vld [vmem:[%s3278_s14 + $0x30] sm:$0xff] }
 0x3be   :  { %2032 = vmatmul.msk.f32.gmra.mxu2 %vm293_vm9, %v524_v63  ;;  %v799_v63 = vld [vmem:[%s3278_s14 + $0x38] sm:$0xff] }
 0x3c2   :  { %v2223_v6 = vpop.eup %2222 }
 0x3c3   :  { %v525_v9 = vmul.f32 %v2223_v6, %v2209_v30  ;;  %v796_v6 = vld [vmem:[%s3278_s14 + $0x20] sm:$0xff] }
 0x3c5   :  { %v569_v4 = vpop.f32.mrf.mxu3 }
 0x3c6   :  { %2033 = vmatmul.msk.f32.gmra.mxu2 %vm293_vm9, %v525_v9  ;;  %2026 = vmatmul.msk.f32.vlgmr.msra.gmra.mxu0 %vm293_vm9, %v569_v4  ;;  %v797_v9 = vld [vmem:[%s3278_s14 + $0x28] sm:$0xff]  ;;  %v794_v4 = vld [vmem:[%s3278_s14 + $0x10] sm:$0xff] }
 0x3c7   :  { %845 = vmatpush.msra.mxu0 %v807_v7  ;;  %v906_v7 = vld [vmem:[%s3279_s15 + $0x20] sm:$0xff] }
 0x3c9   :  { %846 = vmatpush.msra.mxu0 %v805_v55  ;;  %v904_v55 = vld [vmem:[%s3279_s15 + $0x10] sm:$0xff] }
 0x3cb   :  { %847 = vmatpush.msra.mxu0 %v803_v59  ;;  %v902_v59 = vld [vmem:[%s3279_s15] sm:$0xff] }
 0x3cd   :  { %v572_v11 = vpop.f32.mrf.mxu3  ;;  %848 = vmatpush.msra.mxu0 %v801_v57 }
 0x3ce   :  { %2027 = vmatmul.msk.f32.gmra.mxu0 %vm293_vm9, %v572_v11  ;;  %v795_v11 = vld [vmem:[%s3278_s14 + $0x18] sm:$0xff] }
 0x3cf   :  { %849 = vmatpush.msra.mxu0 %v799_v63 }
 0x3d1   :  { %850 = vmatpush.msra.mxu0 %v797_v9 }
 0x3d3   :  { %851 = vmatpush.msra.mxu0 %v795_v11 }
 0x3d5   :  { %852 = vmatpush.msra.mxu0 %v793_v15 }
 0x407   :  { %v575_v14 = vpop.f32.mrf.mxu3 }
 0x408   :  { %2028 = vmatmul.msk.f32.vlgmr.msra.gmra.mxu1 %vm293_vm9, %v575_v14 }
 0x430   :  { %v678_v19 = vpop.f32.mrf.mxu2 }
 0x431   :  { %2034 = vmatmul.msk.f32.vlgmr.msrb.gmra.mxu0 %vm293_vm9, %v678_v19 }
 0x432   :  { %1070 = vmatpush.msrb.mxu0 %v2499_v32 }
 0x434   :  { %1071 = vmatpush.msrb.mxu0 %v2504_v33 }
 0x436   :  { %1072 = vmatpush.msrb.mxu0 %v2513_v35 }
 0x438   :  { %v578_v20 = vpop.f32.mrf.mxu3  ;;  %1073 = vmatpush.msrb.mxu0 %v2525_v38 }
 0x439   :  { %v681_v21 = vpop.f32.mrf.mxu2  ;;  %2029 = vmatmul.msk.f32.gmra.mxu1 %vm293_vm9, %v578_v20 }
 0x43a   :  { %2035 = vmatmul.msk.f32.gmra.mxu0 %vm293_vm9, %v681_v21 }
 0x43b   :  { %1074 = vmatpush.msrb.mxu0 %v2532_v41 }
 0x43d   :  { %1075 = vmatpush.msrb.mxu0 %v2538_v44  ;;  %v2179_v44 = vld [vmem:[%s3277_s13] ss:$0 sm:$0xff] }
 0x43f   :  { %1076 = vmatpush.msrb.mxu0 %v2544_v46 }
 0x441   :  { %v684_v22 = vpop.f32.mrf.mxu2  ;;  %1077 = vmatpush.msrb.mxu0 %v2560_v1 }
 0x442   :  { %2036 = vmatmul.msk.f32.vlgmr.msrb.gmra.mxu1 %vm293_vm9, %v684_v22 }
 0x443   :  { %v604_v24 = vpop.f32.mrf.mxu0 }
 0x444   :  { %v610_v34 = vadd.f32 %v604_v24, %v2432_v0 }
 0x449   :  { %v687_v23 = vpop.f32.mrf.mxu2 }
 0x44a   :  { %2037 = vmatmul.msk.f32.gmra.mxu1 %vm293_vm9, %v687_v23 }
 0x44b   :  { %v607_v30 = vpop.f32.mrf.mxu0 }
 0x44c   :  { %v611_v43 = vadd.f32 %v607_v30, %v2439_v2  ;;  %v806_v2 = vld [vmem:[%s3278_s14 + $0x70] sm:$0xff] }
 0x44d   :  { %822 = vmatpush.msrb.mxu3 %v806_v2  ;;  %v907_v2 = vld [vmem:[%s3279_s15 + $0x28] sm:$0xff] }
 0x44f   :  { %823 = vmatpush.msrb.mxu3 %v804_v53  ;;  %v905_v53 = vld [vmem:[%s3279_s15 + $0x18] sm:$0xff] }
 0x451   :  { %824 = vmatpush.msrb.mxu3 %v802_v56  ;;  %v903_v56 = vld [vmem:[%s3279_s15 + $0x8] sm:$0xff] }
 0x453   :  { %825 = vmatpush.msrb.mxu3 %v800_v60 }
 0x455   :  { %826 = vmatpush.msrb.mxu3 %v798_v61 }
 0x457   :  { %827 = vmatpush.msrb.mxu3 %v796_v6 }
 0x459   :  { %828 = vmatpush.msrb.mxu3 %v794_v4 }
 0x45b   :  { %829 = vmatpush.msrb.mxu3 %v792_v12 }
 0x485   :  { %v635_v26 = vpop.f32.mrf.mxu1 }
 0x486   :  { %v641_v39 = vadd.f32 %v635_v26, %v610_v34 }
 0x4ae   :  { %v713_v36 = vpop.f32.mrf.mxu0 }
 0x4af   :  { %v719_v40 = vadd.f32 %v713_v36, %v641_v39 }
 0x4b6   :  { %v638_v31 = vpop.f32.mrf.mxu1 }
 0x4b7   :  { %v642_v45 = vadd.f32 %v638_v31, %v611_v43  ;;  %v716_v37 = vpop.f32.mrf.mxu0  ;;  %v916_v43 = vld [vmem:[%s3279_s15 + $0x70] sm:$0xff] }
 0x4b9   :  { %v720_v47 = vadd.f32 %v716_v37, %v642_v45  ;;  %v915_v45 = vld [vmem:[%s3279_s15 + $0x68] sm:$0xff]  ;;  %v912_v37 = vld [vmem:[%s3279_s15 + $0x50] sm:$0xff] }
 0x4bf   :  { %v744_v42 = vpop.f32.mrf.mxu1 }
 0x4c0   :  { %v2746_v25 = vadd.f32 %v744_v42, %v719_v40  ;;  %v917_v42 = vld [vmem:[%s3279_s15 + $0x78] sm:$0xff] }
 0x4c1   :  { %918 = vmatpush.msrb.mxu2 %v917_v42 }
 0x4c2   :  { %v752_v48 = vmul.f32 %v2746_v25, %v2746_v25 }
 0x4c3   :  { %919 = vmatpush.msrb.mxu2 %v916_v43 }
 0x4c4   :  { %v754_v50 = vsel %vm106_vm0, %v752_v48, 0.0  ;;  %v914_v48 = vld [vmem:[%s3279_s15 + $0x60] sm:$0xff] }
 0x4c5   :  { %755 = vadd.xlane.f32.xlu1 %v754_v50  ;;  %920 = vmatpush.msrb.mxu2 %v915_v45  ;;  %v913_v50 = vld [vmem:[%s3279_s15 + $0x58] sm:$0xff] }
 0x4c7   :  { %v747_v51 = vpop.f32.mrf.mxu1  ;;  %921 = vmatpush.msrb.mxu2 %v914_v48 }
 0x4c8   :  { %v2751_v52 = vadd.f32 %v747_v51, %v720_v47  ;;  %v911_v47 = vld [vmem:[%s3279_s15 + $0x48] sm:$0xff]  ;;  %v910_v51 = vld [vmem:[%s3279_s15 + $0x40] sm:$0xff] }
 0x4c9   :  { %922 = vmatpush.msrb.mxu2 %v913_v50 }
 0x4ca   :  { %v753_v0 = vmul.f32 %v2751_v52, %v2751_v52 }
 0x4cb   :  { %923 = vmatpush.msrb.mxu2 %v912_v37 }
 0x4cc   :  { %v757_v5 = vsel %vm106_vm0, %v753_v0, 0.0  ;;  %v909_v0 = vld [vmem:[%s3279_s15 + $0x38] sm:$0xff] }
 0x4cd   :  { %758 = vadd.xlane.f32.xlu2 %v757_v5  ;;  %924 = vmatpush.msrb.mxu2 %v911_v47  ;;  %v908_v5 = vld [vmem:[%s3279_s15 + $0x30] sm:$0xff] }
 0x4cf   :  { %925 = vmatpush.msrb.mxu2 %v910_v51  ;;  %v2062_v51 = vld [vmem:[%s3311_s3 + $0x78] sm:$0xff] }
 0x4d0   :  { %1039 = vmatpush.msra.mxu3 %v2062_v51 }
 0x4d1   :  { %926 = vmatpush.msrb.mxu2 %v909_v0  ;;  %v2061_v0 = vld [vmem:[%s3311_s3 + $0x70] sm:$0xff] }
 0x4d2   :  { %1040 = vmatpush.msra.mxu3 %v2061_v0 }
 0x4d3   :  { %927 = vmatpush.msrb.mxu2 %v908_v5  ;;  %v2050_v5 = vld [vmem:[%s3310_s26 + $0x68] sm:$0xff] }
 0x4d5   :  { %928 = vmatpush.msrb.mxu2 %v907_v2  ;;  %v2060_v2 = vld [vmem:[%s3311_s3 + $0x68] sm:$0xff] }
 0x4d6   :  { %1041 = vmatpush.msra.mxu3 %v2060_v2  ;;  %v2299_v2 = vld [vmem:[%s3315_s2 + $0x8] sm:$0xff] }
 0x4d7   :  { %929 = vmatpush.msrb.mxu2 %v906_v7  ;;  %v2049_v7 = vld [vmem:[%s3310_s26 + $0x60] sm:$0xff] }
 0x4d9   :  { %930 = vmatpush.msrb.mxu2 %v905_v53  ;;  %v2059_v53 = vld [vmem:[%s3311_s3 + $0x60] sm:$0xff] }
 0x4da   :  { %1042 = vmatpush.msra.mxu3 %v2059_v53  ;;  %v2300_v53 = vld [vmem:[%s3274_s5] sm:$0xff] }
 0x4db   :  { %931 = vmatpush.msrb.mxu2 %v904_v55  ;;  %v2048_v55 = vld [vmem:[%s3310_s26 + $0x58] sm:$0xff] }
 0x4dd   :  { %932 = vmatpush.msrb.mxu2 %v903_v56  ;;  %v2058_v56 = vld [vmem:[%s3311_s3 + $0x58] sm:$0xff] }
 0x4de   :  { %1043 = vmatpush.msra.mxu3 %v2058_v56  ;;  %v2301_v56 = vld [vmem:[%s3316_s28 + $0x8] sm:$0xff] }
 0x4df   :  { %933 = vmatpush.msrb.mxu2 %v902_v59  ;;  %v2047_v59 = vld [vmem:[%s3310_s26 + $0x50] sm:$0xff] }
 0x538   :  { %v756_v14 = vpop.xlane.xlu1 %755 }
 0x539   :  { %v760_v16 = vmul.f32 %v756_v14, %v2493_v28 }
 0x53b   :  { %v762_v17 = vadd.f32 1e-05, %v760_v16 }
 0x53d   :  { %2224 = vrsqrt.f32 %v762_v17  ;;  %vm770_vm11 = vweird.f32 %v762_v17 }
 0x540   :  { %v759_v18 = vpop.xlane.xlu2 %758 }
 0x541   :  { %v761_v32 = vmul.f32 %v759_v18, %v2493_v28 }
 0x543   :  { %v2225_v33 = vpop.eup %2224  ;;  %v763_v35 = vadd.f32 1e-05, %v761_v32 }
 0x544   :  { %v765_v19 = vmul.f32 %v2225_v33, %v762_v17  ;;  %vm771_vm10 = vweird.f32 %v2225_v33 }
 0x545   :  { %2226 = vrsqrt.f32 %v763_v35  ;;  %vm772_vm12 = vmor %vm770_vm11, %vm771_vm10  ;;  %vm780_vm14 = vweird.f32 %v763_v35 }
 0x546   :  { %v766_v20 = vmul.f32 %v2225_v33, %v765_v19 }
 0x548   :  { %v767_v21 = vmul.f32 0.5, %v766_v20 }
 0x54a   :  { %v768_v38 = vsub.f32 1.5, %v767_v21 }
 0x54b   :  { %v2227_v22 = vpop.eup %2226 }
 0x54c   :  { %v769_v41 = vmul.f32 %v2225_v33, %v768_v38  ;;  %v775_v23 = vmul.f32 %v2227_v22, %v763_v35  ;;  %vm781_vm13 = vweird.f32 %v2227_v22 }
 0x54d   :  { %vm782_vm15 = vmor %vm780_vm14, %vm781_vm13 }
 0x54e   :  { %v773_v46 = vsel %vm772_vm12, %v2225_v33, %v769_v41  ;;  %v776_v24 = vmul.f32 %v2227_v22, %v775_v23 }
 0x54f   :  { %v784_v1 = vmul.f32 %v773_v46, %v2746_v25 }
 0x550   :  { %v777_v26 = vmul.f32 0.5, %v776_v24 }
 0x551   :  { %v790_v30 = vmul.f32 %v2179_v44, %v784_v1 }
 0x552   :  { %v778_v31 = vsub.f32 1.5, %v777_v26 }
 0x553   :  { %2038 = vmatmul.msk.f32.vlgmr.msrb.gmra.mxu3 %vm106_vm0, %v790_v30  ;;  %2040 = vmatmul.msk.f32.vlgmr.msra.gmra.mxu0 %vm106_vm0, %v790_v30 }
 0x554   :  { %v779_v34 = vmul.f32 %v2227_v22, %v778_v31 }
 0x556   :  { %v783_v36 = vsel %vm782_vm15, %v2227_v22, %v779_v34 }
 0x557   :  { %v785_v39 = vmul.f32 %v783_v36, %v2751_v52 }
 0x559   :  { %v791_v40 = vmul.f32 %v2179_v44, %v785_v39 }
 0x55b   :  { %2039 = vmatmul.msk.f32.gmra.mxu3 %vm106_vm0, %v791_v40  ;;  %2041 = vmatmul.msk.f32.gmra.mxu0 %vm106_vm0, %v791_v40 }
 0x5d0   :  { %v854_v21 = vpop.f32.mrf.mxu0 }
 0x5d6   :  { %v831_v60 = vpop.f32.mrf.mxu3 }
 0x5d7   :  { %v2042_v57 = vmul.f32 -1.442695, %v831_v60 }
 0x5d8   :  { %v857_v36 = vpop.f32.mrf.mxu0 }
 0x5d9   :  { %2228 = vpow2.f32 %v2042_v57  ;;  %v2046_v57 = vld [vmem:[%s3310_s26 + $0x48] sm:$0xff] }
 0x5de   :  { %v834_v61 = vpop.f32.mrf.mxu3 }
 0x5df   :  { %v2229_v63 = vpop.eup %2228  ;;  %v2043_v6 = vmul.f32 -1.442695, %v834_v61 }
 0x5e0   :  { %v866_v9 = vadd.f32 1.0, %v2229_v63  ;;  %v2045_v63 = vld [vmem:[%s3310_s26 + $0x40] sm:$0xff] }
 0x5e1   :  { %2230 = vpow2.f32 %v2043_v6  ;;  %v2055_v6 = vld [vmem:[%s3311_s3 + $0x40] sm:$0xff] }
 0x5e2   :  { %2232 = vrcp.f32 %v866_v9  ;;  %v879_v16 = vand.u32 2147483648, %v866_v9  ;;  %v877_v18 = vand.u32 2147483647, %v866_v9  ;;  %vm873_vm2 = vweird.f32 %v866_v9 }
 0x5e4   :  { %v880_v35 = vor.u32 1.1754944e-38, %v879_v16  ;;  %vm878_vm4 = vcmp.eq.f32.partialorder %v877_v18, 8.507059e+37 }
 0x5e7   :  { %v2231_v4 = vpop.eup %2230 }
 0x5e8   :  { %v2233_v11 = vpop.eup %2232  ;;  %v867_v12 = vadd.f32 1.0, %v2231_v4  ;;  %v2295_v4 = vld [vmem:[%s3313_s9 + $0x10] sm:$0xff] }
 0x5e9   :  { %v869_v15 = vmul.f32 %v2233_v11, %v866_v9  ;;  %vm874_vm1 = vweird.f32 %v2233_v11  ;;  %v2294_v9 = vld [vmem:[%s3313_s9 + $0x18] sm:$0xff] }
 0x5ea   :  { %2234 = vrcp.f32 %v867_v12  ;;  %vm875_vm3 = vmor %vm873_vm2, %vm874_vm1  ;;  %v894_v23 = vand.u32 2147483648, %v867_v12  ;;  %v892_v24 = vand.u32 2147483647, %v867_v12  ;;  %vm888_vm6 = vweird.f32 %v867_v12 }
 0x5eb   :  { %v870_v14 = vsub.f32 1.0, %v869_v15 }
 0x5ec   :  { %v895_v26 = vor.u32 1.1754944e-38, %v894_v23  ;;  %vm893_vm10 = vcmp.eq.f32.partialorder %v892_v24, 8.507059e+37 }
 0x5ed   :  { %v871_v17 = vmul.f32 %v2233_v11, %v870_v14 }
 0x5ef   :  { %v872_v32 = vadd.f32 %v2233_v11, %v871_v17 }
 0x5f0   :  { %v2235_v33 = vpop.eup %2234 }
 0x5f1   :  { %v876_v19 = vsel %vm875_vm3, %v2233_v11, %v872_v32  ;;  %v884_v20 = vmul.f32 %v2235_v33, %v867_v12  ;;  %vm889_vm5 = vweird.f32 %v2235_v33  ;;  %v2296_v11 = vld [vmem:[%s3313_s9 + $0x8] sm:$0xff] }
 0x5f2   :  { %v881_v38 = vsel %vm878_vm4, %v880_v35, %v876_v19  ;;  %vm890_vm7 = vmor %vm888_vm6, %vm889_vm5 }
 0x5f3   :  { %v898_v22 = vmul.f32 %v881_v38, %v831_v60  ;;  %v885_v41 = vsub.f32 1.0, %v884_v20  ;;  %v2057_v60 = vld [vmem:[%s3311_s3 + $0x50] sm:$0xff] }
 0x5f4   :  { %1044 = vmatpush.msra.mxu3 %v2057_v60 }
 0x5f5   :  { %v900_v44 = vmul.f32 %v898_v22, %v854_v21  ;;  %v886_v46 = vmul.f32 %v2235_v33, %v885_v41 }
 0x5f7   :  { %v887_v1 = vadd.f32 %v2235_v33, %v886_v46  ;;  %934 = vmatmul.f32.vlgmr.msrb.gmra.mxu2 %v900_v44 }
 0x5f9   :  { %v891_v30 = vsel %vm890_vm7, %v2235_v33, %v887_v1 }
 0x5fa   :  { %v896_v31 = vsel %vm893_vm10, %v895_v26, %v891_v30 }
 0x5fb   :  { %v899_v34 = vmul.f32 %v896_v31, %v834_v61  ;;  %v2056_v61 = vld [vmem:[%s3311_s3 + $0x48] sm:$0xff] }
 0x5fc   :  { %1045 = vmatpush.msra.mxu3 %v2056_v61 }
 0x5fd   :  { %v901_v39 = vmul.f32 %v899_v34, %v857_v36 }
 0x5fe   :  { %1046 = vmatpush.msra.mxu3 %v2055_v6 }
 0x5ff   :  { %937 = vmatmul.f32.gmra.mxu2 %v901_v39 }
 0x67a   :  { %v935_v40 = vpop.f32.mrf.mxu2 }
 0x67b   :  { %v2872_v42 = vadd.f32 %v935_v40, %v2746_v25  ;;  %v2052_v25 = vld [vmem:[%s3310_s26 + $0x78] sm:$0xff] }
 0x67c   :  { %1007 = vmatpush.msra.mxu1 %v2052_v25 }
 0x67d   :  { %v943_v43 = vmul.f32 %v2872_v42, %v2872_v42 }
 0x67f   :  { %v945_v45 = vsel %vm106_vm0, %v943_v43, 0.0 }
 0x680   :  { %946 = vadd.xlane.f32.xlu2 %v945_v45 }
 0x682   :  { %v938_v48 = vpop.f32.mrf.mxu2 }
 0x683   :  { %v2878_v50 = vadd.f32 %v938_v48, %v2751_v52  ;;  %v2051_v52 = vld [vmem:[%s3310_s26 + $0x70] sm:$0xff]  ;;  %v2297_v48 = vld [vmem:[%s3315_s2] sm:$0xff] }
 0x684   :  { %1008 = vmatpush.msra.mxu1 %v2051_v52 }
 0x685   :  { %v944_v37 = vmul.f32 %v2878_v50, %v2878_v50 }
 0x686   :  { %1009 = vmatpush.msra.mxu1 %v2050_v5 }
 0x687   :  { %v948_v47 = vsel %vm106_vm0, %v944_v37, 0.0 }
 0x688   :  { %949 = vadd.xlane.f32.xlu2 %v948_v47  ;;  %1010 = vmatpush.msra.mxu1 %v2049_v7  ;;  %v2298_v47 = vld [vmem:[%s3316_s28] sm:$0xff]  ;;  %s3319_s28 = sld [smem:[#allocation11_spill]] }
 0x68a   :  { %1011 = vmatpush.msra.mxu1 %v2048_v55 }
 0x68c   :  { %1012 = vmatpush.msra.mxu1 %v2047_v59 }
 0x68e   :  { %1013 = vmatpush.msra.mxu1 %v2046_v57 }
 0x690   :  { %1014 = vmatpush.msra.mxu1 %v2045_v63 }
 0x692   :  { %1111 = vmatpush.msrb.mxu1 %v2294_v9  ;;  %v2302_v9 = vld [vmem:[%s3273_s4 + $0x8] sm:$0xff]  ;;  %s3317_s4 = smov 80  }
 0x694   :  { %1112 = vmatpush.msrb.mxu1 %v2295_v4 }
 0x696   :  { %1113 = vmatpush.msrb.mxu1 %v2296_v11  ;;  %v2303_v11 = vld [vmem:[%s3274_s5 + $0x8] sm:$0xff] }
 0x698   :  { %1114 = vmatpush.msrb.mxu1 %v2565_v3  ;;  %v2178_v3 = vld [vmem:[%s3314_s11 + $0x1] ss:$0 sm:$0xff] }
 0x6f3   :  { %v947_v12 = vpop.xlane.xlu2 %946 }
 0x6f4   :  { %v951_v15 = vmul.f32 %v947_v12, %v2493_v28 }
 0x6f6   :  { %v953_v14 = vadd.f32 1e-05, %v951_v15 }
 0x6f8   :  { %2236 = vrsqrt.f32 %v953_v14  ;;  %vm961_vm12 = vweird.f32 %v953_v14 }
 0x6fb   :  { %v950_v16 = vpop.xlane.xlu2 %949 }
 0x6fc   :  { %v952_v17 = vmul.f32 %v950_v16, %v2493_v28 }
 0x6fe   :  { %v2237_v18 = vpop.eup %2236  ;;  %v954_v32 = vadd.f32 1e-05, %v952_v17 }
 0x6ff   :  { %v956_v33 = vmul.f32 %v2237_v18, %v953_v14  ;;  %vm962_vm11 = vweird.f32 %v2237_v18 }
 0x700   :  { %2238 = vrsqrt.f32 %v954_v32  ;;  %vm963_vm13 = vmor %vm961_vm12, %vm962_vm11  ;;  %vm971_vm15 = vweird.f32 %v954_v32 }
 0x701   :  { %v957_v35 = vmul.f32 %v2237_v18, %v956_v33 }
 0x703   :  { %v958_v19 = vmul.f32 0.5, %v957_v35 }
 0x705   :  { %v959_v20 = vsub.f32 1.5, %v958_v19 }
 0x706   :  { %v2239_v21 = vpop.eup %2238 }
 0x707   :  { %v960_v38 = vmul.f32 %v2237_v18, %v959_v20  ;;  %v966_v22 = vmul.f32 %v2239_v21, %v954_v32  ;;  %vm972_vm14 = vweird.f32 %v2239_v21 }
 0x708   :  { %vm973_vm1 = vmor %vm971_vm15, %vm972_vm14 }
 0x709   :  { %v964_v41 = vsel %vm963_vm13, %v2237_v18, %v960_v38  ;;  %v967_v23 = vmul.f32 %v2239_v21, %v966_v22 }
 0x70a   :  { %v975_v44 = vmul.f32 %v964_v41, %v2872_v42 }
 0x70b   :  { %v968_v46 = vmul.f32 0.5, %v967_v23 }
 0x70c   :  { %v982_v24 = vmul.f32 %v2178_v3, %v975_v44 }
 0x70d   :  { %v969_v1 = vsub.f32 1.5, %v968_v46 }
 0x70e   :  { %2053 = vmatmul.msk.f32.vlgmr.msra.gmra.mxu1 %vm106_vm0, %v982_v24  ;;  %2063 = vmatmul.msk.f32.vlgmr.msra.gmra.mxu3 %vm106_vm0, %v982_v24 }
 0x70f   :  { %v970_v26 = vmul.f32 %v2239_v21, %v969_v1 }
 0x711   :  { %v974_v30 = vsel %vm973_vm1, %v2239_v21, %v970_v26 }
 0x712   :  { %v976_v31 = vmul.f32 %v974_v30, %v2878_v50 }
 0x714   :  { %v983_v34 = vmul.f32 %v2178_v3, %v976_v31 }
 0x716   :  { %2054 = vmatmul.msk.f32.gmra.mxu1 %vm106_vm0, %v983_v34  ;;  %2064 = vmatmul.msk.f32.gmra.mxu3 %vm106_vm0, %v983_v34 }
 0x78b   :  { %v1016_v36 = vpop.f32.mrf.mxu1 }
 0x78c   :  { %2065 = vmatmul.msk.f32.vlgmr.msrb.gmra.mxu0 %vm106_vm0, %v1016_v36  ;;  %v1054_v37 = vmul.f32 %v2297_v48, %v1016_v36 }
 0x791   :  { %v2953_v39 = vpop.f32.mrf.mxu3 }
 0x792   :  { %2067 = vmatmul.msk.f32.vlgmr.msrb.gmra.mxu1 %vm259_vm8, %v2953_v39  ;;  %v1091_v60 = vmul.f32 %v2953_v39, %v2605_v27 }
 0x793   :  { %v1019_v40 = vpop.f32.mrf.mxu1 }
 0x794   :  { %2066 = vmatmul.msk.f32.gmra.mxu0 %vm106_vm0, %v1019_v40  ;;  %v1055_v7 = vmul.f32 %v2299_v2, %v1019_v40 }
 0x799   :  { %v2958_v43 = vpop.f32.mrf.mxu3 }
 0x79a   :  { %2068 = vmatmul.msk.f32.gmra.mxu1 %vm259_vm8, %v2958_v43  ;;  %v1092_v4 = vmul.f32 %v2302_v9, %v2958_v43  ;;  %v2167_v2 = vpack.i.bf16 %v2953_v39, %v2958_v43 }
 0x809   :  { %v1079_v45 = vpop.f32.mrf.mxu0 }
 0x80a   :  { %v1085_v25 = vmul.f32 %v2298_v47, %v1079_v45 }
 0x80c   :  { %v1087_v51 = vadd.f32 %v1085_v25, %v1054_v37 }
 0x80e   :  { %v1089_v52 = vmul.f32 0.25, %v1087_v51 }
 0x80f   :  { %v1116_v0 = vpop.f32.mrf.mxu1 }
 0x810   :  { %1161 = vrot.lane.b32.xlu0 %v1089_v52, %s2305_s27  ;;  %v1122_v55 = vmul.f32 %v2300_v53, %v1116_v0 }
 0x811   :  { %v1082_v5 = vpop.f32.mrf.mxu0 }
 0x812   :  { %v1086_v59 = vmul.f32 %v2301_v56, %v1082_v5  ;;  %v1124_v61 = vadd.f32 %v1122_v55, %v1091_v60 }
 0x814   :  { %v1088_v57 = vadd.f32 %v1086_v59, %v1055_v7 }
 0x816   :  { %v1090_v63 = vmul.f32 0.25, %v1088_v57 }
 0x817   :  { %v1119_v6 = vpop.f32.mrf.mxu1 }
 0x818   :  { %v1123_v12 = vmul.f32 %v2303_v11, %v1119_v6  ;;  %1196 = vrot.lane.b32.xlu0 %v1124_v61, %s2305_s27  ;;  %1163 = vrot.lane.b32.xlu1 %v1090_v63, %s2305_s27 }
 0x81a   :  { %v1125_v27 = vadd.f32 %v1123_v12, %v1092_v4 }
 0x81c   :  { %1198 = vrot.lane.b32.xlu2 %v1125_v27, %s2305_s27  ;;  %2069 = vmatpush.xpose.msk.msra.mxu2 %vm293_vm9, %v1125_v27 }
 0x81d   :  { %2073 = vmatpush.xpose.msk.msrb.mxu3 %vm293_vm9, %v1125_v27 }
 0x820   :  { %1192 = vrot.lane.b32.xlu0 %v1089_v52, %s2306_s22  ;;  %2070 = vmatpush.xpose.msk.msra.mxu2 %vm293_vm9, %v1124_v61 }
 0x821   :  { %2074 = vmatpush.xpose.msk.msrb.mxu3 %vm293_vm9, %v1124_v61 }
 0x823   :  { %2071 = vmatmul.msk.f32.vlgmr.msra.gmra.mxu2 %vm293_vm9, %v1089_v52 }
 0x824   :  { %1194 = vrot.lane.b32.xlu2 %v1090_v63, %s2306_s22 }
 0x828   :  { %1231 = vrot.lane.b32.xlu0 %v1089_v52, %s3317_s4 }
 0x82b   :  { %2072 = vmatmul.msk.f32.gmra.mxu2 %vm293_vm9, %v1090_v63 }
 0x82c   :  { %1233 = vrot.lane.b32.xlu2 %v1090_v63, %s3317_s4 }
 0x876   :  { %v1199_v15 = vpop.permute.xlu2 %1198 }
 0x877   :  { %2077 = vmatpush.xpose.msk.msra.mxu0 %vm293_vm9, %v1199_v15  ;;  %2081 = vmatpush.xpose.msk.msra.mxu1 %vm293_vm9, %v1199_v15 }
 0x87e   :  { %v1195_v32 = vpop.permute.xlu2 %1194 }
 0x882   :  { %v1162_v14 = vpop.permute.xlu0 %1161 }
 0x883   :  { %2075 = vmatmul.msk.f32.vlgmr.msrb.gmra.mxu3 %vm293_vm9, %v1162_v14 }
 0x886   :  { %v1234_v35 = vpop.permute.xlu2 %1233 }
 0x88a   :  { %v1197_v16 = vpop.permute.xlu0 %1196  ;;  %v1164_v17 = vpop.permute.xlu1 %1163 }
 0x88b   :  { %2076 = vmatmul.msk.f32.gmra.mxu3 %vm293_vm9, %v1164_v17  ;;  %2078 = vmatpush.xpose.msk.msra.mxu0 %vm293_vm9, %v1197_v16 }
 0x88c   :  { %2082 = vmatpush.xpose.msk.msra.mxu1 %vm293_vm9, %v1197_v16 }
 0x892   :  { %v1193_v18 = vpop.permute.xlu0 %1192 }
 0x893   :  { %2079 = vmatmul.msk.f32.vlgmr.msra.gmra.mxu0 %vm293_vm9, %v1193_v18 }
 0x89a   :  { %v1232_v33 = vpop.permute.xlu0 %1231 }
 0x89b   :  { %2080 = vmatmul.msk.f32.gmra.mxu0 %vm293_vm9, %v1195_v32  ;;  %2083 = vmatmul.msk.f32.vlgmr.msra.gmra.mxu1 %vm293_vm9, %v1232_v33 }
 0x8a3   :  { %2084 = vmatmul.msk.f32.gmra.mxu1 %vm293_vm9, %v1234_v35 }
 0x8a6   :  { %v1155_v19 = vpop.f32.mrf.mxu2 }
 0x8a7   :  { %v1262_v20 = vadd.f32 %v1155_v19, %v2634_v49 }
 0x8a9   :  { %v1270_v21 = vsel %vm293_vm9, %v1262_v20, -inf }
 0x8aa   :  { %1271 = vmax.xlane.f32.xlu1 %v1270_v21 }
 0x8ae   :  { %v1158_v38 = vpop.f32.mrf.mxu2 }
 0x8af   :  { %v1263_v22 = vadd.f32 %v1158_v38, %v2642_v54 }
 0x8b1   :  { %v1273_v3 = vsel %vm293_vm9, %v1263_v22, -inf }
 0x8b2   :  { %1274 = vmax.xlane.f32.xlu0 %v1273_v3 }
 0x906   :  { %v1186_v41 = vpop.f32.mrf.mxu3 }
 0x907   :  { %v1264_v23 = vadd.f32 %v1186_v41, %v2649_v58 }
 0x909   :  { %v1276_v44 = vsel %vm293_vm9, %v1264_v23, -inf }
 0x90a   :  { %1277 = vmax.xlane.f32.xlu2 %v1276_v44 }
 0x90e   :  { %v1189_v46 = vpop.f32.mrf.mxu3 }
 0x90f   :  { %v1265_v24 = vadd.f32 %v1189_v46, %v2663_v8 }
 0x910   :  { %v1225_v1 = vpop.f32.mrf.mxu0 }
 0x911   :  { %v1266_v49 = vadd.f32 %v1225_v1, %v2656_v62  ;;  %v1279_v26 = vsel %vm293_vm9, %v1265_v24, -inf }
 0x912   :  { %1280 = vmax.xlane.f32.xlu0 %v1279_v26 }
 0x913   :  { %v1282_v54 = vsel %vm293_vm9, %v1266_v49, -inf }
 0x914   :  { %1283 = vmax.xlane.f32.xlu1 %v1282_v54 }
 0x918   :  { %v1228_v30 = vpop.f32.mrf.mxu0  ;;  %v1256_v31 = vpop.f32.mrf.mxu1 }
 0x919   :  { %v1267_v34 = vadd.f32 %v1228_v30, %v2673_v13  ;;  %v1268_v58 = vadd.f32 %v1256_v31, %v2668_v10 }
 0x91b   :  { %v1285_v36 = vsel %vm293_vm9, %v1267_v34, -inf  ;;  %v1288_v40 = vsel %vm293_vm9, %v1268_v58, -inf }
 0x91c   :  { %1286 = vmax.xlane.f32.xlu2 %v1285_v36  ;;  %1289 = vmax.xlane.f32.xlu1 %v1288_v40  ;;  %v2085_v40 = vld [vmem:[%s3276_s12 + $0x40] sm:$0xff] }
 0x91d   :  { %v1272_v8 = vpop.xlane.xlu1 %1271 }
 0x91e   :  { %v1294_v62 = vsub.f32 %v1262_v20, %v1272_v8 }
 0x920   :  { %v1302_v45 = vmul.f32 1.442695, %v1294_v62  ;;  %v1259_v48 = vpop.f32.mrf.mxu1  ;;  %v2088_v62 = vld [vmem:[%s3276_s12 + $0x58] sm:$0xff] }
 0x921   :  { %v1269_v37 = vadd.f32 %v1259_v48, %v2686_v29  ;;  %1465 = vmatpush.msrb.mxu0 %v2088_v62  ;;  %v2111_v62 = vld [vmem:[%s3278_s14 + $0x88] sm:$0xff] }
 0x922   :  { %2240 = vpow2.f32 %v1302_v45 }
 0x923   :  { %v1291_v47 = vsel %vm293_vm9, %v1269_v37, -inf }
 0x924   :  { %1292 = vmax.xlane.f32.xlu0 %v1291_v47 }
 0x925   :  { %v1275_v25 = vpop.xlane.xlu0 %1274 }
 0x926   :  { %v1295_v13 = vsub.f32 %v1263_v22, %v1275_v25 }
 0x928   :  { %v2241_v51 = vpop.eup %2240  ;;  %v1304_v10 = vmul.f32 1.442695, %v1295_v13 }
 0x929   :  { %v1318_v52 = vsel %vm293_vm9, %v2241_v51, 0.0 }
 0x92a   :  { %2242 = vpow2.f32 %v1304_v10  ;;  %1319 = vadd.xlane.f32.xlu2 %v1318_v52 }
 0x930   :  { %v2243_v0 = vpop.eup %2242 }
 0x931   :  { %v1321_v5 = vsel %vm293_vm9, %v2243_v0, 0.0 }
 0x932   :  { %1322 = vadd.xlane.f32.xlu0 %v1321_v5 }
 0x935   :  { %2168 = vrot.lane.b32.xlu1 %v2167_v2, %s2306_s22 }
 0x97d   :  { %v1278_v29 = vpop.xlane.xlu2 %1277 }
 0x97e   :  { %v1296_v7 = vsub.f32 %v1264_v23, %v1278_v29 }
 0x980   :  { %v1306_v53 = vmul.f32 1.442695, %v1296_v7 }
 0x982   :  { %2244 = vpow2.f32 %v1306_v53 }
 0x985   :  { %v1281_v55 = vpop.xlane.xlu0 %1280 }
 0x986   :  { %v1297_v56 = vsub.f32 %v1265_v24, %v1281_v55 }
 0x987   :  { %v1284_v59 = vpop.xlane.xlu1 %1283 }
 0x988   :  { %v2245_v60 = vpop.eup %2244  ;;  %v1308_v57 = vmul.f32 1.442695, %v1297_v56  ;;  %v1298_v61 = vsub.f32 %v1266_v49, %v1284_v59  ;;  %v2087_v56 = vld [vmem:[%s3276_s12 + $0x50] sm:$0xff]  ;;  %v2090_v59 = vld [vmem:[%s3276_s12 + $0x68] sm:$0xff] }
 0x989   :  { %v1324_v63 = vsel %vm293_vm9, %v2245_v60, 0.0  ;;  %1466 = vmatpush.msrb.mxu0 %v2087_v56 }
 0x98a   :  { %2246 = vpow2.f32 %v1308_v57  ;;  %v1310_v6 = vmul.f32 1.442695, %v1298_v61  ;;  %1325 = vadd.xlane.f32.xlu2 %v1324_v63  ;;  %v2092_v57 = vld [vmem:[%s3276_s12 + $0x78] sm:$0xff]  ;;  %v2091_v63 = vld [vmem:[%s3276_s12 + $0x70] sm:$0xff] }
 0x98b   :  { %1574 = vmatpush.msra.mxu0 %v2092_v57 }
 0x98c   :  { %2248 = vpow2.f32 %v1310_v6 }
 0x98d   :  { %1575 = vmatpush.msra.mxu0 %v2091_v63 }
 0x98f   :  { %v1287_v9 = vpop.xlane.xlu2 %1286  ;;  %v1290_v39 = vpop.xlane.xlu1 %1289 }
 0x990   :  { %v2247_v43 = vpop.eup %2246  ;;  %v1299_v4 = vsub.f32 %v1267_v34, %v1287_v9  ;;  %v1300_v11 = vsub.f32 %v1268_v58, %v1290_v39  ;;  %v2086_v34 = vld [vmem:[%s3276_s12 + $0x48] sm:$0xff] }
 0x991   :  { %v1327_v12 = vsel %vm293_vm9, %v2247_v43, 0.0  ;;  %1434 = vmatpush.msra.mxu3 %v2086_v34  ;;  %v2114_v34 = vld [vmem:[%s3278_s14 + $0xa0] sm:$0xff] }
 0x992   :  { %v2249_v27 = vpop.eup %2248  ;;  %v1312_v15 = vmul.f32 1.442695, %v1299_v4  ;;  %v1314_v14 = vmul.f32 1.442695, %v1300_v11  ;;  %1328 = vadd.xlane.f32.xlu2 %v1327_v12 }
 0x993   :  { %v1330_v16 = vsel %vm293_vm9, %v2249_v27, 0.0  ;;  %1435 = vmatpush.msra.mxu3 %v2085_v40  ;;  %v2113_v40 = vld [vmem:[%s3278_s14 + $0x98] sm:$0xff] }
 0x994   :  { %2250 = vpow2.f32 %v1312_v15  ;;  %1331 = vadd.xlane.f32.xlu0 %v1330_v16 }
 0x995   :  { %2252 = vpow2.f32 %v1314_v14  ;;  %1543 = vmatpush.msrb.mxu3 %v2090_v59 }
 0x997   :  { %v1293_v17 = vpop.xlane.xlu0 %1292 }
 0x998   :  { %v1301_v18 = vsub.f32 %v1269_v37, %v1293_v17 }
 0x99a   :  { %v2251_v32 = vpop.eup %2250  ;;  %v1316_v33 = vmul.f32 1.442695, %v1301_v18 }
 0x99b   :  { %v2253_v35 = vpop.eup %2252  ;;  %v1333_v19 = vsel %vm293_vm9, %v2251_v32, 0.0 }
 0x99c   :  { %2254 = vpow2.f32 %v1316_v33  ;;  %v1336_v20 = vsel %vm293_vm9, %v2253_v35, 0.0  ;;  %1334 = vadd.xlane.f32.xlu2 %v1333_v19 }
 0x99d   :  { %1337 = vadd.xlane.f32.xlu1 %v1336_v20  ;;  %v1320_v21 = vpop.xlane.xlu2 %1319 }
 0x99e   :  { %2256 = vrcp.f32 %v1320_v21 }
 0x9a2   :  { %v2255_v38 = vpop.eup %2254 }
 0x9a3   :  { %v1339_v22 = vsel %vm293_vm9, %v2255_v38, 0.0 }
 0x9a4   :  { %1340 = vadd.xlane.f32.xlu2 %v1339_v22  ;;  %v2257_v23 = vpop.eup %2256 }
 0x9a5   :  { %v1323_v3 = vpop.xlane.xlu0 %1322  ;;  %v1350_v24 = vmul.f32 %v2257_v23, %v2241_v51 }
 0x9a6   :  { %2258 = vrcp.f32 %v1323_v3 }
 0x9a7   :  { %v2169_v41 = vpop.permute.xlu1 %2168 }
 0x9a8   :  { %v2170_v44 = vunpack.i.l.bf16 %v2169_v41  ;;  %2173 = vrot.lane.b32.xlu0 %v2167_v2, %s3317_s4  ;;  %v2171_v46 = vunpack.i.h.bf16 %v2169_v41 }
 0x9aa   :  { %1399 = vmatpush.msrb.mxu2 %v2170_v44  ;;  %v2125_v44 = vld [vmem:[%s3278_s14 + $0xf8] sm:$0xff] }
 0x9ac   :  { %1400 = vmatpush.msrb.mxu2 %v2171_v46  ;;  %v2259_v1 = vpop.eup %2258  ;;  %v2122_v46 = vld [vmem:[%s3278_s14 + $0xe0] sm:$0xff] }
 0x9ad   :  { %2093 = vmatmul.msk.f32.vlgmr.msrb.gmra.mxu2 %vm293_vm9, %v1350_v24  ;;  %v1351_v49 = vmul.f32 %v2259_v1, %v2243_v0  ;;  %v2123_v24 = vld [vmem:[%s3278_s14 + $0xe8] sm:$0xff]  ;;  %v2120_v1 = vld [vmem:[%s3278_s14 + $0xd0] sm:$0xff] }
 0x9b5   :  { %2094 = vmatmul.msk.f32.gmra.mxu2 %vm293_vm9, %v1351_v49  ;;  %v2121_v49 = vld [vmem:[%s3278_s14 + $0xd8] sm:$0xff] }
 0x9fd   :  { %v1326_v26 = vpop.xlane.xlu2 %1325 }
 0x9fe   :  { %2260 = vrcp.f32 %v1326_v26  ;;  %v2118_v26 = vld [vmem:[%s3278_s14 + $0xc0] sm:$0xff] }
 0xa04   :  { %v2261_v54 = vpop.eup %2260 }
 0xa05   :  { %v1329_v30 = vpop.xlane.xlu2 %1328  ;;  %v1352_v31 = vmul.f32 %v2261_v54, %v2245_v60  ;;  %v2089_v60 = vld [vmem:[%s3276_s12 + $0x60] sm:$0xff]  ;;  %v2119_v54 = vld [vmem:[%s3278_s14 + $0xc8] sm:$0xff] }
 0xa06   :  { %2262 = vrcp.f32 %v1329_v30  ;;  %1544 = vmatpush.msrb.mxu3 %v2089_v60  ;;  %v2116_v30 = vld [vmem:[%s3278_s14 + $0xb0] sm:$0xff] }
 0xa07   :  { %2095 = vmatmul.msk.f32.gmra.mxu2 %vm293_vm9, %v1352_v31  ;;  %v1332_v8 = vpop.xlane.xlu0 %1331  ;;  %v2117_v31 = vld [vmem:[%s3278_s14 + $0xb8] sm:$0xff] }
 0xa08   :  { %2264 = vrcp.f32 %v1332_v8  ;;  %v2110_v8 = vld [vmem:[%s3278_s14 + $0x80] sm:$0xff] }
 0xa0c   :  { %v2263_v58 = vpop.eup %2262 }
 0xa0d   :  { %v1353_v36 = vmul.f32 %v2263_v58, %v2247_v43  ;;  %v2115_v58 = vld [vmem:[%s3278_s14 + $0xa8] sm:$0xff] }
 0xa0e   :  { %v2265_v37 = vpop.eup %2264 }
 0xa0f   :  { %2096 = vmatmul.msk.f32.gmra.mxu2 %vm293_vm9, %v1353_v36  ;;  %v1335_v45 = vpop.xlane.xlu2 %1334  ;;  %v1354_v13 = vmul.f32 %v2265_v37, %v2249_v27  ;;  %v2112_v36 = vld [vmem:[%s3278_s14 + $0x90] sm:$0xff] }
 0xa10   :  { %2266 = vrcp.f32 %v1335_v45  ;;  %v1338_v51 = vpop.xlane.xlu1 %1337 }
 0xa11   :  { %2268 = vrcp.f32 %v1338_v51 }
 0xa16   :  { %v2267_v10 = vpop.eup %2266 }
 0xa17   :  { %v1355_v52 = vmul.f32 %v2267_v10, %v2251_v32  ;;  %v1341_v0 = vpop.xlane.xlu2 %1340  ;;  %v2269_v5 = vpop.eup %2268 }
 0xa18   :  { %2270 = vrcp.f32 %v1341_v0  ;;  %v1356_v2 = vmul.f32 %v2269_v5, %v2253_v35 }
 0xa1a   :  { %v2174_v48 = vpop.permute.xlu0 %2173 }
 0xa1b   :  { %v2175_v47 = vunpack.i.l.bf16 %v2174_v48  ;;  %v2176_v25 = vunpack.i.h.bf16 %v2174_v48 }
 0xa1d   :  { %1508 = vmatpush.msrb.mxu1 %v2175_v47 }
 0xa1e   :  { %v2271_v7 = vpop.eup %2270 }
 0xa1f   :  { %1509 = vmatpush.msrb.mxu1 %v2176_v25  ;;  %v1357_v53 = vmul.f32 %v2271_v7, %v2255_v38 }
 0xa20   :  { %2101 = vmatmul.msk.f32.vlgmr.msrb.gmra.mxu1 %vm293_vm9, %v1354_v13 }
 0xa28   :  { %2102 = vmatmul.msk.f32.gmra.mxu1 %vm293_vm9, %v1355_v52 }
 0xa30   :  { %v1402_v29 = vpop.f32.mrf.mxu2  ;;  %2103 = vmatmul.msk.f32.gmra.mxu1 %vm293_vm9, %v1356_v2 }
 0xa31   :  { %2097 = vmatmul.msk.f32.vlgmr.msra.gmra.mxu3 %vm293_vm9, %v1402_v29 }
 0xa32   :  { %1680 = vmatpush.msra.mxu3 %v2125_v44 }
 0xa34   :  { %1681 = vmatpush.msra.mxu3 %v2123_v24 }
 0xa36   :  { %1682 = vmatpush.msra.mxu3 %v2121_v49 }
 0xa38   :  { %v1405_v55 = vpop.f32.mrf.mxu2  ;;  %2104 = vmatmul.msk.f32.gmra.mxu1 %vm293_vm9, %v1357_v53  ;;  %1683 = vmatpush.msra.mxu3 %v2119_v54  ;;  %v2180_v53 = vld [vmem:[%s3277_s13 + $0x1] ss:$0 sm:$0xff] }
 0xa39   :  { %2098 = vmatmul.msk.f32.gmra.mxu3 %vm293_vm9, %v1405_v55 }
 0xa3a   :  { %1684 = vmatpush.msra.mxu3 %v2117_v31 }
 0xa3c   :  { %1685 = vmatpush.msra.mxu3 %v2115_v58 }
 0xa3e   :  { %1686 = vmatpush.msra.mxu3 %v2113_v40 }
 0xa40   :  { %1687 = vmatpush.msra.mxu3 %v2111_v62 }
 0xa8a   :  { %v1408_v61 = vpop.f32.mrf.mxu2 }
 0xa8b   :  { %2099 = vmatmul.msk.f32.vlgmr.msrb.gmra.mxu0 %vm293_vm9, %v1408_v61 }
 0xa92   :  { %v1411_v6 = vpop.f32.mrf.mxu2 }
 0xa93   :  { %2100 = vmatmul.msk.f32.gmra.mxu0 %vm293_vm9, %v1411_v6 }
 0xa9d   :  { %v1511_v9 = vpop.f32.mrf.mxu1 }
 0xa9e   :  { %2105 = vmatmul.msk.f32.vlgmr.msrb.gmra.mxu3 %vm293_vm9, %v1511_v9 }
 0xaa5   :  { %v1514_v39 = vpop.f32.mrf.mxu1 }
 0xaa6   :  { %2106 = vmatmul.msk.f32.gmra.mxu3 %vm293_vm9, %v1514_v39 }
 0xaad   :  { %v1517_v43 = vpop.f32.mrf.mxu1 }
 0xaae   :  { %2107 = vmatmul.msk.f32.vlgmr.msra.gmra.mxu0 %vm293_vm9, %v1517_v43  ;;  %v2147_v43 = vld [vmem:[%s3279_s15 + $0xf8] sm:$0xff] }
 0xaaf   :  { %1754 = vmatpush.msra.mxu1 %v2147_v43  ;;  %v1850_v43 = vld [vmem:[%s3281_s17 + $0x38] sm:$0xff] }
 0xab4   :  { %v1437_v11 = vpop.f32.mrf.mxu3 }
 0xab5   :  { %v1520_v4 = vpop.f32.mrf.mxu1  ;;  %v1443_v16 = vadd.f32 %v1437_v11, %v2872_v42  ;;  %v2145_v11 = vld [vmem:[%s3279_s15 + $0xe8] sm:$0xff] }
 0xab6   :  { %2108 = vmatmul.msk.f32.gmra.mxu0 %vm293_vm9, %v1520_v4  ;;  %v2146_v4 = vld [vmem:[%s3279_s15 + $0xf0] sm:$0xff] }
 0xab7   :  { %1755 = vmatpush.msra.mxu1 %v2146_v4 }
 0xab9   :  { %1756 = vmatpush.msra.mxu1 %v2145_v11  ;;  %v1847_v11 = vld [vmem:[%s3281_s17 + $0x20] sm:$0xff] }
 0xabc   :  { %v1440_v27 = vpop.f32.mrf.mxu3 }
 0xabd   :  { %v1444_v35 = vadd.f32 %v1440_v27, %v2878_v50  ;;  %v2124_v50 = vld [vmem:[%s3278_s14 + $0xf0] sm:$0xff]  ;;  %v2143_v27 = vld [vmem:[%s3279_s15 + $0xd8] sm:$0xff] }
 0xabe   :  { %1657 = vmatpush.msra.mxu2 %v2124_v50 }
 0xac0   :  { %1658 = vmatpush.msra.mxu2 %v2122_v46 }
 0xac2   :  { %1659 = vmatpush.msra.mxu2 %v2120_v1 }
 0xac4   :  { %1660 = vmatpush.msra.mxu2 %v2118_v26 }
 0xac6   :  { %1661 = vmatpush.msra.mxu2 %v2116_v30 }
 0xac8   :  { %1662 = vmatpush.msra.mxu2 %v2114_v34 }
 0xaca   :  { %1663 = vmatpush.msra.mxu2 %v2112_v36 }
 0xacc   :  { %1664 = vmatpush.msra.mxu2 %v2110_v8 }
 0xace   :  { %1866 = vmatpush.msrb.mxu2 %v1850_v43 }
 0xb08   :  { %v1468_v12 = vpop.f32.mrf.mxu0 }
 0xb09   :  { %v1474_v17 = vadd.f32 %v1468_v12, %v1443_v16  ;;  %v2144_v12 = vld [vmem:[%s3279_s15 + $0xe0] sm:$0xff] }
 0xb0a   :  { %1757 = vmatpush.msra.mxu1 %v2144_v12  ;;  %v2140_v16 = vld [vmem:[%s3279_s15 + $0xc0] sm:$0xff] }
 0xb0c   :  { %1758 = vmatpush.msra.mxu1 %v2143_v27  ;;  %v1846_v27 = vld [vmem:[%s3281_s17 + $0x18] sm:$0xff] }
 0xb10   :  { %v1471_v15 = vpop.f32.mrf.mxu0 }
 0xb11   :  { %v1475_v21 = vadd.f32 %v1471_v15, %v1444_v35  ;;  %v2142_v15 = vld [vmem:[%s3279_s15 + $0xd0] sm:$0xff]  ;;  %v2136_v35 = vld [vmem:[%s3279_s15 + $0xa0] sm:$0xff] }
 0xb12   :  { %1759 = vmatpush.msra.mxu1 %v2142_v15 }
 0xb21   :  { %v1546_v14 = vpop.f32.mrf.mxu3 }
 0xb22   :  { %v1552_v18 = vadd.f32 %v1546_v14, %v1474_v17  ;;  %v2141_v14 = vld [vmem:[%s3279_s15 + $0xc8] sm:$0xff]  ;;  %v2139_v17 = vld [vmem:[%s3279_s15 + $0xb8] sm:$0xff] }
 0xb23   :  { %1760 = vmatpush.msra.mxu1 %v2141_v14 }
 0xb25   :  { %1761 = vmatpush.msra.mxu1 %v2140_v16 }
 0xb27   :  { %1762 = vmatpush.msra.mxu1 %v2139_v17  ;;  %v1845_v17 = vld [vmem:[%s3281_s17 + $0x10] sm:$0xff] }
 0xb29   :  { %v1549_v20 = vpop.f32.mrf.mxu3 }
 0xb2a   :  { %v1553_v22 = vadd.f32 %v1549_v20, %v1475_v21  ;;  %v2134_v20 = vld [vmem:[%s3279_s15 + $0x90] sm:$0xff]  ;;  %v2133_v21 = vld [vmem:[%s3279_s15 + $0x88] sm:$0xff] }
 0xb2b   :  { %v1577_v32 = vpop.f32.mrf.mxu0 }
 0xb2c   :  { %v3079_v33 = vadd.f32 %v1577_v32, %v1552_v18  ;;  %v2138_v18 = vld [vmem:[%s3279_s15 + $0xb0] sm:$0xff]  ;;  %v2137_v32 = vld [vmem:[%s3279_s15 + $0xa8] sm:$0xff] }
 0xb2d   :  { %1763 = vmatpush.msra.mxu1 %v2138_v18 }
 0xb2e   :  { %v1585_v19 = vmul.f32 %v3079_v33, %v3079_v33 }
 0xb2f   :  { %1764 = vmatpush.msra.mxu1 %v2137_v32 }
 0xb30   :  { %v1587_v38 = vsel %vm106_vm0, %v1585_v19, 0.0  ;;  %v2135_v19 = vld [vmem:[%s3279_s15 + $0x98] sm:$0xff] }
 0xb31   :  { %1588 = vadd.xlane.f32.xlu2 %v1587_v38  ;;  %1765 = vmatpush.msra.mxu1 %v2136_v35 }
 0xb33   :  { %v1580_v3 = vpop.f32.mrf.mxu0  ;;  %1766 = vmatpush.msra.mxu1 %v2135_v19 }
 0xb34   :  { %v3085_v41 = vadd.f32 %v1580_v3, %v1553_v22  ;;  %v2132_v22 = vld [vmem:[%s3279_s15 + $0x80] sm:$0xff] }
 0xb35   :  { %1767 = vmatpush.msra.mxu1 %v2134_v20 }
 0xb36   :  { %v1586_v42 = vmul.f32 %v3085_v41, %v3085_v41 }
 0xb37   :  { %1768 = vmatpush.msra.mxu1 %v2133_v21 }
 0xb38   :  { %v1590_v23 = vsel %vm106_vm0, %v1586_v42, 0.0 }
 0xb39   :  { %1591 = vadd.xlane.f32.xlu0 %v1590_v23  ;;  %1769 = vmatpush.msra.mxu1 %v2132_v22 }
 0xba4   :  { %v1589_v45 = vpop.xlane.xlu2 %1588 }
 0xba5   :  { %v1593_v48 = vmul.f32 %v1589_v45, %v2493_v28 }
 0xba7   :  { %v1595_v37 = vadd.f32 1e-05, %v1593_v48 }
 0xba9   :  { %2272 = vrsqrt.f32 %v1595_v37  ;;  %vm1603_vm3 = vweird.f32 %v1595_v37 }
 0xbac   :  { %v1592_v47 = vpop.xlane.xlu0 %1591 }
 0xbad   :  { %v1594_v25 = vmul.f32 %v1592_v47, %v2493_v28 }
 0xbaf   :  { %v2273_v13 = vpop.eup %2272  ;;  %v1596_v51 = vadd.f32 1e-05, %v1594_v25 }
 0xbb0   :  { %v1598_v10 = vmul.f32 %v2273_v13, %v1595_v37  ;;  %vm1604_vm2 = vweird.f32 %v2273_v13 }
 0xbb1   :  { %2274 = vrsqrt.f32 %v1596_v51  ;;  %vm1605_vm4 = vmor %vm1603_vm3, %vm1604_vm2  ;;  %vm1613_vm6 = vweird.f32 %v1596_v51 }
 0xbb2   :  { %v1599_v52 = vmul.f32 %v2273_v13, %v1598_v10 }
 0xbb4   :  { %v1600_v0 = vmul.f32 0.5, %v1599_v52 }
 0xbb6   :  { %v1601_v5 = vsub.f32 1.5, %v1600_v0 }
 0xbb7   :  { %v2275_v2 = vpop.eup %2274 }
 0xbb8   :  { %v1602_v29 = vmul.f32 %v2273_v13, %v1601_v5  ;;  %v1608_v7 = vmul.f32 %v2275_v2, %v1596_v51  ;;  %vm1614_vm5 = vweird.f32 %v2275_v2 }
 0xbb9   :  { %vm1615_vm7 = vmor %vm1613_vm6, %vm1614_vm5 }
 0xbba   :  { %v1606_v55 = vsel %vm1605_vm4, %v2273_v13, %v1602_v29  ;;  %v1609_v56 = vmul.f32 %v2275_v2, %v1608_v7 }
 0xbbb   :  { %v1617_v59 = vmul.f32 %v1606_v55, %v3079_v33 }
 0xbbc   :  { %v1610_v60 = vmul.f32 0.5, %v1609_v56 }
 0xbbd   :  { %v1624_v57 = vmul.f32 %v2180_v53, %v1617_v59 }
 0xbbe   :  { %v1611_v61 = vsub.f32 1.5, %v1610_v60 }
 0xbbf   :  { %2126 = vmatmul.msk.f32.vlgmr.msra.gmra.mxu2 %vm106_vm0, %v1624_v57  ;;  %2128 = vmatmul.msk.f32.vlgmr.msra.gmra.mxu3 %vm106_vm0, %v1624_v57 }
 0xbc0   :  { %v1612_v63 = vmul.f32 %v2275_v2, %v1611_v61 }
 0xbc2   :  { %v1616_v6 = vsel %vm1615_vm7, %v2275_v2, %v1612_v63 }
 0xbc3   :  { %v1618_v9 = vmul.f32 %v1616_v6, %v3085_v41 }
 0xbc5   :  { %v1625_v39 = vmul.f32 %v2180_v53, %v1618_v9 }
 0xbc7   :  { %2127 = vmatmul.msk.f32.gmra.mxu2 %vm106_vm0, %v1625_v39  ;;  %2129 = vmatmul.msk.f32.gmra.mxu3 %vm106_vm0, %v1625_v39 }
 0xc42   :  { %v1666_v38 = vpop.f32.mrf.mxu2  ;;  %v1689_v45 = vpop.f32.mrf.mxu3 }
 0xc43   :  { %v2130_v3 = vmul.f32 -1.442695, %v1666_v38 }
 0xc45   :  { %2276 = vpow2.f32 %v2130_v3 }
 0xc4a   :  { %v1669_v42 = vpop.f32.mrf.mxu2  ;;  %v1692_v29 = vpop.f32.mrf.mxu3 }
 0xc4b   :  { %v2277_v23 = vpop.eup %2276  ;;  %v2131_v50 = vmul.f32 -1.442695, %v1669_v42 }
 0xc4c   :  { %v1701_v44 = vadd.f32 1.0, %v2277_v23 }
 0xc4d   :  { %2278 = vpow2.f32 %v2131_v50 }
 0xc4e   :  { %2280 = vrcp.f32 %v1701_v44  ;;  %v1714_v54 = vand.u32 2147483648, %v1701_v44  ;;  %v1712_v31 = vand.u32 2147483647, %v1701_v44  ;;  %vm1708_vm11 = vweird.f32 %v1701_v44 }
 0xc50   :  { %v1715_v36 = vor.u32 1.1754944e-38, %v1714_v54  ;;  %vm1713_vm13 = vcmp.eq.f32.partialorder %v1712_v31, 8.507059e+37  ;;  %v1843_v54 = vld [vmem:[%s3281_s17] sm:$0xff] }
 0xc51   :  { %v2182_v31 = vld [vmem:[%s3283_s18] ss:$0 sm:$0xff] }
 0xc53   :  { %v2279_v46 = vpop.eup %2278 }
 0xc54   :  { %v2281_v24 = vpop.eup %2280  ;;  %v1702_v1 = vadd.f32 1.0, %v2279_v46 }
 0xc55   :  { %v1704_v49 = vmul.f32 %v2281_v24, %v1701_v44  ;;  %vm1709_vm10 = vweird.f32 %v2281_v24 }
 0xc56   :  { %2282 = vrcp.f32 %v1702_v1  ;;  %vm1710_vm12 = vmor %vm1708_vm11, %vm1709_vm10  ;;  %v1729_v47 = vand.u32 2147483648, %v1702_v1  ;;  %v1727_v51 = vand.u32 2147483647, %v1702_v1  ;;  %vm1723_vm15 = vweird.f32 %v1702_v1 }
 0xc57   :  { %v1705_v26 = vsub.f32 1.0, %v1704_v49  ;;  %vm1878_vm11 = vcmask 254976  }
 0xc58   :  { %v1730_v52 = vor.u32 1.1754944e-38, %v1729_v47  ;;  %vm1728_vm2 = vcmp.eq.f32.partialorder %v1727_v51, 8.507059e+37 }
 0xc59   :  { %v1706_v30 = vmul.f32 %v2281_v24, %v1705_v26  ;;  %v1819_v26 = vld [vmem:[%s3282_s8] sm:$0x3] }
 0xc5b   :  { %v1707_v34 = vadd.f32 %v2281_v24, %v1706_v30 }
 0xc5c   :  { %v2283_v58 = vpop.eup %2282 }
 0xc5d   :  { %v1711_v40 = vsel %vm1710_vm12, %v2281_v24, %v1707_v34  ;;  %v1719_v8 = vmul.f32 %v2283_v58, %v1702_v1  ;;  %vm1724_vm14 = vweird.f32 %v2283_v58 }
 0xc5e   :  { %v1716_v62 = vsel %vm1713_vm13, %v1715_v36, %v1711_v40  ;;  %vm1725_vm1 = vmor %vm1723_vm15, %vm1724_vm14  ;;  %v2308_v40 = vmov 32.0  }
 0xc5f   :  { %v1733_v48 = vmul.f32 %v1716_v62, %v1666_v38  ;;  %v1720_v37 = vsub.f32 1.0, %v1719_v8  ;;  %v2181_v38 = vld [vmem:[%s3280_s16] ss:$0 sm:$0xff] }
 0xc61   :  { %v1735_v25 = vmul.f32 %v1733_v48, %v1689_v45  ;;  %v1721_v13 = vmul.f32 %v2283_v58, %v1720_v37 }
 0xc63   :  { %v1722_v10 = vadd.f32 %v2283_v58, %v1721_v13  ;;  %1770 = vmatmul.f32.vlgmr.msra.gmra.mxu1 %v1735_v25 }
 0xc65   :  { %v1726_v0 = vsel %vm1725_vm1, %v2283_v58, %v1722_v10 }
 0xc66   :  { %v1731_v5 = vsel %vm1728_vm2, %v1730_v52, %v1726_v0 }
 0xc67   :  { %v1734_v2 = vmul.f32 %v1731_v5, %v1669_v42 }
 0xc69   :  { %v1736_v7 = vmul.f32 %v1734_v2, %v1692_v29  ;;  %v1965_v2 = vld [vmem:[%s3287_s21 + $0x18] sm:$0xff]  ;;  %v1964_v29 = vld [vmem:[%s3287_s21 + $0x10] sm:$0xff] }
 0xc6b   :  { %1773 = vmatmul.f32.gmra.mxu1 %v1736_v7 }
 0xce0   :  { %v1771_v53 = vpop.f32.mrf.mxu1 }
 0xce1   :  { %v1777_v60 = vadd.f32 %v1771_v53, %v3079_v33  ;;  %v1848_v33 = vld [vmem:[%s3281_s17 + $0x28] sm:$0xff] }
 0xce2   :  { %v1963_v53 = vld [vmem:[%s3287_s21 + $0x8] sm:$0xff] }
 0xce3   :  { %v1779_v61 = vmul.f32 %v1777_v60, %v1777_v60 }
 0xce5   :  { %v1781_v63 = vsel %vm106_vm0, %v1779_v61, 0.0 }
 0xce8   :  { %v1774_v55 = vpop.f32.mrf.mxu1 }
 0xce9   :  { %v1778_v56 = vadd.f32 %v1774_v55, %v3085_v41  ;;  %v1849_v41 = vld [vmem:[%s3281_s17 + $0x30] sm:$0xff]  ;;  %v1962_v55 = vld [vmem:[%s3287_s21] sm:$0xff]  ;;  %s3318_s21 = sld [smem:[#allocation10_spill]] }
 0xcea   :  { %1867 = vmatpush.msrb.mxu2 %v1849_v41 }
 0xceb   :  { %v1780_v59 = vmul.f32 %v1778_v56, %v1778_v56 }
 0xcec   :  { %1868 = vmatpush.msrb.mxu2 %v1848_v33 }
 0xced   :  { %v1784_v57 = vsel %vm106_vm0, %v1780_v59, 0.0 }
 0xcee   :  { %1785 = vadd.xlane.f32.xlu2 %v1784_v57  ;;  %1869 = vmatpush.msrb.mxu2 %v1847_v11 }
 0xcf0   :  { %1870 = vmatpush.msrb.mxu2 %v1846_v27 }
 0xcf2   :  { %1871 = vmatpush.msrb.mxu2 %v1845_v17 }
 0xcf6   :  { %1782 = vadd.xlane.f32.xlu2 %v1781_v63 }
 0xd61   :  { %v1786_v6 = vpop.xlane.xlu2 %1785 }
 0xd62   :  { %v1788_v9 = vmul.f32 %v1786_v6, %v2493_v28  ;;  %v2183_v6 = vld [vmem:[%s3284_s19] ss:$0 sm:$0xff] }
 0xd64   :  { %v1790_v39 = vadd.f32 1e-05, %v1788_v9 }
 0xd66   :  { %2284 = vrsqrt.f32 %v1790_v39  ;;  %vm1807_vm4 = vweird.f32 %v1790_v39 }
 0xd69   :  { %v1783_v4 = vpop.xlane.xlu2 %1782 }
 0xd6a   :  { %v1787_v12 = vmul.f32 %v1783_v4, %v2493_v28  ;;  %v1844_v28 = vld [vmem:[%s3281_s17 + $0x8] sm:$0xff] }
 0xd6b   :  { %1872 = vmatpush.msrb.mxu2 %v1844_v28 }
 0xd6c   :  { %v2285_v15 = vpop.eup %2284  ;;  %v1789_v14 = vadd.f32 1e-05, %v1787_v12 }
 0xd6d   :  { %v1802_v16 = vmul.f32 %v2285_v15, %v1790_v39  ;;  %vm1808_vm3 = vweird.f32 %v2285_v15  ;;  %1873 = vmatpush.msrb.mxu2 %v1843_v54  ;;  %v2184_v39 = vld [vmem:[%s3285_s20] ss:$0 sm:$0xff] }
 0xd6e   :  { %2286 = vrsqrt.f32 %v1789_v14  ;;  %vm1809_vm5 = vmor %vm1807_vm4, %vm1808_vm3  ;;  %vm1797_vm7 = vweird.f32 %v1789_v14 }
 0xd6f   :  { %v1803_v18 = vmul.f32 %v2285_v15, %v1802_v16  ;;  %2288 = vrcp.f32 %v2308_v40 }
 0xd71   :  { %v1804_v32 = vmul.f32 0.5, %v1803_v18 }
 0xd73   :  { %v1805_v35 = vsub.f32 1.5, %v1804_v32 }
 0xd74   :  { %v2287_v19 = vpop.eup %2286 }
 0xd75   :  { %v1806_v20 = vmul.f32 %v2285_v15, %v1805_v35  ;;  %v1792_v21 = vmul.f32 %v2287_v19, %v1789_v14  ;;  %vm1798_vm6 = vweird.f32 %v2287_v19  ;;  %v2289_v8 = vpop.eup %2288 }
 0xd76   :  { %vm1799_vm10 = vmor %vm1797_vm7, %vm1798_vm6  ;;  %v1883_v62 = vmul.f32 32.0, %v2289_v8 }
 0xd77   :  { %v1810_v22 = vsel %vm1809_vm5, %v2285_v15, %v1806_v20  ;;  %v1793_v3 = vmul.f32 %v2287_v19, %v1792_v21 }
 0xd78   :  { %v1812_v42 = vmul.f32 %v1810_v22, %v1778_v56  ;;  %v1884_v45 = vsub.f32 1.0, %v1883_v62 }
 0xd79   :  { %v1794_v23 = vmul.f32 0.5, %v1793_v3 }
 0xd7a   :  { %v1818_v50 = vmul.f32 %v2181_v38, %v1812_v42  ;;  %v1885_v48 = vmul.f32 %v2289_v8, %v1884_v45 }
 0xd7b   :  { %v1795_v44 = vsub.f32 1.5, %v1794_v23 }
 0xd7c   :  { %1837 = vmatpush.msrb.mxu0 %v1818_v50  ;;  %v1886_v37 = vadd.f32 %v2289_v8, %v1885_v48 }
 0xd7d   :  { %v1796_v46 = vmul.f32 %v2287_v19, %v1795_v44 }
 0xd7f   :  { %v1800_v24 = vsel %vm1799_vm10, %v2287_v19, %v1796_v46 }
 0xd80   :  { %v1811_v1 = vmul.f32 %v1800_v24, %v1777_v60 }
 0xd82   :  { %v1817_v49 = vmul.f32 %v2181_v38, %v1811_v1 }
 0xd84   :  { %1838 = vmatpush.msrb.mxu0 %v1817_v49 }
 0xd85   :  { %2148 = vmatmul.msk.f32.vlgmr.msrb.gmra.mxu0 %vm293_vm9, %v1819_v26  ;;  %vm1887_vm9 = vweird.f32 %v2289_v8 }
 0xd86   :  { %v1888_v47 = vsel %vm1887_vm9, %v2289_v8, %v1886_v37  ;;  %1985 = vmatpush.msra.mxu0 %v1965_v2 }
 0xd88   :  { %1986 = vmatpush.msra.mxu0 %v1964_v29 }
 0xd8a   :  { %1987 = vmatpush.msra.mxu0 %v1963_v53 }
 0xd8c   :  { %1988 = vmatpush.msra.mxu0 %v1962_v55 }
 0xe02   :  { %v1840_v30 = vpop.f32.mrf.mxu0 }
 0xe03   :  { %2149 = vmatmul.msk.f32.vlgmr.msrb.gmra.mxu2 %vm106_vm0, %v1840_v30 }
 0xe86   :  { %v1875_v34 = vpop.f32.mrf.mxu2 }
 0xe87   :  { %v1876_v58 = vadd.f32 %v2182_v31, %v1875_v34 }
 0xe89   :  { %v1879_v36 = vsel %vm1878_vm11, %v1876_v58, 0.0 }
 0xe8a   :  { %1880 = vadd.xlane.f32.xlu2 %v1879_v36 }
 0xefd   :  { %v1881_v25 = vpop.xlane.xlu2 %1880 }
 0xefe   :  { %v1889_v13 = vmul.f32 %v1888_v47, %v1881_v25 }
 0xf00   :  { %v1890_v51 = vsub.f32 %v1876_v58, %v1889_v13 }
 0xf02   :  { %v1891_v10 = vmul.f32 %v1890_v51, %v1890_v51 }
 0xf04   :  { %v1892_v52 = vsel %vm1878_vm11, %v1891_v10, 0.0 }
 0xf05   :  { %1893 = vadd.xlane.f32.xlu2 %v1892_v52 }
 0xf78   :  { %v1894_v0 = vpop.xlane.xlu2 %1893 }
 0xf79   :  { %v1895_v5 = vmul.f32 %v1894_v0, %v1888_v47  ;;  %v2185_v47 = vld [vmem:[%s3318_s21] ss:$0 sm:$0xff] }
 0xf7b   :  { %v1896_v7 = vadd.f32 1e-05, %v1895_v5 }
 0xf7d   :  { %2290 = vrsqrt.f32 %v1896_v7  ;;  %vm1903_vm12 = vweird.f32 %v1896_v7 }
 0xf83   :  { %v2291_v56 = vpop.eup %2290 }
 0xf84   :  { %v1898_v59 = vmul.f32 %v2291_v56, %v1896_v7  ;;  %vm1904_vm0 = vweird.f32 %v2291_v56 }
 0xf85   :  { %vm1905_vm13 = vmor %vm1903_vm12, %vm1904_vm0 }
 0xf86   :  { %v1899_v60 = vmul.f32 %v2291_v56, %v1898_v59 }
 0xf88   :  { %v1900_v57 = vmul.f32 0.5, %v1899_v60 }
 0xf8a   :  { %v1901_v61 = vsub.f32 1.5, %v1900_v57 }
 0xf8c   :  { %v1902_v63 = vmul.f32 %v2291_v56, %v1901_v61 }
 0xf8e   :  { %v1906_v9 = vsel %vm1905_vm13, %v2291_v56, %v1902_v63 }
 0xf8f   :  { %v1907_v43 = vmul.f32 %v1906_v9, %v1890_v51 }
 0xf91   :  { %v1912_v41 = vmul.f32 %v2183_v6, %v1907_v43 }
 0xf93   :  { %v1917_v33 = vadd.f32 %v2184_v39, %v1912_v41 }
 0xf95   :  { %v1919_v4 = vmul.f32 0.70710677, %v1917_v33  ;;  %v1918_v45 = vmul.f32 0.5, %v1917_v33 }
 0xf97   :  { %v1920_v11 = vmul.f32 %v1919_v4, %v1919_v4 }
 0xf99   :  { %v1921_v12 = vmin.f32 %v1920_v11, 16.0 }
 0xf9b   :  { %v1922_v27 = vmul.f32 2.1237322e-06, %v1921_v12  ;;  %v1933_v15 = vmul.f32 3.8918573e-05, %v1921_v12 }
 0xf9d   :  { %v1923_v14 = vadd.f32 0.00028619796, %v1922_v27  ;;  %v1934_v16 = vadd.f32 0.001143296, %v1933_v15 }
 0xf9f   :  { %v1924_v17 = vmul.f32 %v1923_v14, %v1921_v12  ;;  %v1935_v18 = vmul.f32 %v1934_v16, %v1921_v12 }
 0xfa1   :  { %v1936_v28 = vadd.f32 0.014752088, %v1935_v18  ;;  %v1925_v32 = vadd.f32 0.0036580483, %v1924_v17 }
 0xfa3   :  { %v1937_v35 = vmul.f32 %v1936_v28, %v1921_v12  ;;  %v1926_v20 = vmul.f32 %v1925_v32, %v1921_v12 }
 0xfa5   :  { %v1938_v19 = vadd.f32 0.112945676, %v1937_v35  ;;  %v1927_v22 = vadd.f32 0.05243302, %v1926_v20 }
 0xfa7   :  { %v1939_v21 = vmul.f32 %v1938_v19, %v1921_v12  ;;  %v1928_v23 = vmul.f32 %v1927_v22, %v1921_v12 }
 0xfa9   :  { %v1940_v38 = vadd.f32 0.4994258, %v1939_v21  ;;  %v1929_v50 = vadd.f32 0.18741608, %v1928_v23 }
 0xfab   :  { %v1941_v3 = vmul.f32 %v1940_v38, %v1921_v12  ;;  %v1930_v46 = vmul.f32 %v1929_v50, %v1921_v12 }
 0xfad   :  { %v1942_v42 = vadd.f32 1.0, %v1941_v3  ;;  %v1931_v26 = vadd.f32 1.1283791, %v1930_v46 }
 0xfaf   :  { %2292 = vrcp.f32 %v1942_v42  ;;  %v1954_v49 = vand.u32 2147483648, %v1942_v42  ;;  %v1952_v30 = vand.u32 2147483647, %v1942_v42  ;;  %vm1948_vm15 = vweird.f32 %v1942_v42 }
 0xfb0   :  { %v1932_v58 = vmul.f32 %v1931_v26, %v1919_v4 }
 0xfb1   :  { %v1955_v34 = vor.u32 1.1754944e-38, %v1954_v49  ;;  %vm1953_vm2 = vcmp.eq.f32.partialorder %v1952_v30, 8.507059e+37 }
 0xfb5   :  { %v2293_v44 = vpop.eup %2292 }
 0xfb6   :  { %v1944_v24 = vmul.f32 %v2293_v44, %v1942_v42  ;;  %vm1949_vm14 = vweird.f32 %v2293_v44 }
 0xfb7   :  { %vm1950_vm1 = vmor %vm1948_vm15, %vm1949_vm14 }
 0xfb8   :  { %v1945_v1 = vsub.f32 1.0, %v1944_v24 }
 0xfba   :  { %v1946_v54 = vmul.f32 %v2293_v44, %v1945_v1 }
 0xfbc   :  { %v1947_v31 = vadd.f32 %v2293_v44, %v1946_v54 }
 0xfbe   :  { %v1951_v36 = vsel %vm1950_vm1, %v2293_v44, %v1947_v31 }
 0xfbf   :  { %v1956_v40 = vsel %vm1953_vm2, %v1955_v34, %v1951_v36 }
 0xfc0   :  { %v1957_v8 = vmul.f32 %v1956_v40, %v1932_v58 }
 0xfc2   :  { %v2150_v62 = vclamps-f32 %v1957_v8, 1.0 }
 0xfc4   :  { %v1960_v48 = vadd.f32 1.0, %v2150_v62 }
 0xfc6   :  { %v1961_v37 = vmul.f32 %v1960_v48, %v1918_v45 }
 0xfc8   :  { %2151 = vmatmul.msk.f32.vlgmr.msra.gmra.mxu0 %vm259_vm8, %v1961_v37 }
0x1045   :  { %v1990_v25 = vpop.f32.mrf.mxu0 }
0x1046   :  { %v1991_v13 = vadd.f32 %v2185_v47, %v1990_v25 }
0x1048   :  { %1993 = vst [vmem:[%s3319_s28] sm:$0x3] %v1991_v13 }

</bundles_post_ra>
